<compile_context>
chip_gen: v7x
topology: tpu7x:2x2x1
jax: 0.10.0
libtpu: 0.0.40
codegen_flags: <defaults>
</compile_context>

<pallas_src>
import math

import jax
import jax.numpy as jnp
import numpy as np
from jax.experimental import pallas as pl
from jax.experimental.pallas import tpu as pltpu

BN_EPS = 1e-5


# ----------------------------------------------------------------------------- Pallas kernel ---
def _gc4d_block_kernel(x_ref, adj_ref, sadj_ref, tpre_ref, wbd_ref,
                       pool_ref, rall_ref, scale_ref, shift_ref, o_ref):
    """NB batch elements per grid step: gc1 -> bn1 -> tanh -> gc2 -> bn2 -> tanh -> + x."""
    NB, T, VC = x_ref.shape
    V = adj_ref.shape[0]
    C = VC // V
    inv = 1.0 / math.sqrt(C)            # out_features == in_features in GC4D_Block
    f32 = jnp.float32

    x0 = x_ref[...]                     # (NB, T, VC)  lane-dense, flat index k = v*C + c
    pool = pool_ref[...]                # (VC, VC)     per-node channel-mean (expanded over c)
    rall = rall_ref[...]                # (VC, V*VC)   source-node lane-tiling selector

    def softsign(z):
        d = 1.0 + jnp.abs(z)
        r = pl.reciprocal(d, approx=True)     # EUP slot (otherwise idle)
        r = r * (2.0 - d * r)                 # one Newton step -> ~f32 accuracy, 2 cheap VPU ops
        return z * r

    def layer(xf, li):
        # xf: (NB, T, VC) lane-dense input of this layer.
        xf2 = xf.reshape(NB * T, VC)
        # xm[n,t, v*C+c] = mean_c' xf[n,t, v*C+c']   (node-v channel mean, broadcast over c)
        xm = jnp.dot(xf2, pool, preferred_element_type=f32).reshape(NB, T, VC)
        # xt[n,t, i*VC+v*C+c] = xf[n,t, i*C+c]       (source node i tiled across all v groups)
        xt = jnp.dot(xf2, rall, preferred_element_type=f32).reshape(NB, T, V * VC)

        acc = jnp.zeros((NB, T, VC), f32)

        # Spatial aggregation: sum_i (s*adj + softsign((xm_v - xm_i)*adj)/sqrt(C)) * x[t,i,c]
        # (short unrolled loop of pure 128-lane FMAs; no per-i matmuls)
        for i in range(V):
            diff = xm - xm[:, :, i * C:i * C + 1]                     # xm[n,t,v] - xm[n,t,i]
            coef = sadj_ref[li, i][None] + softsign(diff * adj_ref[i][None]) * inv
            acc = acc + coef * xt[:, :, i * VC:(i + 1) * VC]

        # Temporal aggregation: sum_j (t + softsign(xm_t - xm_j)/sqrt(C)) * x[j,v,c]
        for j in range(T):
            diff = xm - xm[:, j:j + 1, :]                             # xm[n,t,v] - xm[n,j,v]
            coef = tpre_ref[li, j][None] + softsign(diff) * inv
            acc = acc + coef * xf[:, j:j + 1, :]

        # Per-node feature transform == one block-diagonal (VC, VC) MXU matmul,
        # then the fused (bias + eval-BatchNorm) affine and tanh.
        y = jnp.dot(acc.reshape(NB * T, VC), wbd_ref[li], preferred_element_type=f32)
        y = y * scale_ref[li] + shift_ref[li]
        return jnp.tanh(y).reshape(NB, T, VC)

    y = layer(x0, 0)
    # TODO(synk): nn.Dropout treated as identity (inference forward); training-mode RNG drop not implemented.
    y = layer(y, 1)
    o_ref[...] = y + x0                 # residual, dense 128-lane stores


# ----------------------------------------------------------------------------- wrapper ---------
def _pick_batch_block(n, t, target_rows=128):
    """Largest divisor nb of n with nb*t <= target_rows rows per grid step, while keeping
    >= 2 grid steps whenever n >= 2 so both TensorCores of a dual-core chip (v7x) stay busy.
    (On 1-TC chips this still amortizes grid-step overhead for realistic batch sizes.)"""
    best = 1
    for nb in range(1, n + 1):
        if n % nb:
            continue
        if nb * t > target_rows:
            break
        if n // nb >= 2 or n == 1:
            best = nb
    return best


def gc4d_block_forward(x, adj, params, *, target_rows=128):
    """GC4D_Block.forward (inference) via one fused pallas_call (grid over batch blocks)."""
    N, T, V, C = x.shape
    VC = V * C
    f32 = jnp.float32

    def expand_c(a):
        # a[..., v] -> out[..., v*C + c] = a[..., v]
        return jnp.repeat(a, C, axis=-1)

    def prep(gc, bn):
        s_p, t_p, w, bias = gc
        gamma, beta, rm, rv = bn
        sadj = expand_c(jnp.transpose(s_p * adj, (2, 0, 1)))      # (V_i, T, VC): s[t,v,i]*adj[t,v,i]
        tpre = expand_c(jnp.transpose(t_p, (2, 1, 0)))            # (T_j, T_t, VC): t[v,t,j]
        eye = jnp.eye(V, dtype=w.dtype)
        wbd = (w[:, :, None, :] * eye[:, None, :, None]).reshape(VC, VC)   # block-diag weight
        scale = gamma * jax.lax.rsqrt(rv + BN_EPS)                # fold eval-BN into per-channel affine
        shift = (bias - rm) * scale + beta
        return sadj, tpre, wbd, jnp.tile(scale, V), jnp.tile(shift, V)

    p1 = prep(params['gc1'], params['bn1'])
    p2 = prep(params['gc2'], params['bn2'])
    stack = lambda a, b: jnp.stack([a, b]).astype(f32)
    sadj = stack(p1[0], p2[0])                                    # (2, V, T, VC)
    tpre = stack(p1[1], p2[1])                                    # (2, T, T, VC)
    wbd = stack(p1[2], p2[2])                                     # (2, VC, VC)
    scale = stack(p1[3], p2[3]).reshape(2, 1, VC)
    shift = stack(p1[4], p2[4]).reshape(2, 1, VC)
    adj_exp = expand_c(jnp.transpose(adj, (2, 0, 1))).astype(f32)  # (V_i, T, VC): adj[t,v,i]

    # Constant selector matrices, hoisted out of the kernel (DMA'd once, fed straight to the MXU).
    pool = (jnp.kron(jnp.eye(V, dtype=f32), jnp.ones((C, C), f32)) / C)       # (VC, VC)
    ki = jnp.arange(VC)
    sel_i = (ki[:, None] // C) == jnp.arange(V)[None, :]                      # (VC, V)
    sel_c = (ki[:, None] % C) == jnp.arange(C)[None, :]                       # (VC, C)
    rall = jnp.broadcast_to(sel_i[:, :, None, None] & sel_c[:, None, None, :],
                            (VC, V, V, C)).astype(f32).reshape(VC, V * VC)    # (VC, V*VC)

    x_flat = x.reshape(N, T, VC).astype(f32)
    nb = _pick_batch_block(N, T, target_rows)
    grid = (N // nb,)

    m_rows = N * T
    mm_flops = 2 * m_rows * (VC * VC + VC * (V * VC) + VC * VC)   # per layer (3 MXU matmuls)
    vpu_flops = 10 * (V + T) * m_rows * VC                        # per layer (lane-dense FMAs)
    cost = pl.CostEstimate(
        flops=int(2 * (mm_flops + vpu_flops)),
        transcendentals=int(2 * ((V + T) * m_rows * VC + m_rows * VC)),
        bytes_accessed=int(4 * (2 * N * T * VC + adj_exp.size + sadj.size + tpre.size
                                + wbd.size + pool.size + rall.size + scale.size + shift.size)),
    )

    out_flat = pl.pallas_call(
        _gc4d_block_kernel,
        out_shape=jax.ShapeDtypeStruct((N, T, VC), f32),
        grid=grid,
        in_specs=[
            pl.BlockSpec((nb, T, VC), lambda b: (b, 0, 0)),        # x, nb batch elements, lane-dense
            pl.BlockSpec((V, T, VC), lambda b: (0, 0, 0)),         # adj expanded over channels
            pl.BlockSpec((2, V, T, VC), lambda b: (0, 0, 0, 0)),   # s*adj (both layers), expanded
            pl.BlockSpec((2, T, T, VC), lambda b: (0, 0, 0, 0)),   # t (both layers), expanded
            pl.BlockSpec((2, VC, VC), lambda b: (0, 0, 0)),        # block-diagonal weights
            pl.BlockSpec((VC, VC), lambda b: (0, 0)),              # channel-mean selector
            pl.BlockSpec((VC, V * VC), lambda b: (0, 0)),          # node-tile selector
            pl.BlockSpec((2, 1, VC), lambda b: (0, 0, 0)),         # fused BN scale
            pl.BlockSpec((2, 1, VC), lambda b: (0, 0, 0)),         # fused bias+BN shift
        ],
        out_specs=pl.BlockSpec((nb, T, VC), lambda b: (b, 0, 0)),
        compiler_params=pltpu.CompilerParams(dimension_semantics=("parallel",)),
        cost_estimate=cost,
    )(x_flat, adj_exp, sadj, tpre, wbd, pool, rall, scale, shift)
    return out_flat.reshape(N, T, V, C)


# ----------------------------------------------------------------------------- pure-JAX ref ----
def _softsign_ref(x):
    return x / (1.0 + jnp.abs(x))


def _gc4d_ref(x, adj, gc_params):
    s_p, t_p, w, bias = gc_params
    c = x.shape[-1]
    inv = 1.0 / math.sqrt(c)
    hp = jax.lax.Precision.HIGHEST
    xm = x.mean(-1)                                                   # (N,T,V)
    tt = _softsign_ref(xm[:, :, None, :] - xm[:, None, :, :]) * inv   # (N,T,T,V)
    tt = jnp.transpose(tt, (0, 3, 1, 2))                              # (N,V,T,T)
    ss = _softsign_ref((xm[..., :, None] - xm[..., None, :]) * adj[None]) * inv   # (N,T,V,V)
    s = s_p * adj
    aggreg_s = jnp.einsum('ntvi,ntic->ntvc', s[None] + ss, x, precision=hp)
    aggreg_t = jnp.einsum('nvtj,njvc->ntvc', t_p[None] + tt, x, precision=hp)
    support = aggreg_s + aggreg_t
    return jnp.einsum('ntvj,vjc->ntvc', support, w, precision=hp) + bias


def _bn_tanh_ref(y, bn_params):
    gamma, beta, rm, rv = bn_params
    return jnp.tanh((y - rm) / jnp.sqrt(rv + BN_EPS) * gamma + beta)


def _block_ref(x, adj, params):
    y = _bn_tanh_ref(_gc4d_ref(x, adj, params['gc1']), params['bn1'])
    y = _bn_tanh_ref(_gc4d_ref(y, adj, params['gc2']), params['bn2'])
    return y + x


# ----------------------------------------------------------------------------- main ------------
if __name__ == "__main__":
    N, T, V, C = 2, 8, 8, 16          # batch, frame_n, node_n, in_features  (V*C = 128 lanes)
    key = jax.random.PRNGKey(0)
    ks = jax.random.split(key, 6)
    stdv = 1.0 / math.sqrt(C)

    def u(k, shape):
        return jax.random.uniform(k, shape, jnp.float32, -stdv, stdv)

    def make_gc(k):
        k1, k2, k3, k4 = jax.random.split(k, 4)
        return (u(k1, (T, V, V)),     # s
                u(k2, (V, T, T)),     # t
                u(k3, (V, C, C)),     # weight
                u(k4, (C,)))          # bias

    def make_bn(k):
        k1, k2, k3, k4 = jax.random.split(k, 4)
        gamma = 1.0 + 0.1 * jax.random.normal(k1, (C,), jnp.float32)
        beta = 0.1 * jax.random.normal(k2, (C,), jnp.float32)
        rmean = 0.1 * jax.random.normal(k3, (C,), jnp.float32)
        rvar = 1.0 + 0.1 * jax.random.uniform(k4, (C,), jnp.float32)
        return (gamma, beta, rmean, rvar)

    params = {
        'gc1': make_gc(ks[0]), 'bn1': make_bn(ks[1]),
        'gc2': make_gc(ks[2]), 'bn2': make_bn(ks[3]),
    }

    x = jax.random.normal(ks[4], (N, T, V, C), jnp.float32)
    # deterministic banded adjacency mask, shared across frames: (T, V, V)
    idx = jnp.arange(V)
    band = (jnp.abs(idx[:, None] - idx[None, :]) <= 2).astype(jnp.float32)
    adj = jnp.broadcast_to(band, (T, V, V))

    out = jax.block_until_ready(gc4d_block_forward(x, adj, params))
    ref = _block_ref(x, adj, params)
    np.testing.assert_allclose(np.asarray(out), np.asarray(ref), rtol=5e-3, atol=5e-3)
    print("KERNEL_OK")
</pallas_src>

<mosaic_0001>
module attributes {stable_mosaic.version = 11 : i64} {
  func.func @_gc4d_block_kernel(%arg0: i32, %arg1: memref<1x8x128xf32, #tpu.memory_space<vmem>>, %arg2: memref<8x8x128xf32, #tpu.memory_space<vmem>>, %arg3: memref<2x8x8x128xf32, #tpu.memory_space<vmem>>, %arg4: memref<2x8x8x128xf32, #tpu.memory_space<vmem>>, %arg5: memref<2x128x128xf32, #tpu.memory_space<vmem>>, %arg6: memref<128x128xf32, #tpu.memory_space<vmem>>, %arg7: memref<128x1024xf32, #tpu.memory_space<vmem>>, %arg8: memref<2x1x128xf32, #tpu.memory_space<vmem>>, %arg9: memref<2x1x128xf32, #tpu.memory_space<vmem>>, %arg10: memref<1x8x128xf32, #tpu.memory_space<vmem>>) attributes {dimension_semantics = [#tpu.dimension_semantics<parallel>], iteration_bounds = array<i64: 2>, scalar_prefetch = 0 : i64, scratch_operands = 0 : i64, tpu.core_type = #tpu.core_type<tc>, window_params = [{transform_indices = @transform_0, window_bounds = array<i64: 1, 8, 128>}, {pipeline_mode = #tpu.pipeline_mode<synchronous>, transform_indices = @transform_1, window_bounds = array<i64: 8, 8, 128>}, {pipeline_mode = #tpu.pipeline_mode<synchronous>, transform_indices = @transform_2, window_bounds = array<i64: 2, 8, 8, 128>}, {pipeline_mode = #tpu.pipeline_mode<synchronous>, transform_indices = @transform_3, window_bounds = array<i64: 2, 8, 8, 128>}, {pipeline_mode = #tpu.pipeline_mode<synchronous>, transform_indices = @transform_4, window_bounds = array<i64: 2, 128, 128>}, {pipeline_mode = #tpu.pipeline_mode<synchronous>, transform_indices = @transform_5, window_bounds = array<i64: 128, 128>}, {pipeline_mode = #tpu.pipeline_mode<synchronous>, transform_indices = @transform_6, window_bounds = array<i64: 128, 1024>}, {pipeline_mode = #tpu.pipeline_mode<synchronous>, transform_indices = @transform_7, window_bounds = array<i64: 2, 1, 128>}, {pipeline_mode = #tpu.pipeline_mode<synchronous>, transform_indices = @transform_8, window_bounds = array<i64: 2, 1, 128>}, {transform_indices = @transform_9, window_bounds = array<i64: 1, 8, 128>}]} {
    %c0 = arith.constant 0 : index
    %c0_0 = arith.constant 0 : index
    %c0_1 = arith.constant 0 : index
    %0 = vector.load %arg1[%c0, %c0_0, %c0_1] : memref<1x8x128xf32, #tpu.memory_space<vmem>>, vector<1x8x128xf32>
    %c0_2 = arith.constant 0 : index
    %c0_3 = arith.constant 0 : index
    %1 = vector.load %arg6[%c0_2, %c0_3] : memref<128x128xf32, #tpu.memory_space<vmem>>, vector<128x128xf32>
    %c0_4 = arith.constant 0 : index
    %c0_5 = arith.constant 0 : index
    %2 = vector.load %arg7[%c0_4, %c0_5] : memref<128x1024xf32, #tpu.memory_space<vmem>>, vector<128x1024xf32>
    %3 = vector.shape_cast %0 : vector<1x8x128xf32> to vector<8x128xf32>
    %cst = arith.constant dense<0.000000e+00> : vector<8x128xf32>
    %4 = tpu.matmul %3, %1, %cst {dimension_numbers = #tpu.dot_dimension_numbers<[1], [0], [0], [1], [0, 0, 1, 1], [], []>} : vector<8x128xf32>, vector<128x128xf32>, vector<8x128xf32> -> vector<8x128xf32>
    %5 = vector.shape_cast %4 : vector<8x128xf32> to vector<1x8x128xf32>
    %cst_6 = arith.constant dense<0.000000e+00> : vector<8x1024xf32>
    %6 = tpu.matmul %3, %2, %cst_6 {dimension_numbers = #tpu.dot_dimension_numbers<[1], [0], [0], [1], [0, 0, 1, 1], [], []>} : vector<8x128xf32>, vector<128x1024xf32>, vector<8x1024xf32> -> vector<8x1024xf32>
    %7 = vector.shape_cast %6 : vector<8x1024xf32> to vector<1x8x1024xf32>
    %cst_7 = arith.constant 0.000000e+00 : f32
    %8 = vector.broadcast %cst_7 : f32 to vector<1x8x128xf32>
    %9 = vector.extract_strided_slice %5 {offsets = [0, 0, 0], sizes = [1, 8, 1], strides = [1, 1, 1]} : vector<1x8x128xf32> to vector<1x8x1xf32>
    %10 = vector.broadcast %9 : vector<1x8x1xf32> to vector<1x8x128xf32>
    %11 = arith.subf %5, %10 : vector<1x8x128xf32>
    %c0_8 = arith.constant 0 : index
    %c0_9 = arith.constant 0 : index
    %c0_10 = arith.constant 0 : index
    %c0_11 = arith.constant 0 : index
    %12 = vector.load %arg3[%c0_8, %c0_9, %c0_10, %c0_11] : memref<2x8x8x128xf32, #tpu.memory_space<vmem>>, vector<1x1x8x128xf32>
    %13 = vector.shape_cast %12 : vector<1x1x8x128xf32> to vector<8x128xf32>
    %14 = vector.shape_cast %13 : vector<8x128xf32> to vector<1x8x128xf32>
    %c0_12 = arith.constant 0 : index
    %c0_13 = arith.constant 0 : index
    %c0_14 = arith.constant 0 : index
    %15 = vector.load %arg2[%c0_12, %c0_13, %c0_14] : memref<8x8x128xf32, #tpu.memory_space<vmem>>, vector<1x8x128xf32>
    %16 = vector.shape_cast %15 : vector<1x8x128xf32> to vector<8x128xf32>
    %17 = vector.shape_cast %16 : vector<8x128xf32> to vector<1x8x128xf32>
    %18 = arith.mulf %11, %17 : vector<1x8x128xf32>
    %19 = math.absf %18 : vector<1x8x128xf32>
    %cst_15 = arith.constant 1.000000e+00 : f32
    %20 = vector.broadcast %cst_15 : f32 to vector<1x8x128xf32>
    %21 = arith.addf %20, %19 : vector<1x8x128xf32>
    %22 = tpu.reciprocal %21 {approx = true} : vector<1x8x128xf32> -> vector<1x8x128xf32>
    %23 = arith.mulf %21, %22 : vector<1x8x128xf32>
    %cst_16 = arith.constant 2.000000e+00 : f32
    %24 = vector.broadcast %cst_16 : f32 to vector<1x8x128xf32>
    %25 = arith.subf %24, %23 : vector<1x8x128xf32>
    %26 = arith.mulf %22, %25 : vector<1x8x128xf32>
    %27 = arith.mulf %18, %26 : vector<1x8x128xf32>
    %cst_17 = arith.constant 2.500000e-01 : f32
    %28 = vector.broadcast %cst_17 : f32 to vector<1x8x128xf32>
    %29 = arith.mulf %27, %28 : vector<1x8x128xf32>
    %30 = arith.addf %14, %29 : vector<1x8x128xf32>
    %31 = vector.extract_strided_slice %7 {offsets = [0, 0, 0], sizes = [1, 8, 128], strides = [1, 1, 1]} : vector<1x8x1024xf32> to vector<1x8x128xf32>
    %32 = arith.mulf %30, %31 : vector<1x8x128xf32>
    %33 = arith.addf %8, %32 : vector<1x8x128xf32>
    %34 = vector.extract_strided_slice %5 {offsets = [0, 0, 16], sizes = [1, 8, 1], strides = [1, 1, 1]} : vector<1x8x128xf32> to vector<1x8x1xf32>
    %35 = vector.broadcast %34 : vector<1x8x1xf32> to vector<1x8x128xf32>
    %36 = arith.subf %5, %35 : vector<1x8x128xf32>
    %c0_18 = arith.constant 0 : index
    %c1 = arith.constant 1 : index
    %c0_19 = arith.constant 0 : index
    %c0_20 = arith.constant 0 : index
    %37 = vector.load %arg3[%c0_18, %c1, %c0_19, %c0_20] : memref<2x8x8x128xf32, #tpu.memory_space<vmem>>, vector<1x1x8x128xf32>
    %38 = vector.shape_cast %37 : vector<1x1x8x128xf32> to vector<8x128xf32>
    %39 = vector.shape_cast %38 : vector<8x128xf32> to vector<1x8x128xf32>
    %c1_21 = arith.constant 1 : index
    %c0_22 = arith.constant 0 : index
    %c0_23 = arith.constant 0 : index
    %40 = vector.load %arg2[%c1_21, %c0_22, %c0_23] : memref<8x8x128xf32, #tpu.memory_space<vmem>>, vector<1x8x128xf32>
    %41 = vector.shape_cast %40 : vector<1x8x128xf32> to vector<8x128xf32>
    %42 = vector.shape_cast %41 : vector<8x128xf32> to vector<1x8x128xf32>
    %43 = arith.mulf %36, %42 : vector<1x8x128xf32>
    %44 = math.absf %43 : vector<1x8x128xf32>
    %cst_24 = arith.constant 1.000000e+00 : f32
    %45 = vector.broadcast %cst_24 : f32 to vector<1x8x128xf32>
    %46 = arith.addf %45, %44 : vector<1x8x128xf32>
    %47 = tpu.reciprocal %46 {approx = true} : vector<1x8x128xf32> -> vector<1x8x128xf32>
    %48 = arith.mulf %46, %47 : vector<1x8x128xf32>
    %cst_25 = arith.constant 2.000000e+00 : f32
    %49 = vector.broadcast %cst_25 : f32 to vector<1x8x128xf32>
    %50 = arith.subf %49, %48 : vector<1x8x128xf32>
    %51 = arith.mulf %47, %50 : vector<1x8x128xf32>
    %52 = arith.mulf %43, %51 : vector<1x8x128xf32>
    %cst_26 = arith.constant 2.500000e-01 : f32
    %53 = vector.broadcast %cst_26 : f32 to vector<1x8x128xf32>
    %54 = arith.mulf %52, %53 : vector<1x8x128xf32>
    %55 = arith.addf %39, %54 : vector<1x8x128xf32>
    %56 = vector.extract_strided_slice %7 {offsets = [0, 0, 128], sizes = [1, 8, 128], strides = [1, 1, 1]} : vector<1x8x1024xf32> to vector<1x8x128xf32>
    %57 = arith.mulf %55, %56 : vector<1x8x128xf32>
    %58 = arith.addf %33, %57 : vector<1x8x128xf32>
    %59 = vector.extract_strided_slice %5 {offsets = [0, 0, 32], sizes = [1, 8, 1], strides = [1, 1, 1]} : vector<1x8x128xf32> to vector<1x8x1xf32>
    %60 = vector.broadcast %59 : vector<1x8x1xf32> to vector<1x8x128xf32>
    %61 = arith.subf %5, %60 : vector<1x8x128xf32>
    %c0_27 = arith.constant 0 : index
    %c2 = arith.constant 2 : index
    %c0_28 = arith.constant 0 : index
    %c0_29 = arith.constant 0 : index
    %62 = vector.load %arg3[%c0_27, %c2, %c0_28, %c0_29] : memref<2x8x8x128xf32, #tpu.memory_space<vmem>>, vector<1x1x8x128xf32>
    %63 = vector.shape_cast %62 : vector<1x1x8x128xf32> to vector<8x128xf32>
    %64 = vector.shape_cast %63 : vector<8x128xf32> to vector<1x8x128xf32>
    %c2_30 = arith.constant 2 : index
    %c0_31 = arith.constant 0 : index
    %c0_32 = arith.constant 0 : index
    %65 = vector.load %arg2[%c2_30, %c0_31, %c0_32] : memref<8x8x128xf32, #tpu.memory_space<vmem>>, vector<1x8x128xf32>
    %66 = vector.shape_cast %65 : vector<1x8x128xf32> to vector<8x128xf32>
    %67 = vector.shape_cast %66 : vector<8x128xf32> to vector<1x8x128xf32>
    %68 = arith.mulf %61, %67 : vector<1x8x128xf32>
    %69 = math.absf %68 : vector<1x8x128xf32>
    %cst_33 = arith.constant 1.000000e+00 : f32
    %70 = vector.broadcast %cst_33 : f32 to vector<1x8x128xf32>
    %71 = arith.addf %70, %69 : vector<1x8x128xf32>
    %72 = tpu.reciprocal %71 {approx = true} : vector<1x8x128xf32> -> vector<1x8x128xf32>
    %73 = arith.mulf %71, %72 : vector<1x8x128xf32>
    %cst_34 = arith.constant 2.000000e+00 : f32
    %74 = vector.broadcast %cst_34 : f32 to vector<1x8x128xf32>
    %75 = arith.subf %74, %73 : vector<1x8x128xf32>
    %76 = arith.mulf %72, %75 : vector<1x8x128xf32>
    %77 = arith.mulf %68, %76 : vector<1x8x128xf32>
    %cst_35 = arith.constant 2.500000e-01 : f32
    %78 = vector.broadcast %cst_35 : f32 to vector<1x8x128xf32>
    %79 = arith.mulf %77, %78 : vector<1x8x128xf32>
    %80 = arith.addf %64, %79 : vector<1x8x128xf32>
    %81 = vector.extract_strided_slice %7 {offsets = [0, 0, 256], sizes = [1, 8, 128], strides = [1, 1, 1]} : vector<1x8x1024xf32> to vector<1x8x128xf32>
    %82 = arith.mulf %80, %81 : vector<1x8x128xf32>
    %83 = arith.addf %58, %82 : vector<1x8x128xf32>
    %84 = vector.extract_strided_slice %5 {offsets = [0, 0, 48], sizes = [1, 8, 1], strides = [1, 1, 1]} : vector<1x8x128xf32> to vector<1x8x1xf32>
    %85 = vector.broadcast %84 : vector<1x8x1xf32> to vector<1x8x128xf32>
    %86 = arith.subf %5, %85 : vector<1x8x128xf32>
    %c0_36 = arith.constant 0 : index
    %c3 = arith.constant 3 : index
    %c0_37 = arith.constant 0 : index
    %c0_38 = arith.constant 0 : index
    %87 = vector.load %arg3[%c0_36, %c3, %c0_37, %c0_38] : memref<2x8x8x128xf32, #tpu.memory_space<vmem>>, vector<1x1x8x128xf32>
    %88 = vector.shape_cast %87 : vector<1x1x8x128xf32> to vector<8x128xf32>
    %89 = vector.shape_cast %88 : vector<8x128xf32> to vector<1x8x128xf32>
    %c3_39 = arith.constant 3 : index
    %c0_40 = arith.constant 0 : index
    %c0_41 = arith.constant 0 : index
    %90 = vector.load %arg2[%c3_39, %c0_40, %c0_41] : memref<8x8x128xf32, #tpu.memory_space<vmem>>, vector<1x8x128xf32>
    %91 = vector.shape_cast %90 : vector<1x8x128xf32> to vector<8x128xf32>
    %92 = vector.shape_cast %91 : vector<8x128xf32> to vector<1x8x128xf32>
    %93 = arith.mulf %86, %92 : vector<1x8x128xf32>
    %94 = math.absf %93 : vector<1x8x128xf32>
    %cst_42 = arith.constant 1.000000e+00 : f32
    %95 = vector.broadcast %cst_42 : f32 to vector<1x8x128xf32>
    %96 = arith.addf %95, %94 : vector<1x8x128xf32>
    %97 = tpu.reciprocal %96 {approx = true} : vector<1x8x128xf32> -> vector<1x8x128xf32>
    %98 = arith.mulf %96, %97 : vector<1x8x128xf32>
    %cst_43 = arith.constant 2.000000e+00 : f32
    %99 = vector.broadcast %cst_43 : f32 to vector<1x8x128xf32>
    %100 = arith.subf %99, %98 : vector<1x8x128xf32>
    %101 = arith.mulf %97, %100 : vector<1x8x128xf32>
    %102 = arith.mulf %93, %101 : vector<1x8x128xf32>
    %cst_44 = arith.constant 2.500000e-01 : f32
    %103 = vector.broadcast %cst_44 : f32 to vector<1x8x128xf32>
    %104 = arith.mulf %102, %103 : vector<1x8x128xf32>
    %105 = arith.addf %89, %104 : vector<1x8x128xf32>
    %106 = vector.extract_strided_slice %7 {offsets = [0, 0, 384], sizes = [1, 8, 128], strides = [1, 1, 1]} : vector<1x8x1024xf32> to vector<1x8x128xf32>
    %107 = arith.mulf %105, %106 : vector<1x8x128xf32>
    %108 = arith.addf %83, %107 : vector<1x8x128xf32>
    %109 = vector.extract_strided_slice %5 {offsets = [0, 0, 64], sizes = [1, 8, 1], strides = [1, 1, 1]} : vector<1x8x128xf32> to vector<1x8x1xf32>
    %110 = vector.broadcast %109 : vector<1x8x1xf32> to vector<1x8x128xf32>
    %111 = arith.subf %5, %110 : vector<1x8x128xf32>
    %c0_45 = arith.constant 0 : index
    %c4 = arith.constant 4 : index
    %c0_46 = arith.constant 0 : index
    %c0_47 = arith.constant 0 : index
    %112 = vector.load %arg3[%c0_45, %c4, %c0_46, %c0_47] : memref<2x8x8x128xf32, #tpu.memory_space<vmem>>, vector<1x1x8x128xf32>
    %113 = vector.shape_cast %112 : vector<1x1x8x128xf32> to vector<8x128xf32>
    %114 = vector.shape_cast %113 : vector<8x128xf32> to vector<1x8x128xf32>
    %c4_48 = arith.constant 4 : index
    %c0_49 = arith.constant 0 : index
    %c0_50 = arith.constant 0 : index
    %115 = vector.load %arg2[%c4_48, %c0_49, %c0_50] : memref<8x8x128xf32, #tpu.memory_space<vmem>>, vector<1x8x128xf32>
    %116 = vector.shape_cast %115 : vector<1x8x128xf32> to vector<8x128xf32>
    %117 = vector.shape_cast %116 : vector<8x128xf32> to vector<1x8x128xf32>
    %118 = arith.mulf %111, %117 : vector<1x8x128xf32>
    %119 = math.absf %118 : vector<1x8x128xf32>
    %cst_51 = arith.constant 1.000000e+00 : f32
    %120 = vector.broadcast %cst_51 : f32 to vector<1x8x128xf32>
    %121 = arith.addf %120, %119 : vector<1x8x128xf32>
    %122 = tpu.reciprocal %121 {approx = true} : vector<1x8x128xf32> -> vector<1x8x128xf32>
    %123 = arith.mulf %121, %122 : vector<1x8x128xf32>
    %cst_52 = arith.constant 2.000000e+00 : f32
    %124 = vector.broadcast %cst_52 : f32 to vector<1x8x128xf32>
    %125 = arith.subf %124, %123 : vector<1x8x128xf32>
    %126 = arith.mulf %122, %125 : vector<1x8x128xf32>
    %127 = arith.mulf %118, %126 : vector<1x8x128xf32>
    %cst_53 = arith.constant 2.500000e-01 : f32
    %128 = vector.broadcast %cst_53 : f32 to vector<1x8x128xf32>
    %129 = arith.mulf %127, %128 : vector<1x8x128xf32>
    %130 = arith.addf %114, %129 : vector<1x8x128xf32>
    %131 = vector.extract_strided_slice %7 {offsets = [0, 0, 512], sizes = [1, 8, 128], strides = [1, 1, 1]} : vector<1x8x1024xf32> to vector<1x8x128xf32>
    %132 = arith.mulf %130, %131 : vector<1x8x128xf32>
    %133 = arith.addf %108, %132 : vector<1x8x128xf32>
    %134 = vector.extract_strided_slice %5 {offsets = [0, 0, 80], sizes = [1, 8, 1], strides = [1, 1, 1]} : vector<1x8x128xf32> to vector<1x8x1xf32>
    %135 = vector.broadcast %134 : vector<1x8x1xf32> to vector<1x8x128xf32>
    %136 = arith.subf %5, %135 : vector<1x8x128xf32>
    %c0_54 = arith.constant 0 : index
    %c5 = arith.constant 5 : index
    %c0_55 = arith.constant 0 : index
    %c0_56 = arith.constant 0 : index
    %137 = vector.load %arg3[%c0_54, %c5, %c0_55, %c0_56] : memref<2x8x8x128xf32, #tpu.memory_space<vmem>>, vector<1x1x8x128xf32>
    %138 = vector.shape_cast %137 : vector<1x1x8x128xf32> to vector<8x128xf32>
    %139 = vector.shape_cast %138 : vector<8x128xf32> to vector<1x8x128xf32>
    %c5_57 = arith.constant 5 : index
    %c0_58 = arith.constant 0 : index
    %c0_59 = arith.constant 0 : index
    %140 = vector.load %arg2[%c5_57, %c0_58, %c0_59] : memref<8x8x128xf32, #tpu.memory_space<vmem>>, vector<1x8x128xf32>
    %141 = vector.shape_cast %140 : vector<1x8x128xf32> to vector<8x128xf32>
    %142 = vector.shape_cast %141 : vector<8x128xf32> to vector<1x8x128xf32>
    %143 = arith.mulf %136, %142 : vector<1x8x128xf32>
    %144 = math.absf %143 : vector<1x8x128xf32>
    %cst_60 = arith.constant 1.000000e+00 : f32
    %145 = vector.broadcast %cst_60 : f32 to vector<1x8x128xf32>
    %146 = arith.addf %145, %144 : vector<1x8x128xf32>
    %147 = tpu.reciprocal %146 {approx = true} : vector<1x8x128xf32> -> vector<1x8x128xf32>
    %148 = arith.mulf %146, %147 : vector<1x8x128xf32>
    %cst_61 = arith.constant 2.000000e+00 : f32
    %149 = vector.broadcast %cst_61 : f32 to vector<1x8x128xf32>
    %150 = arith.subf %149, %148 : vector<1x8x128xf32>
    %151 = arith.mulf %147, %150 : vector<1x8x128xf32>
    %152 = arith.mulf %143, %151 : vector<1x8x128xf32>
    %cst_62 = arith.constant 2.500000e-01 : f32
    %153 = vector.broadcast %cst_62 : f32 to vector<1x8x128xf32>
    %154 = arith.mulf %152, %153 : vector<1x8x128xf32>
    %155 = arith.addf %139, %154 : vector<1x8x128xf32>
    %156 = vector.extract_strided_slice %7 {offsets = [0, 0, 640], sizes = [1, 8, 128], strides = [1, 1, 1]} : vector<1x8x1024xf32> to vector<1x8x128xf32>
    %157 = arith.mulf %155, %156 : vector<1x8x128xf32>
    %158 = arith.addf %133, %157 : vector<1x8x128xf32>
    %159 = vector.extract_strided_slice %5 {offsets = [0, 0, 96], sizes = [1, 8, 1], strides = [1, 1, 1]} : vector<1x8x128xf32> to vector<1x8x1xf32>
    %160 = vector.broadcast %159 : vector<1x8x1xf32> to vector<1x8x128xf32>
    %161 = arith.subf %5, %160 : vector<1x8x128xf32>
    %c0_63 = arith.constant 0 : index
    %c6 = arith.constant 6 : index
    %c0_64 = arith.constant 0 : index
    %c0_65 = arith.constant 0 : index
    %162 = vector.load %arg3[%c0_63, %c6, %c0_64, %c0_65] : memref<2x8x8x128xf32, #tpu.memory_space<vmem>>, vector<1x1x8x128xf32>
    %163 = vector.shape_cast %162 : vector<1x1x8x128xf32> to vector<8x128xf32>
    %164 = vector.shape_cast %163 : vector<8x128xf32> to vector<1x8x128xf32>
    %c6_66 = arith.constant 6 : index
    %c0_67 = arith.constant 0 : index
    %c0_68 = arith.constant 0 : index
    %165 = vector.load %arg2[%c6_66, %c0_67, %c0_68] : memref<8x8x128xf32, #tpu.memory_space<vmem>>, vector<1x8x128xf32>
    %166 = vector.shape_cast %165 : vector<1x8x128xf32> to vector<8x128xf32>
    %167 = vector.shape_cast %166 : vector<8x128xf32> to vector<1x8x128xf32>
    %168 = arith.mulf %161, %167 : vector<1x8x128xf32>
    %169 = math.absf %168 : vector<1x8x128xf32>
    %cst_69 = arith.constant 1.000000e+00 : f32
    %170 = vector.broadcast %cst_69 : f32 to vector<1x8x128xf32>
    %171 = arith.addf %170, %169 : vector<1x8x128xf32>
    %172 = tpu.reciprocal %171 {approx = true} : vector<1x8x128xf32> -> vector<1x8x128xf32>
    %173 = arith.mulf %171, %172 : vector<1x8x128xf32>
    %cst_70 = arith.constant 2.000000e+00 : f32
    %174 = vector.broadcast %cst_70 : f32 to vector<1x8x128xf32>
    %175 = arith.subf %174, %173 : vector<1x8x128xf32>
    %176 = arith.mulf %172, %175 : vector<1x8x128xf32>
    %177 = arith.mulf %168, %176 : vector<1x8x128xf32>
    %cst_71 = arith.constant 2.500000e-01 : f32
    %178 = vector.broadcast %cst_71 : f32 to vector<1x8x128xf32>
    %179 = arith.mulf %177, %178 : vector<1x8x128xf32>
    %180 = arith.addf %164, %179 : vector<1x8x128xf32>
    %181 = vector.extract_strided_slice %7 {offsets = [0, 0, 768], sizes = [1, 8, 128], strides = [1, 1, 1]} : vector<1x8x1024xf32> to vector<1x8x128xf32>
    %182 = arith.mulf %180, %181 : vector<1x8x128xf32>
    %183 = arith.addf %158, %182 : vector<1x8x128xf32>
    %184 = vector.extract_strided_slice %5 {offsets = [0, 0, 112], sizes = [1, 8, 1], strides = [1, 1, 1]} : vector<1x8x128xf32> to vector<1x8x1xf32>
    %185 = vector.broadcast %184 : vector<1x8x1xf32> to vector<1x8x128xf32>
    %186 = arith.subf %5, %185 : vector<1x8x128xf32>
    %c0_72 = arith.constant 0 : index
    %c7 = arith.constant 7 : index
    %c0_73 = arith.constant 0 : index
    %c0_74 = arith.constant 0 : index
    %187 = vector.load %arg3[%c0_72, %c7, %c0_73, %c0_74] : memref<2x8x8x128xf32, #tpu.memory_space<vmem>>, vector<1x1x8x128xf32>
    %188 = vector.shape_cast %187 : vector<1x1x8x128xf32> to vector<8x128xf32>
    %189 = vector.shape_cast %188 : vector<8x128xf32> to vector<1x8x128xf32>
    %c7_75 = arith.constant 7 : index
    %c0_76 = arith.constant 0 : index
    %c0_77 = arith.constant 0 : index
    %190 = vector.load %arg2[%c7_75, %c0_76, %c0_77] : memref<8x8x128xf32, #tpu.memory_space<vmem>>, vector<1x8x128xf32>
    %191 = vector.shape_cast %190 : vector<1x8x128xf32> to vector<8x128xf32>
    %192 = vector.shape_cast %191 : vector<8x128xf32> to vector<1x8x128xf32>
    %193 = arith.mulf %186, %192 : vector<1x8x128xf32>
    %194 = math.absf %193 : vector<1x8x128xf32>
    %cst_78 = arith.constant 1.000000e+00 : f32
    %195 = vector.broadcast %cst_78 : f32 to vector<1x8x128xf32>
    %196 = arith.addf %195, %194 : vector<1x8x128xf32>
    %197 = tpu.reciprocal %196 {approx = true} : vector<1x8x128xf32> -> vector<1x8x128xf32>
    %198 = arith.mulf %196, %197 : vector<1x8x128xf32>
    %cst_79 = arith.constant 2.000000e+00 : f32
    %199 = vector.broadcast %cst_79 : f32 to vector<1x8x128xf32>
    %200 = arith.subf %199, %198 : vector<1x8x128xf32>
    %201 = arith.mulf %197, %200 : vector<1x8x128xf32>
    %202 = arith.mulf %193, %201 : vector<1x8x128xf32>
    %cst_80 = arith.constant 2.500000e-01 : f32
    %203 = vector.broadcast %cst_80 : f32 to vector<1x8x128xf32>
    %204 = arith.mulf %202, %203 : vector<1x8x128xf32>
    %205 = arith.addf %189, %204 : vector<1x8x128xf32>
    %206 = vector.extract_strided_slice %7 {offsets = [0, 0, 896], sizes = [1, 8, 128], strides = [1, 1, 1]} : vector<1x8x1024xf32> to vector<1x8x128xf32>
    %207 = arith.mulf %205, %206 : vector<1x8x128xf32>
    %208 = arith.addf %183, %207 : vector<1x8x128xf32>
    %209 = vector.extract_strided_slice %5 {offsets = [0, 0, 0], sizes = [1, 1, 128], strides = [1, 1, 1]} : vector<1x8x128xf32> to vector<1x1x128xf32>
    %210 = vector.broadcast %209 : vector<1x1x128xf32> to vector<1x8x128xf32>
    %211 = arith.subf %5, %210 : vector<1x8x128xf32>
    %c0_81 = arith.constant 0 : index
    %c0_82 = arith.constant 0 : index
    %c0_83 = arith.constant 0 : index
    %c0_84 = arith.constant 0 : index
    %212 = vector.load %arg4[%c0_81, %c0_82, %c0_83, %c0_84] : memref<2x8x8x128xf32, #tpu.memory_space<vmem>>, vector<1x1x8x128xf32>
    %213 = vector.shape_cast %212 : vector<1x1x8x128xf32> to vector<8x128xf32>
    %214 = vector.shape_cast %213 : vector<8x128xf32> to vector<1x8x128xf32>
    %215 = math.absf %211 : vector<1x8x128xf32>
    %cst_85 = arith.constant 1.000000e+00 : f32
    %216 = vector.broadcast %cst_85 : f32 to vector<1x8x128xf32>
    %217 = arith.addf %216, %215 : vector<1x8x128xf32>
    %218 = tpu.reciprocal %217 {approx = true} : vector<1x8x128xf32> -> vector<1x8x128xf32>
    %219 = arith.mulf %217, %218 : vector<1x8x128xf32>
    %cst_86 = arith.constant 2.000000e+00 : f32
    %220 = vector.broadcast %cst_86 : f32 to vector<1x8x128xf32>
    %221 = arith.subf %220, %219 : vector<1x8x128xf32>
    %222 = arith.mulf %218, %221 : vector<1x8x128xf32>
    %223 = arith.mulf %211, %222 : vector<1x8x128xf32>
    %cst_87 = arith.constant 2.500000e-01 : f32
    %224 = vector.broadcast %cst_87 : f32 to vector<1x8x128xf32>
    %225 = arith.mulf %223, %224 : vector<1x8x128xf32>
    %226 = arith.addf %214, %225 : vector<1x8x128xf32>
    %227 = vector.extract_strided_slice %0 {offsets = [0, 0, 0], sizes = [1, 1, 128], strides = [1, 1, 1]} : vector<1x8x128xf32> to vector<1x1x128xf32>
    %228 = vector.broadcast %227 : vector<1x1x128xf32> to vector<1x8x128xf32>
    %229 = arith.mulf %226, %228 : vector<1x8x128xf32>
    %230 = arith.addf %208, %229 : vector<1x8x128xf32>
    %231 = vector.extract_strided_slice %5 {offsets = [0, 1, 0], sizes = [1, 1, 128], strides = [1, 1, 1]} : vector<1x8x128xf32> to vector<1x1x128xf32>
    %232 = vector.broadcast %231 : vector<1x1x128xf32> to vector<1x8x128xf32>
    %233 = arith.subf %5, %232 : vector<1x8x128xf32>
    %c0_88 = arith.constant 0 : index
    %c1_89 = arith.constant 1 : index
    %c0_90 = arith.constant 0 : index
    %c0_91 = arith.constant 0 : index
    %234 = vector.load %arg4[%c0_88, %c1_89, %c0_90, %c0_91] : memref<2x8x8x128xf32, #tpu.memory_space<vmem>>, vector<1x1x8x128xf32>
    %235 = vector.shape_cast %234 : vector<1x1x8x128xf32> to vector<8x128xf32>
    %236 = vector.shape_cast %235 : vector<8x128xf32> to vector<1x8x128xf32>
    %237 = math.absf %233 : vector<1x8x128xf32>
    %cst_92 = arith.constant 1.000000e+00 : f32
    %238 = vector.broadcast %cst_92 : f32 to vector<1x8x128xf32>
    %239 = arith.addf %238, %237 : vector<1x8x128xf32>
    %240 = tpu.reciprocal %239 {approx = true} : vector<1x8x128xf32> -> vector<1x8x128xf32>
    %241 = arith.mulf %239, %240 : vector<1x8x128xf32>
    %cst_93 = arith.constant 2.000000e+00 : f32
    %242 = vector.broadcast %cst_93 : f32 to vector<1x8x128xf32>
    %243 = arith.subf %242, %241 : vector<1x8x128xf32>
    %244 = arith.mulf %240, %243 : vector<1x8x128xf32>
    %245 = arith.mulf %233, %244 : vector<1x8x128xf32>
    %cst_94 = arith.constant 2.500000e-01 : f32
    %246 = vector.broadcast %cst_94 : f32 to vector<1x8x128xf32>
    %247 = arith.mulf %245, %246 : vector<1x8x128xf32>
    %248 = arith.addf %236, %247 : vector<1x8x128xf32>
    %249 = vector.extract_strided_slice %0 {offsets = [0, 1, 0], sizes = [1, 1, 128], strides = [1, 1, 1]} : vector<1x8x128xf32> to vector<1x1x128xf32>
    %250 = vector.broadcast %249 : vector<1x1x128xf32> to vector<1x8x128xf32>
    %251 = arith.mulf %248, %250 : vector<1x8x128xf32>
    %252 = arith.addf %230, %251 : vector<1x8x128xf32>
    %253 = vector.extract_strided_slice %5 {offsets = [0, 2, 0], sizes = [1, 1, 128], strides = [1, 1, 1]} : vector<1x8x128xf32> to vector<1x1x128xf32>
    %254 = vector.broadcast %253 : vector<1x1x128xf32> to vector<1x8x128xf32>
    %255 = arith.subf %5, %254 : vector<1x8x128xf32>
    %c0_95 = arith.constant 0 : index
    %c2_96 = arith.constant 2 : index
    %c0_97 = arith.constant 0 : index
    %c0_98 = arith.constant 0 : index
    %256 = vector.load %arg4[%c0_95, %c2_96, %c0_97, %c0_98] : memref<2x8x8x128xf32, #tpu.memory_space<vmem>>, vector<1x1x8x128xf32>
    %257 = vector.shape_cast %256 : vector<1x1x8x128xf32> to vector<8x128xf32>
    %258 = vector.shape_cast %257 : vector<8x128xf32> to vector<1x8x128xf32>
    %259 = math.absf %255 : vector<1x8x128xf32>
    %cst_99 = arith.constant 1.000000e+00 : f32
    %260 = vector.broadcast %cst_99 : f32 to vector<1x8x128xf32>
    %261 = arith.addf %260, %259 : vector<1x8x128xf32>
    %262 = tpu.reciprocal %261 {approx = true} : vector<1x8x128xf32> -> vector<1x8x128xf32>
    %263 = arith.mulf %261, %262 : vector<1x8x128xf32>
    %cst_100 = arith.constant 2.000000e+00 : f32
    %264 = vector.broadcast %cst_100 : f32 to vector<1x8x128xf32>
    %265 = arith.subf %264, %263 : vector<1x8x128xf32>
    %266 = arith.mulf %262, %265 : vector<1x8x128xf32>
    %267 = arith.mulf %255, %266 : vector<1x8x128xf32>
    %cst_101 = arith.constant 2.500000e-01 : f32
    %268 = vector.broadcast %cst_101 : f32 to vector<1x8x128xf32>
    %269 = arith.mulf %267, %268 : vector<1x8x128xf32>
    %270 = arith.addf %258, %269 : vector<1x8x128xf32>
    %271 = vector.extract_strided_slice %0 {offsets = [0, 2, 0], sizes = [1, 1, 128], strides = [1, 1, 1]} : vector<1x8x128xf32> to vector<1x1x128xf32>
    %272 = vector.broadcast %271 : vector<1x1x128xf32> to vector<1x8x128xf32>
    %273 = arith.mulf %270, %272 : vector<1x8x128xf32>
    %274 = arith.addf %252, %273 : vector<1x8x128xf32>
    %275 = vector.extract_strided_slice %5 {offsets = [0, 3, 0], sizes = [1, 1, 128], strides = [1, 1, 1]} : vector<1x8x128xf32> to vector<1x1x128xf32>
    %276 = vector.broadcast %275 : vector<1x1x128xf32> to vector<1x8x128xf32>
    %277 = arith.subf %5, %276 : vector<1x8x128xf32>
    %c0_102 = arith.constant 0 : index
    %c3_103 = arith.constant 3 : index
    %c0_104 = arith.constant 0 : index
    %c0_105 = arith.constant 0 : index
    %278 = vector.load %arg4[%c0_102, %c3_103, %c0_104, %c0_105] : memref<2x8x8x128xf32, #tpu.memory_space<vmem>>, vector<1x1x8x128xf32>
    %279 = vector.shape_cast %278 : vector<1x1x8x128xf32> to vector<8x128xf32>
    %280 = vector.shape_cast %279 : vector<8x128xf32> to vector<1x8x128xf32>
    %281 = math.absf %277 : vector<1x8x128xf32>
    %cst_106 = arith.constant 1.000000e+00 : f32
    %282 = vector.broadcast %cst_106 : f32 to vector<1x8x128xf32>
    %283 = arith.addf %282, %281 : vector<1x8x128xf32>
    %284 = tpu.reciprocal %283 {approx = true} : vector<1x8x128xf32> -> vector<1x8x128xf32>
    %285 = arith.mulf %283, %284 : vector<1x8x128xf32>
    %cst_107 = arith.constant 2.000000e+00 : f32
    %286 = vector.broadcast %cst_107 : f32 to vector<1x8x128xf32>
    %287 = arith.subf %286, %285 : vector<1x8x128xf32>
    %288 = arith.mulf %284, %287 : vector<1x8x128xf32>
    %289 = arith.mulf %277, %288 : vector<1x8x128xf32>
    %cst_108 = arith.constant 2.500000e-01 : f32
    %290 = vector.broadcast %cst_108 : f32 to vector<1x8x128xf32>
    %291 = arith.mulf %289, %290 : vector<1x8x128xf32>
    %292 = arith.addf %280, %291 : vector<1x8x128xf32>
    %293 = vector.extract_strided_slice %0 {offsets = [0, 3, 0], sizes = [1, 1, 128], strides = [1, 1, 1]} : vector<1x8x128xf32> to vector<1x1x128xf32>
    %294 = vector.broadcast %293 : vector<1x1x128xf32> to vector<1x8x128xf32>
    %295 = arith.mulf %292, %294 : vector<1x8x128xf32>
    %296 = arith.addf %274, %295 : vector<1x8x128xf32>
    %297 = vector.extract_strided_slice %5 {offsets = [0, 4, 0], sizes = [1, 1, 128], strides = [1, 1, 1]} : vector<1x8x128xf32> to vector<1x1x128xf32>
    %298 = vector.broadcast %297 : vector<1x1x128xf32> to vector<1x8x128xf32>
    %299 = arith.subf %5, %298 : vector<1x8x128xf32>
    %c0_109 = arith.constant 0 : index
    %c4_110 = arith.constant 4 : index
    %c0_111 = arith.constant 0 : index
    %c0_112 = arith.constant 0 : index
    %300 = vector.load %arg4[%c0_109, %c4_110, %c0_111, %c0_112] : memref<2x8x8x128xf32, #tpu.memory_space<vmem>>, vector<1x1x8x128xf32>
    %301 = vector.shape_cast %300 : vector<1x1x8x128xf32> to vector<8x128xf32>
    %302 = vector.shape_cast %301 : vector<8x128xf32> to vector<1x8x128xf32>
    %303 = math.absf %299 : vector<1x8x128xf32>
    %cst_113 = arith.constant 1.000000e+00 : f32
    %304 = vector.broadcast %cst_113 : f32 to vector<1x8x128xf32>
    %305 = arith.addf %304, %303 : vector<1x8x128xf32>
    %306 = tpu.reciprocal %305 {approx = true} : vector<1x8x128xf32> -> vector<1x8x128xf32>
    %307 = arith.mulf %305, %306 : vector<1x8x128xf32>
    %cst_114 = arith.constant 2.000000e+00 : f32
    %308 = vector.broadcast %cst_114 : f32 to vector<1x8x128xf32>
    %309 = arith.subf %308, %307 : vector<1x8x128xf32>
    %310 = arith.mulf %306, %309 : vector<1x8x128xf32>
    %311 = arith.mulf %299, %310 : vector<1x8x128xf32>
    %cst_115 = arith.constant 2.500000e-01 : f32
    %312 = vector.broadcast %cst_115 : f32 to vector<1x8x128xf32>
    %313 = arith.mulf %311, %312 : vector<1x8x128xf32>
    %314 = arith.addf %302, %313 : vector<1x8x128xf32>
    %315 = vector.extract_strided_slice %0 {offsets = [0, 4, 0], sizes = [1, 1, 128], strides = [1, 1, 1]} : vector<1x8x128xf32> to vector<1x1x128xf32>
    %316 = vector.broadcast %315 : vector<1x1x128xf32> to vector<1x8x128xf32>
    %317 = arith.mulf %314, %316 : vector<1x8x128xf32>
    %318 = arith.addf %296, %317 : vector<1x8x128xf32>
    %319 = vector.extract_strided_slice %5 {offsets = [0, 5, 0], sizes = [1, 1, 128], strides = [1, 1, 1]} : vector<1x8x128xf32> to vector<1x1x128xf32>
    %320 = vector.broadcast %319 : vector<1x1x128xf32> to vector<1x8x128xf32>
    %321 = arith.subf %5, %320 : vector<1x8x128xf32>
    %c0_116 = arith.constant 0 : index
    %c5_117 = arith.constant 5 : index
    %c0_118 = arith.constant 0 : index
    %c0_119 = arith.constant 0 : index
    %322 = vector.load %arg4[%c0_116, %c5_117, %c0_118, %c0_119] : memref<2x8x8x128xf32, #tpu.memory_space<vmem>>, vector<1x1x8x128xf32>
    %323 = vector.shape_cast %322 : vector<1x1x8x128xf32> to vector<8x128xf32>
    %324 = vector.shape_cast %323 : vector<8x128xf32> to vector<1x8x128xf32>
    %325 = math.absf %321 : vector<1x8x128xf32>
    %cst_120 = arith.constant 1.000000e+00 : f32
    %326 = vector.broadcast %cst_120 : f32 to vector<1x8x128xf32>
    %327 = arith.addf %326, %325 : vector<1x8x128xf32>
    %328 = tpu.reciprocal %327 {approx = true} : vector<1x8x128xf32> -> vector<1x8x128xf32>
    %329 = arith.mulf %327, %328 : vector<1x8x128xf32>
    %cst_121 = arith.constant 2.000000e+00 : f32
    %330 = vector.broadcast %cst_121 : f32 to vector<1x8x128xf32>
    %331 = arith.subf %330, %329 : vector<1x8x128xf32>
    %332 = arith.mulf %328, %331 : vector<1x8x128xf32>
    %333 = arith.mulf %321, %332 : vector<1x8x128xf32>
    %cst_122 = arith.constant 2.500000e-01 : f32
    %334 = vector.broadcast %cst_122 : f32 to vector<1x8x128xf32>
    %335 = arith.mulf %333, %334 : vector<1x8x128xf32>
    %336 = arith.addf %324, %335 : vector<1x8x128xf32>
    %337 = vector.extract_strided_slice %0 {offsets = [0, 5, 0], sizes = [1, 1, 128], strides = [1, 1, 1]} : vector<1x8x128xf32> to vector<1x1x128xf32>
    %338 = vector.broadcast %337 : vector<1x1x128xf32> to vector<1x8x128xf32>
    %339 = arith.mulf %336, %338 : vector<1x8x128xf32>
    %340 = arith.addf %318, %339 : vector<1x8x128xf32>
    %341 = vector.extract_strided_slice %5 {offsets = [0, 6, 0], sizes = [1, 1, 128], strides = [1, 1, 1]} : vector<1x8x128xf32> to vector<1x1x128xf32>
    %342 = vector.broadcast %341 : vector<1x1x128xf32> to vector<1x8x128xf32>
    %343 = arith.subf %5, %342 : vector<1x8x128xf32>
    %c0_123 = arith.constant 0 : index
    %c6_124 = arith.constant 6 : index
    %c0_125 = arith.constant 0 : index
    %c0_126 = arith.constant 0 : index
    %344 = vector.load %arg4[%c0_123, %c6_124, %c0_125, %c0_126] : memref<2x8x8x128xf32, #tpu.memory_space<vmem>>, vector<1x1x8x128xf32>
    %345 = vector.shape_cast %344 : vector<1x1x8x128xf32> to vector<8x128xf32>
    %346 = vector.shape_cast %345 : vector<8x128xf32> to vector<1x8x128xf32>
    %347 = math.absf %343 : vector<1x8x128xf32>
    %cst_127 = arith.constant 1.000000e+00 : f32
    %348 = vector.broadcast %cst_127 : f32 to vector<1x8x128xf32>
    %349 = arith.addf %348, %347 : vector<1x8x128xf32>
    %350 = tpu.reciprocal %349 {approx = true} : vector<1x8x128xf32> -> vector<1x8x128xf32>
    %351 = arith.mulf %349, %350 : vector<1x8x128xf32>
    %cst_128 = arith.constant 2.000000e+00 : f32
    %352 = vector.broadcast %cst_128 : f32 to vector<1x8x128xf32>
    %353 = arith.subf %352, %351 : vector<1x8x128xf32>
    %354 = arith.mulf %350, %353 : vector<1x8x128xf32>
    %355 = arith.mulf %343, %354 : vector<1x8x128xf32>
    %cst_129 = arith.constant 2.500000e-01 : f32
    %356 = vector.broadcast %cst_129 : f32 to vector<1x8x128xf32>
    %357 = arith.mulf %355, %356 : vector<1x8x128xf32>
    %358 = arith.addf %346, %357 : vector<1x8x128xf32>
    %359 = vector.extract_strided_slice %0 {offsets = [0, 6, 0], sizes = [1, 1, 128], strides = [1, 1, 1]} : vector<1x8x128xf32> to vector<1x1x128xf32>
    %360 = vector.broadcast %359 : vector<1x1x128xf32> to vector<1x8x128xf32>
    %361 = arith.mulf %358, %360 : vector<1x8x128xf32>
    %362 = arith.addf %340, %361 : vector<1x8x128xf32>
    %363 = vector.extract_strided_slice %5 {offsets = [0, 7, 0], sizes = [1, 1, 128], strides = [1, 1, 1]} : vector<1x8x128xf32> to vector<1x1x128xf32>
    %364 = vector.broadcast %363 : vector<1x1x128xf32> to vector<1x8x128xf32>
    %365 = arith.subf %5, %364 : vector<1x8x128xf32>
    %c0_130 = arith.constant 0 : index
    %c7_131 = arith.constant 7 : index
    %c0_132 = arith.constant 0 : index
    %c0_133 = arith.constant 0 : index
    %366 = vector.load %arg4[%c0_130, %c7_131, %c0_132, %c0_133] : memref<2x8x8x128xf32, #tpu.memory_space<vmem>>, vector<1x1x8x128xf32>
    %367 = vector.shape_cast %366 : vector<1x1x8x128xf32> to vector<8x128xf32>
    %368 = vector.shape_cast %367 : vector<8x128xf32> to vector<1x8x128xf32>
    %369 = math.absf %365 : vector<1x8x128xf32>
    %cst_134 = arith.constant 1.000000e+00 : f32
    %370 = vector.broadcast %cst_134 : f32 to vector<1x8x128xf32>
    %371 = arith.addf %370, %369 : vector<1x8x128xf32>
    %372 = tpu.reciprocal %371 {approx = true} : vector<1x8x128xf32> -> vector<1x8x128xf32>
    %373 = arith.mulf %371, %372 : vector<1x8x128xf32>
    %cst_135 = arith.constant 2.000000e+00 : f32
    %374 = vector.broadcast %cst_135 : f32 to vector<1x8x128xf32>
    %375 = arith.subf %374, %373 : vector<1x8x128xf32>
    %376 = arith.mulf %372, %375 : vector<1x8x128xf32>
    %377 = arith.mulf %365, %376 : vector<1x8x128xf32>
    %cst_136 = arith.constant 2.500000e-01 : f32
    %378 = vector.broadcast %cst_136 : f32 to vector<1x8x128xf32>
    %379 = arith.mulf %377, %378 : vector<1x8x128xf32>
    %380 = arith.addf %368, %379 : vector<1x8x128xf32>
    %381 = vector.extract_strided_slice %0 {offsets = [0, 7, 0], sizes = [1, 1, 128], strides = [1, 1, 1]} : vector<1x8x128xf32> to vector<1x1x128xf32>
    %382 = vector.broadcast %381 : vector<1x1x128xf32> to vector<1x8x128xf32>
    %383 = arith.mulf %380, %382 : vector<1x8x128xf32>
    %384 = arith.addf %362, %383 : vector<1x8x128xf32>
    %385 = vector.shape_cast %384 : vector<1x8x128xf32> to vector<8x128xf32>
    %c0_137 = arith.constant 0 : index
    %c0_138 = arith.constant 0 : index
    %c0_139 = arith.constant 0 : index
    %386 = vector.load %arg5[%c0_137, %c0_138, %c0_139] : memref<2x128x128xf32, #tpu.memory_space<vmem>>, vector<1x128x128xf32>
    %387 = vector.shape_cast %386 : vector<1x128x128xf32> to vector<128x128xf32>
    %cst_140 = arith.constant dense<0.000000e+00> : vector<8x128xf32>
    %388 = tpu.matmul %385, %387, %cst_140 {dimension_numbers = #tpu.dot_dimension_numbers<[1], [0], [0], [1], [0, 0, 1, 1], [], []>} : vector<8x128xf32>, vector<128x128xf32>, vector<8x128xf32> -> vector<8x128xf32>
    %c0_141 = arith.constant 0 : index
    %c0_142 = arith.constant 0 : index
    %c0_143 = arith.constant 0 : index
    %389 = vector.load %arg8[%c0_141, %c0_142, %c0_143] : memref<2x1x128xf32, #tpu.memory_space<vmem>>, vector<1x1x128xf32>
    %390 = vector.shape_cast %389 : vector<1x1x128xf32> to vector<1x128xf32>
    %391 = vector.broadcast %390 : vector<1x128xf32> to vector<8x128xf32>
    %392 = arith.mulf %388, %391 : vector<8x128xf32>
    %c0_144 = arith.constant 0 : index
    %c0_145 = arith.constant 0 : index
    %c0_146 = arith.constant 0 : index
    %393 = vector.load %arg9[%c0_144, %c0_145, %c0_146] : memref<2x1x128xf32, #tpu.memory_space<vmem>>, vector<1x1x128xf32>
    %394 = vector.shape_cast %393 : vector<1x1x128xf32> to vector<1x128xf32>
    %395 = vector.broadcast %394 : vector<1x128xf32> to vector<8x128xf32>
    %396 = arith.addf %392, %395 : vector<8x128xf32>
    %397 = math.tanh %396 : vector<8x128xf32>
    %398 = vector.shape_cast %397 : vector<8x128xf32> to vector<1x8x128xf32>
    %399 = vector.shape_cast %398 : vector<1x8x128xf32> to vector<8x128xf32>
    %cst_147 = arith.constant dense<0.000000e+00> : vector<8x128xf32>
    %400 = tpu.matmul %399, %1, %cst_147 {dimension_numbers = #tpu.dot_dimension_numbers<[1], [0], [0], [1], [0, 0, 1, 1], [], []>} : vector<8x128xf32>, vector<128x128xf32>, vector<8x128xf32> -> vector<8x128xf32>
    %401 = vector.shape_cast %400 : vector<8x128xf32> to vector<1x8x128xf32>
    %cst_148 = arith.constant dense<0.000000e+00> : vector<8x1024xf32>
    %402 = tpu.matmul %399, %2, %cst_148 {dimension_numbers = #tpu.dot_dimension_numbers<[1], [0], [0], [1], [0, 0, 1, 1], [], []>} : vector<8x128xf32>, vector<128x1024xf32>, vector<8x1024xf32> -> vector<8x1024xf32>
    %403 = vector.shape_cast %402 : vector<8x1024xf32> to vector<1x8x1024xf32>
    %cst_149 = arith.constant 0.000000e+00 : f32
    %404 = vector.broadcast %cst_149 : f32 to vector<1x8x128xf32>
    %405 = vector.extract_strided_slice %401 {offsets = [0, 0, 0], sizes = [1, 8, 1], strides = [1, 1, 1]} : vector<1x8x128xf32> to vector<1x8x1xf32>
    %406 = vector.broadcast %405 : vector<1x8x1xf32> to vector<1x8x128xf32>
    %407 = arith.subf %401, %406 : vector<1x8x128xf32>
    %c1_150 = arith.constant 1 : index
    %c0_151 = arith.constant 0 : index
    %c0_152 = arith.constant 0 : index
    %c0_153 = arith.constant 0 : index
    %408 = vector.load %arg3[%c1_150, %c0_151, %c0_152, %c0_153] : memref<2x8x8x128xf32, #tpu.memory_space<vmem>>, vector<1x1x8x128xf32>
    %409 = vector.shape_cast %408 : vector<1x1x8x128xf32> to vector<8x128xf32>
    %410 = vector.shape_cast %409 : vector<8x128xf32> to vector<1x8x128xf32>
    %c0_154 = arith.constant 0 : index
    %c0_155 = arith.constant 0 : index
    %c0_156 = arith.constant 0 : index
    %411 = vector.load %arg2[%c0_154, %c0_155, %c0_156] : memref<8x8x128xf32, #tpu.memory_space<vmem>>, vector<1x8x128xf32>
    %412 = vector.shape_cast %411 : vector<1x8x128xf32> to vector<8x128xf32>
    %413 = vector.shape_cast %412 : vector<8x128xf32> to vector<1x8x128xf32>
    %414 = arith.mulf %407, %413 : vector<1x8x128xf32>
    %415 = math.absf %414 : vector<1x8x128xf32>
    %cst_157 = arith.constant 1.000000e+00 : f32
    %416 = vector.broadcast %cst_157 : f32 to vector<1x8x128xf32>
    %417 = arith.addf %416, %415 : vector<1x8x128xf32>
    %418 = tpu.reciprocal %417 {approx = true} : vector<1x8x128xf32> -> vector<1x8x128xf32>
    %419 = arith.mulf %417, %418 : vector<1x8x128xf32>
    %cst_158 = arith.constant 2.000000e+00 : f32
    %420 = vector.broadcast %cst_158 : f32 to vector<1x8x128xf32>
    %421 = arith.subf %420, %419 : vector<1x8x128xf32>
    %422 = arith.mulf %418, %421 : vector<1x8x128xf32>
    %423 = arith.mulf %414, %422 : vector<1x8x128xf32>
    %cst_159 = arith.constant 2.500000e-01 : f32
    %424 = vector.broadcast %cst_159 : f32 to vector<1x8x128xf32>
    %425 = arith.mulf %423, %424 : vector<1x8x128xf32>
    %426 = arith.addf %410, %425 : vector<1x8x128xf32>
    %427 = vector.extract_strided_slice %403 {offsets = [0, 0, 0], sizes = [1, 8, 128], strides = [1, 1, 1]} : vector<1x8x1024xf32> to vector<1x8x128xf32>
    %428 = arith.mulf %426, %427 : vector<1x8x128xf32>
    %429 = arith.addf %404, %428 : vector<1x8x128xf32>
    %430 = vector.extract_strided_slice %401 {offsets = [0, 0, 16], sizes = [1, 8, 1], strides = [1, 1, 1]} : vector<1x8x128xf32> to vector<1x8x1xf32>
    %431 = vector.broadcast %430 : vector<1x8x1xf32> to vector<1x8x128xf32>
    %432 = arith.subf %401, %431 : vector<1x8x128xf32>
    %c1_160 = arith.constant 1 : index
    %c1_161 = arith.constant 1 : index
    %c0_162 = arith.constant 0 : index
    %c0_163 = arith.constant 0 : index
    %433 = vector.load %arg3[%c1_160, %c1_161, %c0_162, %c0_163] : memref<2x8x8x128xf32, #tpu.memory_space<vmem>>, vector<1x1x8x128xf32>
    %434 = vector.shape_cast %433 : vector<1x1x8x128xf32> to vector<8x128xf32>
    %435 = vector.shape_cast %434 : vector<8x128xf32> to vector<1x8x128xf32>
    %c1_164 = arith.constant 1 : index
    %c0_165 = arith.constant 0 : index
    %c0_166 = arith.constant 0 : index
    %436 = vector.load %arg2[%c1_164, %c0_165, %c0_166] : memref<8x8x128xf32, #tpu.memory_space<vmem>>, vector<1x8x128xf32>
    %437 = vector.shape_cast %436 : vector<1x8x128xf32> to vector<8x128xf32>
    %438 = vector.shape_cast %437 : vector<8x128xf32> to vector<1x8x128xf32>
    %439 = arith.mulf %432, %438 : vector<1x8x128xf32>
    %440 = math.absf %439 : vector<1x8x128xf32>
    %cst_167 = arith.constant 1.000000e+00 : f32
    %441 = vector.broadcast %cst_167 : f32 to vector<1x8x128xf32>
    %442 = arith.addf %441, %440 : vector<1x8x128xf32>
    %443 = tpu.reciprocal %442 {approx = true} : vector<1x8x128xf32> -> vector<1x8x128xf32>
    %444 = arith.mulf %442, %443 : vector<1x8x128xf32>
    %cst_168 = arith.constant 2.000000e+00 : f32
    %445 = vector.broadcast %cst_168 : f32 to vector<1x8x128xf32>
    %446 = arith.subf %445, %444 : vector<1x8x128xf32>
    %447 = arith.mulf %443, %446 : vector<1x8x128xf32>
    %448 = arith.mulf %439, %447 : vector<1x8x128xf32>
    %cst_169 = arith.constant 2.500000e-01 : f32
    %449 = vector.broadcast %cst_169 : f32 to vector<1x8x128xf32>
    %450 = arith.mulf %448, %449 : vector<1x8x128xf32>
    %451 = arith.addf %435, %450 : vector<1x8x128xf32>
    %452 = vector.extract_strided_slice %403 {offsets = [0, 0, 128], sizes = [1, 8, 128], strides = [1, 1, 1]} : vector<1x8x1024xf32> to vector<1x8x128xf32>
    %453 = arith.mulf %451, %452 : vector<1x8x128xf32>
    %454 = arith.addf %429, %453 : vector<1x8x128xf32>
    %455 = vector.extract_strided_slice %401 {offsets = [0, 0, 32], sizes = [1, 8, 1], strides = [1, 1, 1]} : vector<1x8x128xf32> to vector<1x8x1xf32>
    %456 = vector.broadcast %455 : vector<1x8x1xf32> to vector<1x8x128xf32>
    %457 = arith.subf %401, %456 : vector<1x8x128xf32>
    %c1_170 = arith.constant 1 : index
    %c2_171 = arith.constant 2 : index
    %c0_172 = arith.constant 0 : index
    %c0_173 = arith.constant 0 : index
    %458 = vector.load %arg3[%c1_170, %c2_171, %c0_172, %c0_173] : memref<2x8x8x128xf32, #tpu.memory_space<vmem>>, vector<1x1x8x128xf32>
    %459 = vector.shape_cast %458 : vector<1x1x8x128xf32> to vector<8x128xf32>
    %460 = vector.shape_cast %459 : vector<8x128xf32> to vector<1x8x128xf32>
    %c2_174 = arith.constant 2 : index
    %c0_175 = arith.constant 0 : index
    %c0_176 = arith.constant 0 : index
    %461 = vector.load %arg2[%c2_174, %c0_175, %c0_176] : memref<8x8x128xf32, #tpu.memory_space<vmem>>, vector<1x8x128xf32>
    %462 = vector.shape_cast %461 : vector<1x8x128xf32> to vector<8x128xf32>
    %463 = vector.shape_cast %462 : vector<8x128xf32> to vector<1x8x128xf32>
    %464 = arith.mulf %457, %463 : vector<1x8x128xf32>
    %465 = math.absf %464 : vector<1x8x128xf32>
    %cst_177 = arith.constant 1.000000e+00 : f32
    %466 = vector.broadcast %cst_177 : f32 to vector<1x8x128xf32>
    %467 = arith.addf %466, %465 : vector<1x8x128xf32>
    %468 = tpu.reciprocal %467 {approx = true} : vector<1x8x128xf32> -> vector<1x8x128xf32>
    %469 = arith.mulf %467, %468 : vector<1x8x128xf32>
    %cst_178 = arith.constant 2.000000e+00 : f32
    %470 = vector.broadcast %cst_178 : f32 to vector<1x8x128xf32>
    %471 = arith.subf %470, %469 : vector<1x8x128xf32>
    %472 = arith.mulf %468, %471 : vector<1x8x128xf32>
    %473 = arith.mulf %464, %472 : vector<1x8x128xf32>
    %cst_179 = arith.constant 2.500000e-01 : f32
    %474 = vector.broadcast %cst_179 : f32 to vector<1x8x128xf32>
    %475 = arith.mulf %473, %474 : vector<1x8x128xf32>
    %476 = arith.addf %460, %475 : vector<1x8x128xf32>
    %477 = vector.extract_strided_slice %403 {offsets = [0, 0, 256], sizes = [1, 8, 128], strides = [1, 1, 1]} : vector<1x8x1024xf32> to vector<1x8x128xf32>
    %478 = arith.mulf %476, %477 : vector<1x8x128xf32>
    %479 = arith.addf %454, %478 : vector<1x8x128xf32>
    %480 = vector.extract_strided_slice %401 {offsets = [0, 0, 48], sizes = [1, 8, 1], strides = [1, 1, 1]} : vector<1x8x128xf32> to vector<1x8x1xf32>
    %481 = vector.broadcast %480 : vector<1x8x1xf32> to vector<1x8x128xf32>
    %482 = arith.subf %401, %481 : vector<1x8x128xf32>
    %c1_180 = arith.constant 1 : index
    %c3_181 = arith.constant 3 : index
    %c0_182 = arith.constant 0 : index
    %c0_183 = arith.constant 0 : index
    %483 = vector.load %arg3[%c1_180, %c3_181, %c0_182, %c0_183] : memref<2x8x8x128xf32, #tpu.memory_space<vmem>>, vector<1x1x8x128xf32>
    %484 = vector.shape_cast %483 : vector<1x1x8x128xf32> to vector<8x128xf32>
    %485 = vector.shape_cast %484 : vector<8x128xf32> to vector<1x8x128xf32>
    %c3_184 = arith.constant 3 : index
    %c0_185 = arith.constant 0 : index
    %c0_186 = arith.constant 0 : index
    %486 = vector.load %arg2[%c3_184, %c0_185, %c0_186] : memref<8x8x128xf32, #tpu.memory_space<vmem>>, vector<1x8x128xf32>
    %487 = vector.shape_cast %486 : vector<1x8x128xf32> to vector<8x128xf32>
    %488 = vector.shape_cast %487 : vector<8x128xf32> to vector<1x8x128xf32>
    %489 = arith.mulf %482, %488 : vector<1x8x128xf32>
    %490 = math.absf %489 : vector<1x8x128xf32>
    %cst_187 = arith.constant 1.000000e+00 : f32
    %491 = vector.broadcast %cst_187 : f32 to vector<1x8x128xf32>
    %492 = arith.addf %491, %490 : vector<1x8x128xf32>
    %493 = tpu.reciprocal %492 {approx = true} : vector<1x8x128xf32> -> vector<1x8x128xf32>
    %494 = arith.mulf %492, %493 : vector<1x8x128xf32>
    %cst_188 = arith.constant 2.000000e+00 : f32
    %495 = vector.broadcast %cst_188 : f32 to vector<1x8x128xf32>
    %496 = arith.subf %495, %494 : vector<1x8x128xf32>
    %497 = arith.mulf %493, %496 : vector<1x8x128xf32>
    %498 = arith.mulf %489, %497 : vector<1x8x128xf32>
    %cst_189 = arith.constant 2.500000e-01 : f32
    %499 = vector.broadcast %cst_189 : f32 to vector<1x8x128xf32>
    %500 = arith.mulf %498, %499 : vector<1x8x128xf32>
    %501 = arith.addf %485, %500 : vector<1x8x128xf32>
    %502 = vector.extract_strided_slice %403 {offsets = [0, 0, 384], sizes = [1, 8, 128], strides = [1, 1, 1]} : vector<1x8x1024xf32> to vector<1x8x128xf32>
    %503 = arith.mulf %501, %502 : vector<1x8x128xf32>
    %504 = arith.addf %479, %503 : vector<1x8x128xf32>
    %505 = vector.extract_strided_slice %401 {offsets = [0, 0, 64], sizes = [1, 8, 1], strides = [1, 1, 1]} : vector<1x8x128xf32> to vector<1x8x1xf32>
    %506 = vector.broadcast %505 : vector<1x8x1xf32> to vector<1x8x128xf32>
    %507 = arith.subf %401, %506 : vector<1x8x128xf32>
    %c1_190 = arith.constant 1 : index
    %c4_191 = arith.constant 4 : index
    %c0_192 = arith.constant 0 : index
    %c0_193 = arith.constant 0 : index
    %508 = vector.load %arg3[%c1_190, %c4_191, %c0_192, %c0_193] : memref<2x8x8x128xf32, #tpu.memory_space<vmem>>, vector<1x1x8x128xf32>
    %509 = vector.shape_cast %508 : vector<1x1x8x128xf32> to vector<8x128xf32>
    %510 = vector.shape_cast %509 : vector<8x128xf32> to vector<1x8x128xf32>
    %c4_194 = arith.constant 4 : index
    %c0_195 = arith.constant 0 : index
    %c0_196 = arith.constant 0 : index
    %511 = vector.load %arg2[%c4_194, %c0_195, %c0_196] : memref<8x8x128xf32, #tpu.memory_space<vmem>>, vector<1x8x128xf32>
    %512 = vector.shape_cast %511 : vector<1x8x128xf32> to vector<8x128xf32>
    %513 = vector.shape_cast %512 : vector<8x128xf32> to vector<1x8x128xf32>
    %514 = arith.mulf %507, %513 : vector<1x8x128xf32>
    %515 = math.absf %514 : vector<1x8x128xf32>
    %cst_197 = arith.constant 1.000000e+00 : f32
    %516 = vector.broadcast %cst_197 : f32 to vector<1x8x128xf32>
    %517 = arith.addf %516, %515 : vector<1x8x128xf32>
    %518 = tpu.reciprocal %517 {approx = true} : vector<1x8x128xf32> -> vector<1x8x128xf32>
    %519 = arith.mulf %517, %518 : vector<1x8x128xf32>
    %cst_198 = arith.constant 2.000000e+00 : f32
    %520 = vector.broadcast %cst_198 : f32 to vector<1x8x128xf32>
    %521 = arith.subf %520, %519 : vector<1x8x128xf32>
    %522 = arith.mulf %518, %521 : vector<1x8x128xf32>
    %523 = arith.mulf %514, %522 : vector<1x8x128xf32>
    %cst_199 = arith.constant 2.500000e-01 : f32
    %524 = vector.broadcast %cst_199 : f32 to vector<1x8x128xf32>
    %525 = arith.mulf %523, %524 : vector<1x8x128xf32>
    %526 = arith.addf %510, %525 : vector<1x8x128xf32>
    %527 = vector.extract_strided_slice %403 {offsets = [0, 0, 512], sizes = [1, 8, 128], strides = [1, 1, 1]} : vector<1x8x1024xf32> to vector<1x8x128xf32>
    %528 = arith.mulf %526, %527 : vector<1x8x128xf32>
    %529 = arith.addf %504, %528 : vector<1x8x128xf32>
    %530 = vector.extract_strided_slice %401 {offsets = [0, 0, 80], sizes = [1, 8, 1], strides = [1, 1, 1]} : vector<1x8x128xf32> to vector<1x8x1xf32>
    %531 = vector.broadcast %530 : vector<1x8x1xf32> to vector<1x8x128xf32>
    %532 = arith.subf %401, %531 : vector<1x8x128xf32>
    %c1_200 = arith.constant 1 : index
    %c5_201 = arith.constant 5 : index
    %c0_202 = arith.constant 0 : index
    %c0_203 = arith.constant 0 : index
    %533 = vector.load %arg3[%c1_200, %c5_201, %c0_202, %c0_203] : memref<2x8x8x128xf32, #tpu.memory_space<vmem>>, vector<1x1x8x128xf32>
    %534 = vector.shape_cast %533 : vector<1x1x8x128xf32> to vector<8x128xf32>
    %535 = vector.shape_cast %534 : vector<8x128xf32> to vector<1x8x128xf32>
    %c5_204 = arith.constant 5 : index
    %c0_205 = arith.constant 0 : index
    %c0_206 = arith.constant 0 : index
    %536 = vector.load %arg2[%c5_204, %c0_205, %c0_206] : memref<8x8x128xf32, #tpu.memory_space<vmem>>, vector<1x8x128xf32>
    %537 = vector.shape_cast %536 : vector<1x8x128xf32> to vector<8x128xf32>
    %538 = vector.shape_cast %537 : vector<8x128xf32> to vector<1x8x128xf32>
    %539 = arith.mulf %532, %538 : vector<1x8x128xf32>
    %540 = math.absf %539 : vector<1x8x128xf32>
    %cst_207 = arith.constant 1.000000e+00 : f32
    %541 = vector.broadcast %cst_207 : f32 to vector<1x8x128xf32>
    %542 = arith.addf %541, %540 : vector<1x8x128xf32>
    %543 = tpu.reciprocal %542 {approx = true} : vector<1x8x128xf32> -> vector<1x8x128xf32>
    %544 = arith.mulf %542, %543 : vector<1x8x128xf32>
    %cst_208 = arith.constant 2.000000e+00 : f32
    %545 = vector.broadcast %cst_208 : f32 to vector<1x8x128xf32>
    %546 = arith.subf %545, %544 : vector<1x8x128xf32>
    %547 = arith.mulf %543, %546 : vector<1x8x128xf32>
    %548 = arith.mulf %539, %547 : vector<1x8x128xf32>
    %cst_209 = arith.constant 2.500000e-01 : f32
    %549 = vector.broadcast %cst_209 : f32 to vector<1x8x128xf32>
    %550 = arith.mulf %548, %549 : vector<1x8x128xf32>
    %551 = arith.addf %535, %550 : vector<1x8x128xf32>
    %552 = vector.extract_strided_slice %403 {offsets = [0, 0, 640], sizes = [1, 8, 128], strides = [1, 1, 1]} : vector<1x8x1024xf32> to vector<1x8x128xf32>
    %553 = arith.mulf %551, %552 : vector<1x8x128xf32>
    %554 = arith.addf %529, %553 : vector<1x8x128xf32>
    %555 = vector.extract_strided_slice %401 {offsets = [0, 0, 96], sizes = [1, 8, 1], strides = [1, 1, 1]} : vector<1x8x128xf32> to vector<1x8x1xf32>
    %556 = vector.broadcast %555 : vector<1x8x1xf32> to vector<1x8x128xf32>
    %557 = arith.subf %401, %556 : vector<1x8x128xf32>
    %c1_210 = arith.constant 1 : index
    %c6_211 = arith.constant 6 : index
    %c0_212 = arith.constant 0 : index
    %c0_213 = arith.constant 0 : index
    %558 = vector.load %arg3[%c1_210, %c6_211, %c0_212, %c0_213] : memref<2x8x8x128xf32, #tpu.memory_space<vmem>>, vector<1x1x8x128xf32>
    %559 = vector.shape_cast %558 : vector<1x1x8x128xf32> to vector<8x128xf32>
    %560 = vector.shape_cast %559 : vector<8x128xf32> to vector<1x8x128xf32>
    %c6_214 = arith.constant 6 : index
    %c0_215 = arith.constant 0 : index
    %c0_216 = arith.constant 0 : index
    %561 = vector.load %arg2[%c6_214, %c0_215, %c0_216] : memref<8x8x128xf32, #tpu.memory_space<vmem>>, vector<1x8x128xf32>
    %562 = vector.shape_cast %561 : vector<1x8x128xf32> to vector<8x128xf32>
    %563 = vector.shape_cast %562 : vector<8x128xf32> to vector<1x8x128xf32>
    %564 = arith.mulf %557, %563 : vector<1x8x128xf32>
    %565 = math.absf %564 : vector<1x8x128xf32>
    %cst_217 = arith.constant 1.000000e+00 : f32
    %566 = vector.broadcast %cst_217 : f32 to vector<1x8x128xf32>
    %567 = arith.addf %566, %565 : vector<1x8x128xf32>
    %568 = tpu.reciprocal %567 {approx = true} : vector<1x8x128xf32> -> vector<1x8x128xf32>
    %569 = arith.mulf %567, %568 : vector<1x8x128xf32>
    %cst_218 = arith.constant 2.000000e+00 : f32
    %570 = vector.broadcast %cst_218 : f32 to vector<1x8x128xf32>
    %571 = arith.subf %570, %569 : vector<1x8x128xf32>
    %572 = arith.mulf %568, %571 : vector<1x8x128xf32>
    %573 = arith.mulf %564, %572 : vector<1x8x128xf32>
    %cst_219 = arith.constant 2.500000e-01 : f32
    %574 = vector.broadcast %cst_219 : f32 to vector<1x8x128xf32>
    %575 = arith.mulf %573, %574 : vector<1x8x128xf32>
    %576 = arith.addf %560, %575 : vector<1x8x128xf32>
    %577 = vector.extract_strided_slice %403 {offsets = [0, 0, 768], sizes = [1, 8, 128], strides = [1, 1, 1]} : vector<1x8x1024xf32> to vector<1x8x128xf32>
    %578 = arith.mulf %576, %577 : vector<1x8x128xf32>
    %579 = arith.addf %554, %578 : vector<1x8x128xf32>
    %580 = vector.extract_strided_slice %401 {offsets = [0, 0, 112], sizes = [1, 8, 1], strides = [1, 1, 1]} : vector<1x8x128xf32> to vector<1x8x1xf32>
    %581 = vector.broadcast %580 : vector<1x8x1xf32> to vector<1x8x128xf32>
    %582 = arith.subf %401, %581 : vector<1x8x128xf32>
    %c1_220 = arith.constant 1 : index
    %c7_221 = arith.constant 7 : index
    %c0_222 = arith.constant 0 : index
    %c0_223 = arith.constant 0 : index
    %583 = vector.load %arg3[%c1_220, %c7_221, %c0_222, %c0_223] : memref<2x8x8x128xf32, #tpu.memory_space<vmem>>, vector<1x1x8x128xf32>
    %584 = vector.shape_cast %583 : vector<1x1x8x128xf32> to vector<8x128xf32>
    %585 = vector.shape_cast %584 : vector<8x128xf32> to vector<1x8x128xf32>
    %c7_224 = arith.constant 7 : index
    %c0_225 = arith.constant 0 : index
    %c0_226 = arith.constant 0 : index
    %586 = vector.load %arg2[%c7_224, %c0_225, %c0_226] : memref<8x8x128xf32, #tpu.memory_space<vmem>>, vector<1x8x128xf32>
    %587 = vector.shape_cast %586 : vector<1x8x128xf32> to vector<8x128xf32>
    %588 = vector.shape_cast %587 : vector<8x128xf32> to vector<1x8x128xf32>
    %589 = arith.mulf %582, %588 : vector<1x8x128xf32>
    %590 = math.absf %589 : vector<1x8x128xf32>
    %cst_227 = arith.constant 1.000000e+00 : f32
    %591 = vector.broadcast %cst_227 : f32 to vector<1x8x128xf32>
    %592 = arith.addf %591, %590 : vector<1x8x128xf32>
    %593 = tpu.reciprocal %592 {approx = true} : vector<1x8x128xf32> -> vector<1x8x128xf32>
    %594 = arith.mulf %592, %593 : vector<1x8x128xf32>
    %cst_228 = arith.constant 2.000000e+00 : f32
    %595 = vector.broadcast %cst_228 : f32 to vector<1x8x128xf32>
    %596 = arith.subf %595, %594 : vector<1x8x128xf32>
    %597 = arith.mulf %593, %596 : vector<1x8x128xf32>
    %598 = arith.mulf %589, %597 : vector<1x8x128xf32>
    %cst_229 = arith.constant 2.500000e-01 : f32
    %599 = vector.broadcast %cst_229 : f32 to vector<1x8x128xf32>
    %600 = arith.mulf %598, %599 : vector<1x8x128xf32>
    %601 = arith.addf %585, %600 : vector<1x8x128xf32>
    %602 = vector.extract_strided_slice %403 {offsets = [0, 0, 896], sizes = [1, 8, 128], strides = [1, 1, 1]} : vector<1x8x1024xf32> to vector<1x8x128xf32>
    %603 = arith.mulf %601, %602 : vector<1x8x128xf32>
    %604 = arith.addf %579, %603 : vector<1x8x128xf32>
    %605 = vector.extract_strided_slice %401 {offsets = [0, 0, 0], sizes = [1, 1, 128], strides = [1, 1, 1]} : vector<1x8x128xf32> to vector<1x1x128xf32>
    %606 = vector.broadcast %605 : vector<1x1x128xf32> to vector<1x8x128xf32>
    %607 = arith.subf %401, %606 : vector<1x8x128xf32>
    %c1_230 = arith.constant 1 : index
    %c0_231 = arith.constant 0 : index
    %c0_232 = arith.constant 0 : index
    %c0_233 = arith.constant 0 : index
    %608 = vector.load %arg4[%c1_230, %c0_231, %c0_232, %c0_233] : memref<2x8x8x128xf32, #tpu.memory_space<vmem>>, vector<1x1x8x128xf32>
    %609 = vector.shape_cast %608 : vector<1x1x8x128xf32> to vector<8x128xf32>
    %610 = vector.shape_cast %609 : vector<8x128xf32> to vector<1x8x128xf32>
    %611 = math.absf %607 : vector<1x8x128xf32>
    %cst_234 = arith.constant 1.000000e+00 : f32
    %612 = vector.broadcast %cst_234 : f32 to vector<1x8x128xf32>
    %613 = arith.addf %612, %611 : vector<1x8x128xf32>
    %614 = tpu.reciprocal %613 {approx = true} : vector<1x8x128xf32> -> vector<1x8x128xf32>
    %615 = arith.mulf %613, %614 : vector<1x8x128xf32>
    %cst_235 = arith.constant 2.000000e+00 : f32
    %616 = vector.broadcast %cst_235 : f32 to vector<1x8x128xf32>
    %617 = arith.subf %616, %615 : vector<1x8x128xf32>
    %618 = arith.mulf %614, %617 : vector<1x8x128xf32>
    %619 = arith.mulf %607, %618 : vector<1x8x128xf32>
    %cst_236 = arith.constant 2.500000e-01 : f32
    %620 = vector.broadcast %cst_236 : f32 to vector<1x8x128xf32>
    %621 = arith.mulf %619, %620 : vector<1x8x128xf32>
    %622 = arith.addf %610, %621 : vector<1x8x128xf32>
    %623 = vector.extract_strided_slice %398 {offsets = [0, 0, 0], sizes = [1, 1, 128], strides = [1, 1, 1]} : vector<1x8x128xf32> to vector<1x1x128xf32>
    %624 = vector.broadcast %623 : vector<1x1x128xf32> to vector<1x8x128xf32>
    %625 = arith.mulf %622, %624 : vector<1x8x128xf32>
    %626 = arith.addf %604, %625 : vector<1x8x128xf32>
    %627 = vector.extract_strided_slice %401 {offsets = [0, 1, 0], sizes = [1, 1, 128], strides = [1, 1, 1]} : vector<1x8x128xf32> to vector<1x1x128xf32>
    %628 = vector.broadcast %627 : vector<1x1x128xf32> to vector<1x8x128xf32>
    %629 = arith.subf %401, %628 : vector<1x8x128xf32>
    %c1_237 = arith.constant 1 : index
    %c1_238 = arith.constant 1 : index
    %c0_239 = arith.constant 0 : index
    %c0_240 = arith.constant 0 : index
    %630 = vector.load %arg4[%c1_237, %c1_238, %c0_239, %c0_240] : memref<2x8x8x128xf32, #tpu.memory_space<vmem>>, vector<1x1x8x128xf32>
    %631 = vector.shape_cast %630 : vector<1x1x8x128xf32> to vector<8x128xf32>
    %632 = vector.shape_cast %631 : vector<8x128xf32> to vector<1x8x128xf32>
    %633 = math.absf %629 : vector<1x8x128xf32>
    %cst_241 = arith.constant 1.000000e+00 : f32
    %634 = vector.broadcast %cst_241 : f32 to vector<1x8x128xf32>
    %635 = arith.addf %634, %633 : vector<1x8x128xf32>
    %636 = tpu.reciprocal %635 {approx = true} : vector<1x8x128xf32> -> vector<1x8x128xf32>
    %637 = arith.mulf %635, %636 : vector<1x8x128xf32>
    %cst_242 = arith.constant 2.000000e+00 : f32
    %638 = vector.broadcast %cst_242 : f32 to vector<1x8x128xf32>
    %639 = arith.subf %638, %637 : vector<1x8x128xf32>
    %640 = arith.mulf %636, %639 : vector<1x8x128xf32>
    %641 = arith.mulf %629, %640 : vector<1x8x128xf32>
    %cst_243 = arith.constant 2.500000e-01 : f32
    %642 = vector.broadcast %cst_243 : f32 to vector<1x8x128xf32>
    %643 = arith.mulf %641, %642 : vector<1x8x128xf32>
    %644 = arith.addf %632, %643 : vector<1x8x128xf32>
    %645 = vector.extract_strided_slice %398 {offsets = [0, 1, 0], sizes = [1, 1, 128], strides = [1, 1, 1]} : vector<1x8x128xf32> to vector<1x1x128xf32>
    %646 = vector.broadcast %645 : vector<1x1x128xf32> to vector<1x8x128xf32>
    %647 = arith.mulf %644, %646 : vector<1x8x128xf32>
    %648 = arith.addf %626, %647 : vector<1x8x128xf32>
    %649 = vector.extract_strided_slice %401 {offsets = [0, 2, 0], sizes = [1, 1, 128], strides = [1, 1, 1]} : vector<1x8x128xf32> to vector<1x1x128xf32>
    %650 = vector.broadcast %649 : vector<1x1x128xf32> to vector<1x8x128xf32>
    %651 = arith.subf %401, %650 : vector<1x8x128xf32>
    %c1_244 = arith.constant 1 : index
    %c2_245 = arith.constant 2 : index
    %c0_246 = arith.constant 0 : index
    %c0_247 = arith.constant 0 : index
    %652 = vector.load %arg4[%c1_244, %c2_245, %c0_246, %c0_247] : memref<2x8x8x128xf32, #tpu.memory_space<vmem>>, vector<1x1x8x128xf32>
    %653 = vector.shape_cast %652 : vector<1x1x8x128xf32> to vector<8x128xf32>
    %654 = vector.shape_cast %653 : vector<8x128xf32> to vector<1x8x128xf32>
    %655 = math.absf %651 : vector<1x8x128xf32>
    %cst_248 = arith.constant 1.000000e+00 : f32
    %656 = vector.broadcast %cst_248 : f32 to vector<1x8x128xf32>
    %657 = arith.addf %656, %655 : vector<1x8x128xf32>
    %658 = tpu.reciprocal %657 {approx = true} : vector<1x8x128xf32> -> vector<1x8x128xf32>
    %659 = arith.mulf %657, %658 : vector<1x8x128xf32>
    %cst_249 = arith.constant 2.000000e+00 : f32
    %660 = vector.broadcast %cst_249 : f32 to vector<1x8x128xf32>
    %661 = arith.subf %660, %659 : vector<1x8x128xf32>
    %662 = arith.mulf %658, %661 : vector<1x8x128xf32>
    %663 = arith.mulf %651, %662 : vector<1x8x128xf32>
    %cst_250 = arith.constant 2.500000e-01 : f32
    %664 = vector.broadcast %cst_250 : f32 to vector<1x8x128xf32>
    %665 = arith.mulf %663, %664 : vector<1x8x128xf32>
    %666 = arith.addf %654, %665 : vector<1x8x128xf32>
    %667 = vector.extract_strided_slice %398 {offsets = [0, 2, 0], sizes = [1, 1, 128], strides = [1, 1, 1]} : vector<1x8x128xf32> to vector<1x1x128xf32>
    %668 = vector.broadcast %667 : vector<1x1x128xf32> to vector<1x8x128xf32>
    %669 = arith.mulf %666, %668 : vector<1x8x128xf32>
    %670 = arith.addf %648, %669 : vector<1x8x128xf32>
    %671 = vector.extract_strided_slice %401 {offsets = [0, 3, 0], sizes = [1, 1, 128], strides = [1, 1, 1]} : vector<1x8x128xf32> to vector<1x1x128xf32>
    %672 = vector.broadcast %671 : vector<1x1x128xf32> to vector<1x8x128xf32>
    %673 = arith.subf %401, %672 : vector<1x8x128xf32>
    %c1_251 = arith.constant 1 : index
    %c3_252 = arith.constant 3 : index
    %c0_253 = arith.constant 0 : index
    %c0_254 = arith.constant 0 : index
    %674 = vector.load %arg4[%c1_251, %c3_252, %c0_253, %c0_254] : memref<2x8x8x128xf32, #tpu.memory_space<vmem>>, vector<1x1x8x128xf32>
    %675 = vector.shape_cast %674 : vector<1x1x8x128xf32> to vector<8x128xf32>
    %676 = vector.shape_cast %675 : vector<8x128xf32> to vector<1x8x128xf32>
    %677 = math.absf %673 : vector<1x8x128xf32>
    %cst_255 = arith.constant 1.000000e+00 : f32
    %678 = vector.broadcast %cst_255 : f32 to vector<1x8x128xf32>
    %679 = arith.addf %678, %677 : vector<1x8x128xf32>
    %680 = tpu.reciprocal %679 {approx = true} : vector<1x8x128xf32> -> vector<1x8x128xf32>
    %681 = arith.mulf %679, %680 : vector<1x8x128xf32>
    %cst_256 = arith.constant 2.000000e+00 : f32
    %682 = vector.broadcast %cst_256 : f32 to vector<1x8x128xf32>
    %683 = arith.subf %682, %681 : vector<1x8x128xf32>
    %684 = arith.mulf %680, %683 : vector<1x8x128xf32>
    %685 = arith.mulf %673, %684 : vector<1x8x128xf32>
    %cst_257 = arith.constant 2.500000e-01 : f32
    %686 = vector.broadcast %cst_257 : f32 to vector<1x8x128xf32>
    %687 = arith.mulf %685, %686 : vector<1x8x128xf32>
    %688 = arith.addf %676, %687 : vector<1x8x128xf32>
    %689 = vector.extract_strided_slice %398 {offsets = [0, 3, 0], sizes = [1, 1, 128], strides = [1, 1, 1]} : vector<1x8x128xf32> to vector<1x1x128xf32>
    %690 = vector.broadcast %689 : vector<1x1x128xf32> to vector<1x8x128xf32>
    %691 = arith.mulf %688, %690 : vector<1x8x128xf32>
    %692 = arith.addf %670, %691 : vector<1x8x128xf32>
    %693 = vector.extract_strided_slice %401 {offsets = [0, 4, 0], sizes = [1, 1, 128], strides = [1, 1, 1]} : vector<1x8x128xf32> to vector<1x1x128xf32>
    %694 = vector.broadcast %693 : vector<1x1x128xf32> to vector<1x8x128xf32>
    %695 = arith.subf %401, %694 : vector<1x8x128xf32>
    %c1_258 = arith.constant 1 : index
    %c4_259 = arith.constant 4 : index
    %c0_260 = arith.constant 0 : index
    %c0_261 = arith.constant 0 : index
    %696 = vector.load %arg4[%c1_258, %c4_259, %c0_260, %c0_261] : memref<2x8x8x128xf32, #tpu.memory_space<vmem>>, vector<1x1x8x128xf32>
    %697 = vector.shape_cast %696 : vector<1x1x8x128xf32> to vector<8x128xf32>
    %698 = vector.shape_cast %697 : vector<8x128xf32> to vector<1x8x128xf32>
    %699 = math.absf %695 : vector<1x8x128xf32>
    %cst_262 = arith.constant 1.000000e+00 : f32
    %700 = vector.broadcast %cst_262 : f32 to vector<1x8x128xf32>
    %701 = arith.addf %700, %699 : vector<1x8x128xf32>
    %702 = tpu.reciprocal %701 {approx = true} : vector<1x8x128xf32> -> vector<1x8x128xf32>
    %703 = arith.mulf %701, %702 : vector<1x8x128xf32>
    %cst_263 = arith.constant 2.000000e+00 : f32
    %704 = vector.broadcast %cst_263 : f32 to vector<1x8x128xf32>
    %705 = arith.subf %704, %703 : vector<1x8x128xf32>
    %706 = arith.mulf %702, %705 : vector<1x8x128xf32>
    %707 = arith.mulf %695, %706 : vector<1x8x128xf32>
    %cst_264 = arith.constant 2.500000e-01 : f32
    %708 = vector.broadcast %cst_264 : f32 to vector<1x8x128xf32>
    %709 = arith.mulf %707, %708 : vector<1x8x128xf32>
    %710 = arith.addf %698, %709 : vector<1x8x128xf32>
    %711 = vector.extract_strided_slice %398 {offsets = [0, 4, 0], sizes = [1, 1, 128], strides = [1, 1, 1]} : vector<1x8x128xf32> to vector<1x1x128xf32>
    %712 = vector.broadcast %711 : vector<1x1x128xf32> to vector<1x8x128xf32>
    %713 = arith.mulf %710, %712 : vector<1x8x128xf32>
    %714 = arith.addf %692, %713 : vector<1x8x128xf32>
    %715 = vector.extract_strided_slice %401 {offsets = [0, 5, 0], sizes = [1, 1, 128], strides = [1, 1, 1]} : vector<1x8x128xf32> to vector<1x1x128xf32>
    %716 = vector.broadcast %715 : vector<1x1x128xf32> to vector<1x8x128xf32>
    %717 = arith.subf %401, %716 : vector<1x8x128xf32>
    %c1_265 = arith.constant 1 : index
    %c5_266 = arith.constant 5 : index
    %c0_267 = arith.constant 0 : index
    %c0_268 = arith.constant 0 : index
    %718 = vector.load %arg4[%c1_265, %c5_266, %c0_267, %c0_268] : memref<2x8x8x128xf32, #tpu.memory_space<vmem>>, vector<1x1x8x128xf32>
    %719 = vector.shape_cast %718 : vector<1x1x8x128xf32> to vector<8x128xf32>
    %720 = vector.shape_cast %719 : vector<8x128xf32> to vector<1x8x128xf32>
    %721 = math.absf %717 : vector<1x8x128xf32>
    %cst_269 = arith.constant 1.000000e+00 : f32
    %722 = vector.broadcast %cst_269 : f32 to vector<1x8x128xf32>
    %723 = arith.addf %722, %721 : vector<1x8x128xf32>
    %724 = tpu.reciprocal %723 {approx = true} : vector<1x8x128xf32> -> vector<1x8x128xf32>
    %725 = arith.mulf %723, %724 : vector<1x8x128xf32>
    %cst_270 = arith.constant 2.000000e+00 : f32
    %726 = vector.broadcast %cst_270 : f32 to vector<1x8x128xf32>
    %727 = arith.subf %726, %725 : vector<1x8x128xf32>
    %728 = arith.mulf %724, %727 : vector<1x8x128xf32>
    %729 = arith.mulf %717, %728 : vector<1x8x128xf32>
    %cst_271 = arith.constant 2.500000e-01 : f32
    %730 = vector.broadcast %cst_271 : f32 to vector<1x8x128xf32>
    %731 = arith.mulf %729, %730 : vector<1x8x128xf32>
    %732 = arith.addf %720, %731 : vector<1x8x128xf32>
    %733 = vector.extract_strided_slice %398 {offsets = [0, 5, 0], sizes = [1, 1, 128], strides = [1, 1, 1]} : vector<1x8x128xf32> to vector<1x1x128xf32>
    %734 = vector.broadcast %733 : vector<1x1x128xf32> to vector<1x8x128xf32>
    %735 = arith.mulf %732, %734 : vector<1x8x128xf32>
    %736 = arith.addf %714, %735 : vector<1x8x128xf32>
    %737 = vector.extract_strided_slice %401 {offsets = [0, 6, 0], sizes = [1, 1, 128], strides = [1, 1, 1]} : vector<1x8x128xf32> to vector<1x1x128xf32>
    %738 = vector.broadcast %737 : vector<1x1x128xf32> to vector<1x8x128xf32>
    %739 = arith.subf %401, %738 : vector<1x8x128xf32>
    %c1_272 = arith.constant 1 : index
    %c6_273 = arith.constant 6 : index
    %c0_274 = arith.constant 0 : index
    %c0_275 = arith.constant 0 : index
    %740 = vector.load %arg4[%c1_272, %c6_273, %c0_274, %c0_275] : memref<2x8x8x128xf32, #tpu.memory_space<vmem>>, vector<1x1x8x128xf32>
    %741 = vector.shape_cast %740 : vector<1x1x8x128xf32> to vector<8x128xf32>
    %742 = vector.shape_cast %741 : vector<8x128xf32> to vector<1x8x128xf32>
    %743 = math.absf %739 : vector<1x8x128xf32>
    %cst_276 = arith.constant 1.000000e+00 : f32
    %744 = vector.broadcast %cst_276 : f32 to vector<1x8x128xf32>
    %745 = arith.addf %744, %743 : vector<1x8x128xf32>
    %746 = tpu.reciprocal %745 {approx = true} : vector<1x8x128xf32> -> vector<1x8x128xf32>
    %747 = arith.mulf %745, %746 : vector<1x8x128xf32>
    %cst_277 = arith.constant 2.000000e+00 : f32
    %748 = vector.broadcast %cst_277 : f32 to vector<1x8x128xf32>
    %749 = arith.subf %748, %747 : vector<1x8x128xf32>
    %750 = arith.mulf %746, %749 : vector<1x8x128xf32>
    %751 = arith.mulf %739, %750 : vector<1x8x128xf32>
    %cst_278 = arith.constant 2.500000e-01 : f32
    %752 = vector.broadcast %cst_278 : f32 to vector<1x8x128xf32>
    %753 = arith.mulf %751, %752 : vector<1x8x128xf32>
    %754 = arith.addf %742, %753 : vector<1x8x128xf32>
    %755 = vector.extract_strided_slice %398 {offsets = [0, 6, 0], sizes = [1, 1, 128], strides = [1, 1, 1]} : vector<1x8x128xf32> to vector<1x1x128xf32>
    %756 = vector.broadcast %755 : vector<1x1x128xf32> to vector<1x8x128xf32>
    %757 = arith.mulf %754, %756 : vector<1x8x128xf32>
    %758 = arith.addf %736, %757 : vector<1x8x128xf32>
    %759 = vector.extract_strided_slice %401 {offsets = [0, 7, 0], sizes = [1, 1, 128], strides = [1, 1, 1]} : vector<1x8x128xf32> to vector<1x1x128xf32>
    %760 = vector.broadcast %759 : vector<1x1x128xf32> to vector<1x8x128xf32>
    %761 = arith.subf %401, %760 : vector<1x8x128xf32>
    %c1_279 = arith.constant 1 : index
    %c7_280 = arith.constant 7 : index
    %c0_281 = arith.constant 0 : index
    %c0_282 = arith.constant 0 : index
    %762 = vector.load %arg4[%c1_279, %c7_280, %c0_281, %c0_282] : memref<2x8x8x128xf32, #tpu.memory_space<vmem>>, vector<1x1x8x128xf32>
    %763 = vector.shape_cast %762 : vector<1x1x8x128xf32> to vector<8x128xf32>
    %764 = vector.shape_cast %763 : vector<8x128xf32> to vector<1x8x128xf32>
    %765 = math.absf %761 : vector<1x8x128xf32>
    %cst_283 = arith.constant 1.000000e+00 : f32
    %766 = vector.broadcast %cst_283 : f32 to vector<1x8x128xf32>
    %767 = arith.addf %766, %765 : vector<1x8x128xf32>
    %768 = tpu.reciprocal %767 {approx = true} : vector<1x8x128xf32> -> vector<1x8x128xf32>
    %769 = arith.mulf %767, %768 : vector<1x8x128xf32>
    %cst_284 = arith.constant 2.000000e+00 : f32
    %770 = vector.broadcast %cst_284 : f32 to vector<1x8x128xf32>
    %771 = arith.subf %770, %769 : vector<1x8x128xf32>
    %772 = arith.mulf %768, %771 : vector<1x8x128xf32>
    %773 = arith.mulf %761, %772 : vector<1x8x128xf32>
    %cst_285 = arith.constant 2.500000e-01 : f32
    %774 = vector.broadcast %cst_285 : f32 to vector<1x8x128xf32>
    %775 = arith.mulf %773, %774 : vector<1x8x128xf32>
    %776 = arith.addf %764, %775 : vector<1x8x128xf32>
    %777 = vector.extract_strided_slice %398 {offsets = [0, 7, 0], sizes = [1, 1, 128], strides = [1, 1, 1]} : vector<1x8x128xf32> to vector<1x1x128xf32>
    %778 = vector.broadcast %777 : vector<1x1x128xf32> to vector<1x8x128xf32>
    %779 = arith.mulf %776, %778 : vector<1x8x128xf32>
    %780 = arith.addf %758, %779 : vector<1x8x128xf32>
    %781 = vector.shape_cast %780 : vector<1x8x128xf32> to vector<8x128xf32>
    %c1_286 = arith.constant 1 : index
    %c0_287 = arith.constant 0 : index
    %c0_288 = arith.constant 0 : index
    %782 = vector.load %arg5[%c1_286, %c0_287, %c0_288] : memref<2x128x128xf32, #tpu.memory_space<vmem>>, vector<1x128x128xf32>
    %783 = vector.shape_cast %782 : vector<1x128x128xf32> to vector<128x128xf32>
    %cst_289 = arith.constant dense<0.000000e+00> : vector<8x128xf32>
    %784 = tpu.matmul %781, %783, %cst_289 {dimension_numbers = #tpu.dot_dimension_numbers<[1], [0], [0], [1], [0, 0, 1, 1], [], []>} : vector<8x128xf32>, vector<128x128xf32>, vector<8x128xf32> -> vector<8x128xf32>
    %c1_290 = arith.constant 1 : index
    %c0_291 = arith.constant 0 : index
    %c0_292 = arith.constant 0 : index
    %785 = vector.load %arg8[%c1_290, %c0_291, %c0_292] : memref<2x1x128xf32, #tpu.memory_space<vmem>>, vector<1x1x128xf32>
    %786 = vector.shape_cast %785 : vector<1x1x128xf32> to vector<1x128xf32>
    %787 = vector.broadcast %786 : vector<1x128xf32> to vector<8x128xf32>
    %788 = arith.mulf %784, %787 : vector<8x128xf32>
    %c1_293 = arith.constant 1 : index
    %c0_294 = arith.constant 0 : index
    %c0_295 = arith.constant 0 : index
    %789 = vector.load %arg9[%c1_293, %c0_294, %c0_295] : memref<2x1x128xf32, #tpu.memory_space<vmem>>, vector<1x1x128xf32>
    %790 = vector.shape_cast %789 : vector<1x1x128xf32> to vector<1x128xf32>
    %791 = vector.broadcast %790 : vector<1x128xf32> to vector<8x128xf32>
    %792 = arith.addf %788, %791 : vector<8x128xf32>
    %793 = math.tanh %792 : vector<8x128xf32>
    %794 = vector.shape_cast %793 : vector<8x128xf32> to vector<1x8x128xf32>
    %795 = arith.addf %794, %0 : vector<1x8x128xf32>
    %c0_296 = arith.constant 0 : index
    %c0_297 = arith.constant 0 : index
    %c0_298 = arith.constant 0 : index
    %796 = vector.load %arg10[%c0_296, %c0_297, %c0_298] : memref<1x8x128xf32, #tpu.memory_space<vmem>>, vector<1x8x128xf32>
    tpu.vector_store %arg10[%c0_296, %c0_297, %c0_298], %795 {strides = array<i32>} : memref<1x8x128xf32, #tpu.memory_space<vmem>>, vector<1x8x128xf32>,
    return
  }
  func.func @transform_0(%arg0: i32) -> (i32, i32, i32) {
    %c0_i32 = arith.constant 0 : i32
    %c0_i32_0 = arith.constant 0 : i32
    %c0_i32_1 = arith.constant 0 : i32
    return %arg0, %c0_i32, %c0_i32_0 : i32, i32, i32
  }
  func.func @transform_1(%arg0: i32) -> (i32, i32, i32) {
    %c0_i32 = arith.constant 0 : i32
    %c0_i32_0 = arith.constant 0 : i32
    %c0_i32_1 = arith.constant 0 : i32
    %c0_i32_2 = arith.constant 0 : i32
    return %c0_i32, %c0_i32_0, %c0_i32_1 : i32, i32, i32
  }
  func.func @transform_2(%arg0: i32) -> (i32, i32, i32, i32) {
    %c0_i32 = arith.constant 0 : i32
    %c0_i32_0 = arith.constant 0 : i32
    %c0_i32_1 = arith.constant 0 : i32
    %c0_i32_2 = arith.constant 0 : i32
    %c0_i32_3 = arith.constant 0 : i32
    return %c0_i32, %c0_i32_0, %c0_i32_1, %c0_i32_2 : i32, i32, i32, i32
  }
  func.func @transform_3(%arg0: i32) -> (i32, i32, i32, i32) {
    %c0_i32 = arith.constant 0 : i32
    %c0_i32_0 = arith.constant 0 : i32
    %c0_i32_1 = arith.constant 0 : i32
    %c0_i32_2 = arith.constant 0 : i32
    %c0_i32_3 = arith.constant 0 : i32
    return %c0_i32, %c0_i32_0, %c0_i32_1, %c0_i32_2 : i32, i32, i32, i32
  }
  func.func @transform_4(%arg0: i32) -> (i32, i32, i32) {
    %c0_i32 = arith.constant 0 : i32
    %c0_i32_0 = arith.constant 0 : i32
    %c0_i32_1 = arith.constant 0 : i32
    %c0_i32_2 = arith.constant 0 : i32
    return %c0_i32, %c0_i32_0, %c0_i32_1 : i32, i32, i32
  }
  func.func @transform_5(%arg0: i32) -> (i32, i32) {
    %c0_i32 = arith.constant 0 : i32
    %c0_i32_0 = arith.constant 0 : i32
    %c0_i32_1 = arith.constant 0 : i32
    return %c0_i32, %c0_i32_0 : i32, i32
  }
  func.func @transform_6(%arg0: i32) -> (i32, i32) {
    %c0_i32 = arith.constant 0 : i32
    %c0_i32_0 = arith.constant 0 : i32
    %c0_i32_1 = arith.constant 0 : i32
    return %c0_i32, %c0_i32_0 : i32, i32
  }
  func.func @transform_7(%arg0: i32) -> (i32, i32, i32) {
    %c0_i32 = arith.constant 0 : i32
    %c0_i32_0 = arith.constant 0 : i32
    %c0_i32_1 = arith.constant 0 : i32
    %c0_i32_2 = arith.constant 0 : i32
    return %c0_i32, %c0_i32_0, %c0_i32_1 : i32, i32, i32
  }
  func.func @transform_8(%arg0: i32) -> (i32, i32, i32) {
    %c0_i32 = arith.constant 0 : i32
    %c0_i32_0 = arith.constant 0 : i32
    %c0_i32_1 = arith.constant 0 : i32
    %c0_i32_2 = arith.constant 0 : i32
    return %c0_i32, %c0_i32_0, %c0_i32_1 : i32, i32, i32
  }
  func.func @transform_9(%arg0: i32) -> (i32, i32, i32) {
    %c0_i32 = arith.constant 0 : i32
    %c0_i32_0 = arith.constant 0 : i32
    %c0_i32_1 = arith.constant 0 : i32
    return %arg0, %c0_i32, %c0_i32_0 : i32, i32, i32
  }
}

</mosaic_0001>

<bundles_post_ra>
// kernel: tpu_custom_call.1
= control target key start
LH: loop header
LB: loop body
LE: loop exit
PB: predicated region body
PF: predicated region fallthrough
CT: control target
= control target key end

     0   :  { %s4565_s0 = inlined_call_operand.hbm [shape: f32[2,8,128], index: 0, kind: input, shape index: {}]   ;;  %s4566_s1 = inlined_call_operand.hbm [shape: f32[8,8,128], index: 1, kind: input, shape index: {}]   ;;  %s4567_s2 = inlined_call_operand.hbm [shape: f32[2,8,8,128], index: 2, kind: input, shape index: {}]   ;;  %s4568_s3 = inlined_call_operand.hbm [shape: f32[2,8,8,128], index: 3, kind: input, shape index: {}]   ;;  %s4569_s4 = inlined_call_operand.hbm [shape: f32[2,128,128], index: 4, kind: input, shape index: {}]   ;;  %s4570_s5 = inlined_call_operand.hbm [shape: f32[128,128], index: 5, kind: input, shape index: {}]   ;;  %s4571_s6 = inlined_call_operand.hbm [shape: f32[128,1024], index: 6, kind: input, shape index: {}]   ;;  %s4572_s7 = inlined_call_operand.vmem [shape: f32[2,1,128], index: 7, kind: input, shape index: {}]   ;;  %s4573_s8 = inlined_call_operand.vmem [shape: f32[2,1,128], index: 8, kind: input, shape index: {}]   ;;  %s4574_s9 = inlined_call_operand.hbm [shape: f32[2,8,128], index: 9, kind: output, shape index: {}]  }
   0x1   :  { %4666 = sst [smem:[#allocation89_spill]] %s4566_s1 }
   0x2   :  { %4667 = sst [smem:[#allocation90_spill]] %s4574_s9 }
   0x3   :  { %14 = vsyncpa [#allocation3], 0 }
   0x4   :  { %16 = vsyncpa [#allocation3 + $0x1], 0 }
   0x5   :  { %17 = vsyncpa [#allocation6], 0 }
   0x6   :  { %18 = vsyncpa [#allocation9], 0 }
   0x7   :  { %19 = vsyncpa [#allocation12], 0 }
   0x8   :  { %20 = vsyncpa [#allocation4], 0 }
   0x9   :  { %22 = vsyncpa [#allocation4 + $0x1], 0  ;;  %s3466_s30 = smov 0   ;;  %s3468_s10 = smov 0  }
   0xa   :  { %s3470_s11 = smov 0   ;;  %s3472_s12 = smov 0  }
   0xb LB: > { %s3393_s13 = smov [#allocation5]   ;;  %s3487_s15 = sadd.s32 4294967295, %s3391_s12   ;;  %s3391_s12 = sphi %s3472_s12, %s4841_s12   ;;  %s3387_s11 = sphi %s3470_s11, %s4840_s11   ;;  %s3383_s10 = sphi %s3468_s10, %s4839_s10   ;;  %s3379_s30 = sphi %s3466_s30, %s4838_s30  }
   0xc   : > { %s265_s14 = sshll.u32 %s3393_s13, 4  ;;  %p2312_p0 = scmp.ge.s32.totalorder %s3391_s12, 1  ;;  %s3492_s14 = int_to_ptr.vmem [resolvable:$true] %s265_s14 }
   0xd   : > { %p4576_p1 = scmp.eq.s32.totalorder %s3487_s15, 0  ;;  %p253_p2 = scmp.lt.s32.totalorder %s3391_s12, 3 }
   0xe   : > { %s3394_s17 = smov [#allocation8]   ;;  %s3395_s20 = smov [#allocation11]  }
   0xf   : > { %p3494_p3 = pnand %p2312_p0, %p253_p2  ;;  %s291_s18 = sshll.u32 %s3394_s17, 4  ;;  %s3507_s18 = int_to_ptr.vmem [resolvable:$true] %s291_s18 }
  0x10   : > { %s317_s21 = sshll.u32 %s3395_s20, 4  ;;  %s4670_s1 = sld [smem:[#allocation89_spill]]  ;;  %s3509_s21 = int_to_ptr.vmem [resolvable:$true] %s317_s21 }
  0x11   : > { %s4668_s16 = scalar_select %p3494_p3, 1, 0 }
  0x12   : > { %p2929_p5 = pneg %p3494_p3 }
  0x14   : > { %p3503_p6 = pnand %p2929_p5, %p4576_p1 }
  0x16   : > { %s3115_s24 = scalar_lea.hbm %s4670_s1, 1024  ;;  %p3519_p8 = pneg %p3503_p6 }
  0x17   : > { %p3116_p7 = scmp.ne.s32.totalorder %s4670_s1, %s3115_s24  ;;  %p3122_p11 = scmp.lt.u32.totalorder %s3115_s24, %s4670_s1 }
  0x19   : > { %p3118_p9 = pnand %p3519_p8, %p3116_p7 }
  0x1b   : > { %p3119_p10 = pneg %p3118_p9 }
  0x1d   : > { %p3124_p12 = pnand %p3122_p11, %p3119_p10 }
  0x1f   : > { %3127 = shalt.err (!%p3124_p12)
}
  0x20   : > { %s3128_s13 = scalar_lea.vmem %s3492_s14, 1024  ;;  %p3136_p5 = scmp.lt.s32.totalorder %s3492_s14, %s3492_s14 }
  0x21   : > { %p3129_p13 = scmp.ne.s32.totalorder %s3492_s14, %s3128_s13  ;;  %p3137_p4 = scmp.lt.s32.totalorder %s3128_s13, %s3128_s13 }
  0x23   : > { %p3131_p0 = pnand %p3129_p13, %p3519_p8  ;;  %p3138_p7 = por %p3137_p4, %p3136_p5 }
  0x25   : > { %p3132_p2 = pneg %p3131_p0 }
  0x27   : > { %p3139_p9 = pnand %p3138_p7, %p3132_p2 }
  0x29   : > { %3142 = shalt.err (!%p3139_p9)
}
  0x2a   : > { %s3396_s17 = smov 128   ;;  %s3397_s20 = smov 8  }
  0x2b   : > { %2932 = dma.hbm_to_vmem [thread:$0]  (!%p3503_p6), %s4670_s1, 1024, %s3492_s14, [#allocation6], %s3396_s17, %s3396_s17, %s3397_s20  }
  0x2c   : > { %s3143_s26 = scalar_lea.hbm %s4568_s3, 2048 }
  0x2d   : > { %p3144_p4 = scmp.ne.s32.totalorder %s4568_s3, %s3143_s26  ;;  %p3150_p12 = scmp.lt.u32.totalorder %s3143_s26, %s4568_s3 }
  0x2f   : > { %p3146_p10 = pnand %p3144_p4, %p3519_p8 }
  0x31   : > { %p3147_p11 = pneg %p3146_p10 }
  0x33   : > { %p3152_p13 = pnand %p3150_p12, %p3147_p11 }
  0x35   : > { %3155 = shalt.err (!%p3152_p13)
}
  0x36   : > { %s3156_s14 = scalar_lea.vmem %s3507_s18, 2048  ;;  %p3164_p7 = scmp.lt.s32.totalorder %s3507_s18, %s3507_s18 }
  0x37   : > { %p3157_p0 = scmp.ne.s32.totalorder %s3507_s18, %s3156_s14  ;;  %p3165_p9 = scmp.lt.s32.totalorder %s3156_s14, %s3156_s14 }
  0x39   : > { %p3159_p2 = pnand %p3157_p0, %p3519_p8  ;;  %p3166_p4 = por %p3165_p9, %p3164_p7 }
  0x3b   : > { %p3160_p5 = pneg %p3159_p2 }
  0x3d   : > { %p3167_p10 = pnand %p3166_p4, %p3160_p5 }
  0x3f   : > { %3170 = shalt.err (!%p3167_p10)
}
  0x40   : > { %2938 = dma.hbm_to_vmem [thread:$0]  (!%p3503_p6), %s4568_s3, 2048, %s3507_s18, [#allocation9], %s3396_s17, %s3396_s17, %s3397_s20  }
  0x41   : > { %s3171_s25 = scalar_lea.hbm %s4570_s5, 2048 }
  0x42   : > { %p3172_p11 = scmp.ne.s32.totalorder %s4570_s5, %s3171_s25  ;;  %p3178_p0 = scmp.lt.u32.totalorder %s3171_s25, %s4570_s5 }
  0x44   : > { %p3174_p12 = pnand %p3172_p11, %p3519_p8 }
  0x46   : > { %p3175_p13 = pneg %p3174_p12 }
  0x48   : > { %p3180_p2 = pnand %p3178_p0, %p3175_p13 }
  0x4a   : > { %3183 = shalt.err (!%p3180_p2)
}
  0x4b   : > { %s3184_s18 = scalar_lea.vmem %s3509_s21, 2048  ;;  %p3192_p4 = scmp.lt.s32.totalorder %s3509_s21, %s3509_s21 }
  0x4c   : > { %p3185_p5 = scmp.ne.s32.totalorder %s3509_s21, %s3184_s18  ;;  %p3193_p10 = scmp.lt.s32.totalorder %s3184_s18, %s3184_s18 }
  0x4e   : > { %p3187_p7 = pnand %p3185_p5, %p3519_p8  ;;  %p3194_p11 = por %p3193_p10, %p3192_p4 }
  0x50   : > { %p3188_p9 = pneg %p3187_p7 }
  0x52   : > { %p3195_p12 = pnand %p3194_p11, %p3188_p9 }
  0x54   : > { %3198 = shalt.err (!%p3195_p12)
}
  0x55   : > { %2944 = dma.hbm_to_vmem [thread:$0]  (!%p3503_p6), %s4570_s5, 2048, %s3509_s21, [#allocation12], %s3396_s17, %s3396_s17, %s3397_s20  }
  0x56   : > { %s3398_s22 = smov [#allocation7]   ;;  %s3399_s24 = smov [#allocation10]  }
  0x57   : > { %s278_s23 = sshll.u32 %s3398_s22, 4  ;;  %s304_s25 = sshll.u32 %s3399_s24, 4  ;;  %s279_s23 = int_to_ptr.vmem [resolvable:$true] %s278_s23  ;;  %s305_s25 = int_to_ptr.vmem [resolvable:$true] %s304_s25 }
  0x58   : > { %s3199_s29 = scalar_lea.hbm %s4567_s2, 2048 }
  0x59   : > { %p3200_p13 = scmp.ne.s32.totalorder %s4567_s2, %s3199_s29  ;;  %p3206_p5 = scmp.lt.u32.totalorder %s3199_s29, %s4567_s2 }
  0x5b   : > { %p3202_p0 = pnand %p3200_p13, %p3519_p8 }
  0x5d   : > { %p3203_p2 = pneg %p3202_p0 }
  0x5f   : > { %p3208_p7 = pnand %p3206_p5, %p3203_p2 }
  0x61   : > { %3211 = shalt.err (!%p3208_p7)
}
  0x62   : > { %s3212_s21 = scalar_lea.vmem %s279_s23, 2048  ;;  %p3220_p11 = scmp.lt.s32.totalorder %s279_s23, %s279_s23 }
  0x63   : > { %p3213_p9 = scmp.ne.s32.totalorder %s279_s23, %s3212_s21  ;;  %p3221_p12 = scmp.lt.s32.totalorder %s3212_s21, %s3212_s21 }
  0x65   : > { %p3215_p4 = pnand %p3213_p9, %p3519_p8  ;;  %p3222_p1 = por %p3221_p12, %p3220_p11 }
  0x67   : > { %p3216_p10 = pneg %p3215_p4 }
  0x69   : > { %p3223_p3 = pnand %p3222_p1, %p3216_p10 }
  0x6b   : > { %3226 = shalt.err (!%p3223_p3)
}
  0x6c   : > { %2935 = dma.hbm_to_vmem [thread:$0]  (!%p3503_p6), %s4567_s2, 2048, %s279_s23, [#allocation6], %s3396_s17, %s3396_s17, %s3397_s20  }
  0x6d   : > { %s3227_s26 = scalar_lea.hbm %s4569_s4, 4096 }
  0x6e   : > { %p3228_p1 = scmp.ne.s32.totalorder %s4569_s4, %s3227_s26  ;;  %p3234_p0 = scmp.lt.u32.totalorder %s3227_s26, %s4569_s4 }
  0x70   : > { %p3230_p3 = pnand %p3228_p1, %p3519_p8 }
  0x72   : > { %p3231_p13 = pneg %p3230_p3 }
  0x74   : > { %p3236_p2 = pnand %p3234_p0, %p3231_p13 }
  0x76   : > { %3239 = shalt.err (!%p3236_p2)
}
  0x77   : > { %s3240_s14 = scalar_lea.vmem %s305_s25, 4096  ;;  %p3248_p4 = scmp.lt.s32.totalorder %s305_s25, %s305_s25 }
  0x78   : > { %p3241_p5 = scmp.ne.s32.totalorder %s305_s25, %s3240_s14  ;;  %p3249_p10 = scmp.lt.s32.totalorder %s3240_s14, %s3240_s14 }
  0x7a   : > { %p3243_p7 = pnand %p3241_p5, %p3519_p8  ;;  %p3250_p11 = por %p3249_p10, %p3248_p4 }
  0x7c   : > { %p3244_p9 = pneg %p3243_p7 }
  0x7e   : > { %p3251_p12 = pnand %p3250_p11, %p3244_p9 }
  0x80   : > { %3254 = shalt.err (!%p3251_p12)
}
  0x81   : > { %2941 = dma.hbm_to_vmem [thread:$0]  (!%p3503_p6), %s4569_s4, 4096, %s305_s25, [#allocation9], %s3396_s17, %s3396_s17, %s3397_s20  }
  0x82   : > { %s3400_s1 = smov [#allocation13]   ;;  %s3255_s26 = scalar_lea.hbm %s4571_s6, 16384 }
  0x83   : > { %s330_s9 = sshll.u32 %s3400_s1, 4  ;;  %p3256_p1 = scmp.ne.s32.totalorder %s4571_s6, %s3255_s26  ;;  %s331_s9 = int_to_ptr.vmem [resolvable:$true] %s330_s9 }
  0x84   : > { %p3262_p0 = scmp.lt.u32.totalorder %s3255_s26, %s4571_s6 }
  0x85   : > { %p3258_p3 = pnand %p3256_p1, %p3519_p8 }
  0x87   : > { %p3259_p13 = pneg %p3258_p3 }
  0x89   : > { %p3264_p2 = pnand %p3262_p0, %p3259_p13 }
  0x8b   : > { %3267 = shalt.err (!%p3264_p2)
}
  0x8c   : > { %s3268_s17 = scalar_lea.vmem %s331_s9, 16384  ;;  %p3276_p4 = scmp.lt.s32.totalorder %s331_s9, %s331_s9 }
  0x8d   : > { %p3269_p5 = scmp.ne.s32.totalorder %s331_s9, %s3268_s17  ;;  %p3277_p10 = scmp.lt.s32.totalorder %s3268_s17, %s3268_s17 }
  0x8f   : > { %p3271_p7 = pnand %p3269_p5, %p3519_p8  ;;  %p3278_p11 = por %p3277_p10, %p3276_p4 }
  0x91   : > { %p3272_p9 = pneg %p3271_p7 }
  0x93   : > { %p3279_p12 = pnand %p3278_p11, %p3272_p9 }
  0x95   : > { %3282 = shalt.err (!%p3279_p12)
}
  0x96   : > { %s3401_s20 = smov 1024   ;;  %s3402_s27 = smov 64  }
  0x97   : > { %2947 = dma.hbm_to_vmem [thread:$0]  (!%p3503_p6), %s4571_s6, 16384, %s331_s9, [#allocation12], %s3401_s20, %s3401_s20, %s3402_s27  }
  0x98   : > { %s2311_s23 = sadd.s32 4294967294, %s3391_s12   ;;  %s3657_s21 = sadd.s32 1, %s3391_s12  }
  0x99   : > { %s32_s1 = ssub.s32 %s3391_s12, %s3657_s21  ;;  %s35_s22 = sadd.s32 1, %s3387_s11 }
  0x9a   : > { %p33_p8 = scmp.eq.s32.totalorder %s32_s1, 0  ;;  %p42_p1 = scmp.ne.s32.totalorder %s3387_s11, %s3383_s10 }
  0x9b   : > { %p43_p3 = scmp.eq.s32.totalorder %s3391_s12, 0  ;;  %p48_p13 = scmp.ne.s32.totalorder %s3383_s10, %s3379_s30 }
  0x9c   : > { %s3668_s24 = scalar_select %p33_p8, %s3387_s11, %s35_s22  }
  0x9d   : > { %p3670_p0 = por %p43_p3, %p42_p1  ;;  %p4673_p2 = scmp.eq.s32.totalorder %s3487_s15, 0 }
  0x9e   : > { %p240_p5 = scmp.eq.s32.totalorder %s3487_s15, 1  ;;  %p246_p7 = scmp.eq.s32.totalorder %s2311_s23, 1 }
  0x9f   : > { %p3676_p6 = por %p4673_p2, %p48_p13  ;;  %p2962_p9 = scmp.lt.s32.totalorder %s3391_s12, 2 }
  0xa0   : > { %s350_s26 = sand.u32 1, %s3387_s11   ;;  %p3683_p4 = por %p240_p5, %p42_p1 }
  0xa1   : > { %p3687_p10 = por %p246_p7, %p48_p13  ;;  %s2320_s13 = sshll.u32 %s350_s26, 3 }
  0xa2   : > { %s4675_s28 = scalar_select %p3683_p4, 1, 0 }
  0xa3   : > { %s4676_s29 = scalar_select %p3687_p10, 1, 0 }
  0xa4   : > { %s2321_s18 = sshll.u32 %s3391_s12, 7  ;;  %s354_s25 = scalar_lea.vmem [#allocation2], %s2320_s13 }
  0xa5   : > { %s3695_s27 = scalar_lea.hbm %s4565_s0, %s2321_s18  ;;  %s361_s14 = sshll.u32 %s354_s25, 4  ;;  %s3697_s14 = int_to_ptr.vmem [resolvable:$true] %s361_s14 }
  0xa6   : > { %p3701_p11 = pnand %p2962_p9, %p3670_p0  ;;  %s351_s1 = scalar_lea.sflag [#allocation3], %s350_s26 }
  0xa7   : > { %s3283_s22 = scalar_lea.hbm %s3695_s27, 128  ;;  %s3288_s17 = scalar_lea.hbm %s4565_s0, 256 }
  0xa8   : > { %p3284_p12 = scmp.ne.s32.totalorder %s3695_s27, %s3283_s22  ;;  %p3285_p8 = pneg %p3701_p11 }
  0xa9   : > { %p3289_p13 = scmp.lt.u32.totalorder %s3695_s27, %s4565_s0  ;;  %p3290_p0 = scmp.lt.u32.totalorder %s3288_s17, %s3283_s22 }
  0xaa   : > { %p3286_p1 = pnand %p3285_p8, %p3284_p12  ;;  %p3292_p5 = scmp.lt.u32.totalorder %s3283_s22, %s3695_s27 }
  0xab   : > { %p3291_p2 = por %p3290_p0, %p3289_p13 }
  0xac   : > { %p3287_p3 = pneg %p3286_p1 }
  0xad   : > { %p3293_p7 = por %p3292_p5, %p3291_p2 }
  0xaf   : > { %p3294_p9 = pnand %p3293_p7, %p3287_p3 }
  0xb1   : > { %3297 = shalt.err (!%p3294_p9)
}
  0xb2   : > { %s3298_s26 = scalar_lea.vmem %s3697_s14, 128  ;;  %s3403_s25 = smov [#allocation2]  }
  0xb3   : > { %p3299_p12 = scmp.ne.s32.totalorder %s3697_s14, %s3298_s26  ;;  %s3303_s13 = sshll.u32 %s3403_s25, 4  ;;  %s3304_s13 = int_to_ptr.vmem [resolvable:$false] %s3303_s13 }
  0xb4   : > { %s3305_s18 = scalar_lea.vmem %s3304_s13, 256  ;;  %p3306_p4 = scmp.lt.s32.totalorder %s3697_s14, %s3304_s13 }
  0xb5   : > { %p3301_p1 = pnand %p3299_p12, %p3285_p8  ;;  %p3307_p13 = scmp.lt.s32.totalorder %s3305_s18, %s3298_s26 }
  0xb7   : > { %p3302_p10 = pneg %p3301_p1  ;;  %p3308_p0 = por %p3307_p13, %p3306_p4 }
  0xb9   : > { %p3309_p2 = pnand %p3308_p0, %p3302_p10 }
  0xbb   : > { %3312 = shalt.err (!%p3309_p2)
}
  0xbc   : > { %2951 = dma.hbm_to_vmem [thread:$0]  (!%p3701_p11), %s3695_s27, 128, %s3697_s14, %s351_s1  }
  0xbd   : > { %p4678_p3 = scmp.ne.s32.totalorder %s4668_s16, 0 }
  0xbf   : > { %370 = sbr.rel (%p4678_p3) target bundleno = 1537 (0x601), region = 56 }
  0xc6   : > { %s3733_s22 = sand.u32 1, %s3383_s10  }
  0xc7   : > { %s2323_s17 = sshll.u32 %s3733_s22, 3  ;;  %s373_s19 = scalar_lea.sflag [#allocation3], %s3733_s22 }
  0xc8   : > { %s3739_s20 = scalar_lea.vmem [#allocation2], %s2323_s17 }
  0xc9   : > { %3358 = dma.done.wait (%p3676_p6), %s373_s19, 128  }
  0xca   : > { %3360 = vsyncadd (%p3676_p6), %s373_s19, 4294967168  ;;  %p4679_p4 = scmp.eq.s32.totalorder %s3487_s15, 0 }
  0xcc   : > { %3362 = dma.done.wait (%p4679_p4), [#allocation6], 3072   ;;  %p4680_p10 = pmov %p4679_p4 }
  0xcd   : > { %p4681_p11 = pmov %p4679_p4 }
  0xce   : > { %3364 = vsyncadd (%p4680_p10), [#allocation6], 4294964224 }
  0xcf   : > { %3366 = dma.done.wait (%p4681_p11), [#allocation9], 6144   ;;  %p4682_p8 = pmov %p4679_p4 }
  0xd0   : > { %p4683_p5 = pmov %p4679_p4 }
  0xd1   : > { %3368 = vsyncadd (%p4682_p8), [#allocation9], 4294961152 }
  0xd2   : > { %3370 = dma.done.wait (%p4683_p5), [#allocation12], 18432   ;;  %p4684_p7 = pmov %p4679_p4 }
  0xd3   : > { %v4581_v0 = vmov 0.0|0.0   ;;  %vm3405_vm0 = vmmov 0   ;;  %v4583_v1 = vmov 0.0   ;;  %v4579_v2 = vmov 32   ;;  %v436_v4 = vld [vmem:[#allocation11] sm:$0xff]  ;;  %v437_v5 = vld [vmem:[#allocation11 + $0x8] sm:$0xff] }
  0xd4   : > { %3372 = vsyncadd (%p4684_p7), [#allocation12], 4294948864  ;;  %2549 = vmatprep.subr.bf16.mxu0 %v4581_v0  ;;  %2441 = vmatprep.mubr.msk.f32.mxu0 %vm3405_vm0, %v4583_v1  ;;  %v4580_v3 = vmov 0   ;;  %v438_v6 = vld [vmem:[#allocation11 + $0x10] sm:$0xff]  ;;  %v3763_v7 = vpack.c.bf16 %v437_v5, %v436_v4  ;;  %v439_v8 = vld [vmem:[#allocation11 + $0x18] sm:$0xff]  ;;  %s2338_s13 = sshll.u32 %s3487_s15, 7 }
  0xd5   : > { %714 = vmatprep.mubr.f32.mxu1 %v4583_v1  ;;  %3025 = vset.pattern.permute.xlu1 %v4579_v2  ;;  %v3766_v9 = vpack.c.bf16 %v439_v8, %v438_v6  ;;  %v440_v10 = vld [vmem:[#allocation11 + $0x20] sm:$0xff]  ;;  %v441_v11 = vld [vmem:[#allocation11 + $0x28] sm:$0xff]  ;;  %v442_v22 = vld [vmem:[#allocation11 + $0x30] sm:$0xff]  ;;  %s434_s18 = scalar_lea.vmem [#allocation14], %s2323_s17  ;;  %s4834_s9 = sld [smem:[#allocation90_spill]] }
  0xd6   : > { %3023 = vset.pattern.permute.xlu0 %v4580_v3  ;;  %2551 = vmatpush3.bf16.msra.mxu0 %v3763_v7  ;;  %v453_v12 = vld [vmem:[#allocation13 + $0x8] sm:$0xff]  ;;  %v452_v14 = vld [vmem:[#allocation13] sm:$0xff]  ;;  %v3770_v16 = vpack.c.bf16 %v441_v11, %v440_v10  ;;  %v443_v23 = vld [vmem:[#allocation11 + $0x38] sm:$0xff]  ;;  %s2184_s19 = sshll.u32 %s434_s18, 4  ;;  %s2171_s14 = scalar_lea.sflag [#allocation4], %s3733_s22  ;;  %s4523_s19 = int_to_ptr.vmem [resolvable:$true] %s2184_s19 }
  0xd7   : > { %2552 = vmatprep.subr.bf16.mxu0 %v4581_v0  ;;  %v461_v13 = vld [vmem:[#allocation13 + $0x48] sm:$0xff]  ;;  %v460_v15 = vld [vmem:[#allocation13 + $0x40] sm:$0xff]  ;;  %v3784_v29 = vpack.c.bf16 %v443_v23, %v442_v22  ;;  %v446_v39 = vld [vmem:[#allocation11 + $0x50] sm:$0xff]  ;;  %s3313_s23 = scalar_lea.vmem %s4523_s19, 128  ;;  %p4835_p9 = scmp.ne.s32.totalorder %s4675_s28, 0 }
  0xd8   : > { %v3772_v17 = vpack.c.bf16 %v461_v13, %v453_v12  ;;  %v3774_v18 = vpack.c.bf16 %v460_v15, %v452_v14  ;;  %v469_v19 = vld [vmem:[#allocation13 + $0x88] sm:$0xff]  ;;  %v468_v21 = vld [vmem:[#allocation13 + $0x80] sm:$0xff]  ;;  %v447_v43 = vld [vmem:[#allocation11 + $0x58] sm:$0xff]  ;;  %p3314_p6 = scmp.ne.s32.totalorder %s4523_s19, %s3313_s23  ;;  %s3415_s15 = smov [#allocation14]  }
  0xd9   : > { %v477_v20 = vld [vmem:[#allocation13 + $0xc8] sm:$0xff]  ;;  %v476_v25 = vld [vmem:[#allocation13 + $0xc0] sm:$0xff]  ;;  %v3804_v47 = vpack.c.bf16 %v447_v43, %v446_v39  ;;  %v450_v57 = vld [vmem:[#allocation11 + $0x70] sm:$0xff]  ;;  %s3317_s17 = sshll.u32 %s3415_s15, 4  ;;  %s3318_s17 = int_to_ptr.vmem [resolvable:$false] %s3317_s17 }
  0xda   : > { %2554 = vmatpush3.bf16.msra.mxu0 %v3766_v9  ;;  %4685 = vst [vmem:[#allocation20_spill] sm:$0xff] %v3774_v18  ;;  %v3777_v24 = vpack.c.bf16 %v477_v20, %v469_v19  ;;  %2574 = vmatprep.subr.bf16.mxu1 %v3772_v17  ;;  %v485_v26 = vld [vmem:[#allocation13 + $0x108] sm:$0xff]  ;;  %v3781_v27 = vpack.c.bf16 %v476_v25, %v468_v21  ;;  %v444_v30 = vld [vmem:[#allocation11 + $0x40] sm:$0xff]  ;;  %v451_v61 = vld [vmem:[#allocation11 + $0x78] sm:$0xff]  ;;  %p3315_p12 = pnand %p3314_p6, %p4835_p9  ;;  %s3319_s1 = scalar_lea.vmem %s3318_s17, 256 }
  0xdb   : > { %2555 = vmatprep.subr.bf16.mxu0 %v4581_v0  ;;  %2576 = vmatpush1.bf16.msra.mxu1 %v3774_v18  ;;  %v493_v28 = vld [vmem:[#allocation13 + $0x148] sm:$0xff]  ;;  %v484_v32 = vld [vmem:[#allocation13 + $0x100] sm:$0xff]  ;;  %v455_v4 = vld [vmem:[#allocation13 + $0x18] sm:$0xff]  ;;  %v3824_v8 = vpack.c.bf16 %v451_v61, %v450_v57  ;;  %s4521_s27 = scalar_lea.hbm %s4834_s9, %s2338_s13  ;;  %p3320_p13 = scmp.lt.s32.totalorder %s4523_s19, %s3318_s17 }
  0xdc   : > { %4686 = vst [vmem:[#allocation21_spill] sm:$0xff] %v3777_v24  ;;  %4687 = vst [vmem:[#allocation22_spill] sm:$0xff] %v3781_v27  ;;  %2578 = vmatprep.subr.bf16.mxu1 %v3777_v24  ;;  %v3787_v31 = vpack.c.bf16 %v493_v28, %v485_v26  ;;  %v492_v33 = vld [vmem:[#allocation13 + $0x140] sm:$0xff]  ;;  %v445_v34 = vld [vmem:[#allocation11 + $0x48] sm:$0xff]  ;;  %p3316_p1 = pneg %p3315_p12  ;;  %p3321_p0 = scmp.lt.s32.totalorder %s3319_s1, %s3313_s23 }
  0xdd   : > { %v501_v35 = vld [vmem:[#allocation13 + $0x188] sm:$0xff]  ;;  %v3791_v37 = vpack.c.bf16 %v492_v33, %v484_v32  ;;  %v3794_v38 = vpack.c.bf16 %v445_v34, %v444_v30  ;;  %v500_v41 = vld [vmem:[#allocation13 + $0x180] sm:$0xff]  ;;  %v463_v5 = vld [vmem:[#allocation13 + $0x58] sm:$0xff] }
  0xde   : > { %2557 = vmatpush3.bf16.msra.mxu0 %v3770_v16  ;;  %4688 = vst [vmem:[#allocation23_spill] sm:$0xff] %v3787_v31  ;;  %v509_v36 = vld [vmem:[#allocation13 + $0x1c8] sm:$0xff]  ;;  %v508_v42 = vld [vmem:[#allocation13 + $0x1c0] sm:$0xff]  ;;  %v454_v10 = vld [vmem:[#allocation13 + $0x10] sm:$0xff]  ;;  %v3830_v14 = vpack.c.bf16 %v463_v5, %v455_v4  ;;  %p3322_p2 = por %p3321_p0, %p3320_p13 }
  0xdf   : > { %2558 = vmatprep.subr.bf16.mxu0 %v4581_v0  ;;  %2580 = vmatpush1.bf16.msra.mxu1 %v3781_v27  ;;  %4689 = vst [vmem:[#allocation24_spill] sm:$0xff] %v3791_v37  ;;  %v3797_v40 = vpack.c.bf16 %v509_v36, %v501_v35  ;;  %v517_v44 = vld [vmem:[#allocation13 + $0x208] sm:$0xff]  ;;  %v3801_v46 = vpack.c.bf16 %v508_v42, %v500_v41  ;;  %v448_v48 = vld [vmem:[#allocation11 + $0x60] sm:$0xff]  ;;  %v462_v15 = vld [vmem:[#allocation13 + $0x50] sm:$0xff] }
  0xe0   : > { %2582 = vmatprep.subr.bf16.mxu1 %v3787_v31  ;;  %v525_v45 = vld [vmem:[#allocation13 + $0x248] sm:$0xff]  ;;  %v516_v50 = vld [vmem:[#allocation13 + $0x200] sm:$0xff]  ;;  %v471_v21 = vld [vmem:[#allocation13 + $0x98] sm:$0xff]  ;;  %v3839_v26 = vpack.c.bf16 %v462_v15, %v454_v10  ;;  %p3323_p3 = pnand %p3322_p2, %p3316_p1 }
  0xe1   : > { %4690 = vst [vmem:[#allocation25_spill] sm:$0xff] %v3797_v40  ;;  %4691 = vst [vmem:[#allocation26_spill] sm:$0xff] %v3801_v46  ;;  %v3807_v49 = vpack.c.bf16 %v525_v45, %v517_v44  ;;  %v524_v51 = vld [vmem:[#allocation13 + $0x240] sm:$0xff]  ;;  %v449_v52 = vld [vmem:[#allocation11 + $0x68] sm:$0xff] }
  0xe2   : > { %2560 = vmatpush3.bf16.msra.mxu0 %v3784_v29  ;;  %v533_v53 = vld [vmem:[#allocation13 + $0x288] sm:$0xff]  ;;  %v3811_v55 = vpack.c.bf16 %v524_v51, %v516_v50  ;;  %v3814_v56 = vpack.c.bf16 %v449_v52, %v448_v48  ;;  %v532_v59 = vld [vmem:[#allocation13 + $0x280] sm:$0xff]  ;;  %v479_v22 = vld [vmem:[#allocation13 + $0xd8] sm:$0xff]  ;;  %4698 = vst [vmem:[#allocation33_spill] sm:$0xff] %v3839_v26 }
  0xe3   : > { %2561 = vmatprep.subr.bf16.mxu0 %v4581_v0  ;;  %2584 = vmatpush1.bf16.msra.mxu1 %v3791_v37  ;;  %4692 = vst [vmem:[#allocation27_spill] sm:$0xff] %v3807_v49  ;;  %v541_v54 = vld [vmem:[#allocation13 + $0x2c8] sm:$0xff]  ;;  %v540_v60 = vld [vmem:[#allocation13 + $0x2c0] sm:$0xff]  ;;  %v3833_v23 = vld [vmem:[%s3739_s20] sm:$0xff]  ;;  %v3845_v34 = vpack.c.bf16 %v479_v22, %v471_v21 }
  0xe4   : > { %2586 = vmatprep.subr.bf16.mxu1 %v3797_v40  ;;  %4693 = vst [vmem:[#allocation28_spill] sm:$0xff] %v3811_v55  ;;  %v3817_v58 = vpack.c.bf16 %v541_v54, %v533_v53  ;;  %v549_v62 = vld [vmem:[#allocation13 + $0x308] sm:$0xff]  ;;  %v3821_v6 = vpack.c.bf16 %v540_v60, %v532_v59  ;;  %v548_v12 = vld [vmem:[#allocation13 + $0x300] sm:$0xff]  ;;  %v470_v28 = vld [vmem:[#allocation13 + $0x90] sm:$0xff] }
  0xe5   : > { %v557_v63 = vld [vmem:[#allocation13 + $0x348] sm:$0xff]  ;;  %v556_v13 = vld [vmem:[#allocation13 + $0x340] sm:$0xff]  ;;  %4700 = vst [vmem:[#allocation35_spill] sm:$0xff] %v3845_v34  ;;  %v478_v35 = vld [vmem:[#allocation13 + $0xd0] sm:$0xff] }
  0xe6   : > { %2563 = vmatpush3.bf16.msra.mxu0 %v3794_v38  ;;  %4694 = vst [vmem:[#allocation29_spill] sm:$0xff] %v3817_v58  ;;  %4695 = vst [vmem:[#allocation30_spill] sm:$0xff] %v3821_v6  ;;  %v3827_v11 = vpack.c.bf16 %v557_v63, %v549_v62  ;;  %v565_v19 = vld [vmem:[#allocation13 + $0x388] sm:$0xff]  ;;  %v3836_v25 = vpack.c.bf16 %v556_v13, %v548_v12  ;;  %v564_v32 = vld [vmem:[#allocation13 + $0x380] sm:$0xff]  ;;  %v3852_v44 = vpack.c.bf16 %v478_v35, %v470_v28 }
  0xe7   : > { %2564 = vmatprep.subr.bf16.mxu0 %v4581_v0  ;;  %2588 = vmatpush1.bf16.msra.mxu1 %v3801_v46  ;;  %v573_v20 = vld [vmem:[#allocation13 + $0x3c8] sm:$0xff]  ;;  %v572_v33 = vld [vmem:[#allocation13 + $0x3c0] sm:$0xff]  ;;  %v487_v41 = vld [vmem:[#allocation13 + $0x118] sm:$0xff] }
  0xe8   : > { %2590 = vmatprep.subr.bf16.mxu1 %v3807_v49  ;;  %4696 = vst [vmem:[#allocation31_spill] sm:$0xff] %v3827_v11  ;;  %4697 = vst [vmem:[#allocation32_spill] sm:$0xff] %v3836_v25  ;;  %v3842_v30 = vpack.c.bf16 %v573_v20, %v565_v19  ;;  %v457_v36 = vld [vmem:[#allocation13 + $0x28] sm:$0xff]  ;;  %v495_v42 = vld [vmem:[#allocation13 + $0x158] sm:$0xff]  ;;  %v3849_v43 = vpack.c.bf16 %v572_v33, %v564_v32 }
  0xe9   : > { %v465_v39 = vld [vmem:[#allocation13 + $0x68] sm:$0xff]  ;;  %4702 = vst [vmem:[#allocation37_spill] sm:$0xff] %v3852_v44  ;;  %v486_v45 = vld [vmem:[#allocation13 + $0x110] sm:$0xff]  ;;  %v456_v50 = vld [vmem:[#allocation13 + $0x20] sm:$0xff]  ;;  %v3858_v52 = vpack.c.bf16 %v495_v42, %v487_v41 }
  0xea   : > { %2566 = vmatpush3.bf16.msra.mxu0 %v3804_v47  ;;  %4699 = vst [vmem:[#allocation34_spill] sm:$0xff] %v3842_v30  ;;  %4701 = vst [vmem:[#allocation36_spill] sm:$0xff] %v3849_v43  ;;  %v3855_v48 = vpack.c.bf16 %v465_v39, %v457_v36  ;;  %v464_v51 = vld [vmem:[#allocation13 + $0x60] sm:$0xff]  ;;  %v494_v53 = vld [vmem:[#allocation13 + $0x150] sm:$0xff] }
  0xeb   : > { %2567 = vmatprep.subr.bf16.mxu0 %v4581_v0  ;;  %2592 = vmatpush1.bf16.msra.mxu1 %v3811_v55  ;;  %4704 = vst [vmem:[#allocation39_spill] sm:$0xff] %v3858_v52  ;;  %v473_v54 = vld [vmem:[#allocation13 + $0xa8] sm:$0xff]  ;;  %v503_v59 = vld [vmem:[#allocation13 + $0x198] sm:$0xff]  ;;  %v3862_v61 = vpack.c.bf16 %v464_v51, %v456_v50  ;;  %v3865_v62 = vpack.c.bf16 %v494_v53, %v486_v45  ;;  %v502_v63 = vld [vmem:[#allocation13 + $0x190] sm:$0xff] }
  0xec   : > { %2594 = vmatprep.subr.bf16.mxu1 %v3817_v58  ;;  %4703 = vst [vmem:[#allocation38_spill] sm:$0xff] %v3855_v48  ;;  %v481_v57 = vld [vmem:[#allocation13 + $0xe8] sm:$0xff]  ;;  %v511_v60 = vld [vmem:[#allocation13 + $0x1d8] sm:$0xff]  ;;  %v472_v5 = vld [vmem:[#allocation13 + $0xa0] sm:$0xff] }
  0xed   : > { %4705 = vst [vmem:[#allocation40_spill] sm:$0xff] %v3862_v61  ;;  %4706 = vst [vmem:[#allocation41_spill] sm:$0xff] %v3865_v62  ;;  %v3868_v4 = vpack.c.bf16 %v481_v57, %v473_v54  ;;  %v480_v10 = vld [vmem:[#allocation13 + $0xe0] sm:$0xff]  ;;  %v3871_v12 = vpack.c.bf16 %v511_v60, %v503_v59  ;;  %v510_v13 = vld [vmem:[#allocation13 + $0x1d0] sm:$0xff] }
  0xee   : > { %2569 = vmatpush3.bf16.msra.mxu0 %v3814_v56  ;;  %v489_v15 = vld [vmem:[#allocation13 + $0x128] sm:$0xff]  ;;  %v519_v20 = vld [vmem:[#allocation13 + $0x218] sm:$0xff]  ;;  %v3875_v22 = vpack.c.bf16 %v480_v10, %v472_v5  ;;  %v3879_v28 = vpack.c.bf16 %v510_v13, %v502_v63  ;;  %v518_v32 = vld [vmem:[#allocation13 + $0x210] sm:$0xff] }
  0xef   : > { %2570 = vmatprep.subr.bf16.mxu0 %v4581_v0  ;;  %2596 = vmatpush1.bf16.msra.mxu1 %v3821_v6  ;;  %4707 = vst [vmem:[#allocation42_spill] sm:$0xff] %v3868_v4  ;;  %4708 = vst [vmem:[#allocation43_spill] sm:$0xff] %v3871_v12  ;;  %v497_v19 = vld [vmem:[#allocation13 + $0x168] sm:$0xff]  ;;  %v527_v21 = vld [vmem:[#allocation13 + $0x258] sm:$0xff] }
  0xf0   : > { %2598 = vmatprep.subr.bf16.mxu1 %v3827_v11  ;;  %4709 = vst [vmem:[#allocation44_spill] sm:$0xff] %v3875_v22  ;;  %4710 = vst [vmem:[#allocation45_spill] sm:$0xff] %v3879_v28  ;;  %v3882_v33 = vpack.c.bf16 %v497_v19, %v489_v15  ;;  %v488_v35 = vld [vmem:[#allocation13 + $0x120] sm:$0xff]  ;;  %v3885_v39 = vpack.c.bf16 %v527_v21, %v519_v20  ;;  %v526_v41 = vld [vmem:[#allocation13 + $0x250] sm:$0xff] }
  0xf1   : > { %v496_v36 = vld [vmem:[#allocation13 + $0x160] sm:$0xff]  ;;  %v505_v42 = vld [vmem:[#allocation13 + $0x1a8] sm:$0xff]  ;;  %v535_v50 = vld [vmem:[#allocation13 + $0x298] sm:$0xff]  ;;  %v3891_v54 = vpack.c.bf16 %v526_v41, %v518_v32 }
  0xf2   : > { %2572 = vmatpush3.bf16.msra.mxu0 %v3824_v8  ;;  %4711 = vst [vmem:[#allocation46_spill] sm:$0xff] %v3882_v33  ;;  %4712 = vst [vmem:[#allocation47_spill] sm:$0xff] %v3885_v39  ;;  %v513_v45 = vld [vmem:[#allocation13 + $0x1e8] sm:$0xff]  ;;  %v543_v51 = vld [vmem:[#allocation13 + $0x2d8] sm:$0xff]  ;;  %v3888_v53 = vpack.c.bf16 %v496_v36, %v488_v35 }
  0xf3   : > { %2606 = vmatprep.subr.bf16.mxu0 %v3830_v14  ;;  %2600 = vmatpush1.bf16.msra.mxu1 %v3836_v25  ;;  %4714 = vst [vmem:[#allocation49_spill] sm:$0xff] %v3891_v54  ;;  %v534_v57 = vld [vmem:[#allocation13 + $0x290] sm:$0xff]  ;;  %v3894_v59 = vpack.c.bf16 %v513_v45, %v505_v42  ;;  %v504_v60 = vld [vmem:[#allocation13 + $0x1a0] sm:$0xff]  ;;  %v3897_v5 = vpack.c.bf16 %v543_v51, %v535_v50  ;;  %v521_v13 = vld [vmem:[#allocation13 + $0x228] sm:$0xff] }
  0xf4   : > { %2602 = vmatprep.subr.bf16.mxu1 %v3842_v30  ;;  %4713 = vst [vmem:[#allocation48_spill] sm:$0xff] %v3888_v53  ;;  %v512_v63 = vld [vmem:[#allocation13 + $0x1e0] sm:$0xff]  ;;  %v542_v10 = vld [vmem:[#allocation13 + $0x2d0] sm:$0xff]  ;;  %v529_v15 = vld [vmem:[#allocation13 + $0x268] sm:$0xff] }
  0xf5   : > { %2442 = vmatmul.mubr.f32.vlgmr.msra.gmra.mrb[0].mxu0 %v3833_v23  ;;  %4715 = vst [vmem:[#allocation50_spill] sm:$0xff] %v3894_v59  ;;  %4716 = vst [vmem:[#allocation51_spill] sm:$0xff] %v3897_v5  ;;  %v551_v19 = vld [vmem:[#allocation13 + $0x318] sm:$0xff]  ;;  %v3900_v21 = vpack.c.bf16 %v512_v63, %v504_v60  ;;  %v3903_v32 = vpack.c.bf16 %v542_v10, %v534_v57  ;;  %v550_v35 = vld [vmem:[#allocation13 + $0x310] sm:$0xff]  ;;  %v3906_v36 = vpack.c.bf16 %v529_v15, %v521_v13 }
  0xf6   : > { %2608 = vmatpush1.bf16.msra.mxu0 %v3839_v26  ;;  %785 = vmatprep.mubr.f32.mxu0 %v4583_v1  ;;  %v559_v20 = vld [vmem:[#allocation13 + $0x358] sm:$0xff]  ;;  %v520_v41 = vld [vmem:[#allocation13 + $0x220] sm:$0xff]  ;;  %v558_v50 = vld [vmem:[#allocation13 + $0x350] sm:$0xff] }
  0xf7   : > { %2610 = vmatprep.subr.bf16.mxu0 %v3845_v34  ;;  %2604 = vmatpush1.bf16.msra.mxu1 %v3849_v43  ;;  %4717 = vst [vmem:[#allocation52_spill] sm:$0xff] %v3900_v21  ;;  %4718 = vst [vmem:[#allocation53_spill] sm:$0xff] %v3903_v32  ;;  %v528_v42 = vld [vmem:[#allocation13 + $0x260] sm:$0xff]  ;;  %v3909_v45 = vpack.c.bf16 %v559_v20, %v551_v19  ;;  %v537_v51 = vld [vmem:[#allocation13 + $0x2a8] sm:$0xff]  ;;  %v3915_v10 = vpack.c.bf16 %v558_v50, %v550_v35 }
  0xf8   : > { %2638 = vmatprep.subr.bf16.mxu1 %v3855_v48  ;;  %4719 = vst [vmem:[#allocation54_spill] sm:$0xff] %v3906_v36  ;;  %v545_v2 = vld [vmem:[#allocation13 + $0x2e8] sm:$0xff]  ;;  %v567_v60 = vld [vmem:[#allocation13 + $0x398] sm:$0xff]  ;;  %v3912_v57 = vpack.c.bf16 %v528_v42, %v520_v41  ;;  %v566_v13 = vld [vmem:[#allocation13 + $0x390] sm:$0xff] }
  0xf9   : > { %4720 = vst [vmem:[#allocation55_spill] sm:$0xff] %v3909_v45  ;;  %v575_v63 = vld [vmem:[#allocation13 + $0x3d8] sm:$0xff]  ;;  %4722 = vst [vmem:[#allocation57_spill] sm:$0xff] %v3915_v10  ;;  %v3918_v15 = vpack.c.bf16 %v545_v2, %v537_v51  ;;  %v536_v19 = vld [vmem:[#allocation13 + $0x2a0] sm:$0xff] }
  0xfa   : > { %2612 = vmatpush1.bf16.msra.mxu0 %v3852_v44  ;;  %715 = vmatmul.mubr.f32.vlgmr.msra.gmra.mrb[0].mxu1 %v3833_v23  ;;  %4721 = vst [vmem:[#allocation56_spill] sm:$0xff] %v3912_v57  ;;  %v544_v20 = vld [vmem:[#allocation13 + $0x2e0] sm:$0xff]  ;;  %v3921_v3 = vpack.c.bf16 %v575_v63, %v567_v60  ;;  %v574_v0 = vld [vmem:[#allocation13 + $0x3d0] sm:$0xff]  ;;  %v459_v41 = vld [vmem:[#allocation13 + $0x38] sm:$0xff] }
  0xfb   : > { %2614 = vmatprep.subr.bf16.mxu0 %v3858_v52  ;;  %2640 = vmatpush1.bf16.msra.mxu1 %v3862_v61  ;;  %4723 = vst [vmem:[#allocation58_spill] sm:$0xff] %v3918_v15  ;;  %v467_v42 = vld [vmem:[#allocation13 + $0x78] sm:$0xff]  ;;  %v3924_v35 = vpack.c.bf16 %v544_v20, %v536_v19  ;;  %v3927_v50 = vpack.c.bf16 %v574_v0, %v566_v13  ;;  %v458_v2 = vld [vmem:[#allocation13 + $0x30] sm:$0xff]  ;;  %v552_v60 = vld [vmem:[#allocation13 + $0x320] sm:$0xff] }
  0xfc   : > { %856 = vmatprep.mubr.f32.mxu1 %v4583_v1  ;;  %2642 = vmatprep.subr.bf16.mxu1 %v3868_v4  ;;  %4724 = vst [vmem:[#allocation59_spill] sm:$0xff] %v3921_v3  ;;  %v553_v1 = vld [vmem:[#allocation13 + $0x328] sm:$0xff]  ;;  %v560_v63 = vld [vmem:[#allocation13 + $0x360] sm:$0xff]  ;;  %v475_v19 = vld [vmem:[#allocation13 + $0xb8] sm:$0xff] }
  0xfd   : > { %4725 = vst [vmem:[#allocation60_spill] sm:$0xff] %v3924_v35  ;;  %4726 = vst [vmem:[#allocation61_spill] sm:$0xff] %v3927_v50  ;;  %v483_v20 = vld [vmem:[#allocation13 + $0xf8] sm:$0xff]  ;;  %v3936_v0 = vpack.c.bf16 %v560_v63, %v552_v60  ;;  %v498_v60 = vld [vmem:[#allocation13 + $0x170] sm:$0xff]  ;;  %v4736_v63 = vmov 0.0  }
  0xfe   : > { %2616 = vmatpush1.bf16.msra.mxu0 %v3865_v62  ;;  %v4166_v58 = vld [vmem:[#allocation5 + $0x38] sm:$0xff] }
  0xff   : > { %2618 = vmatprep.subr.bf16.mxu0 %v3871_v12  ;;  %2644 = vmatpush1.bf16.msra.mxu1 %v3875_v22  ;;  %4729 = vst [vmem:[#allocation64_spill] sm:$0xff] %v3936_v0  ;;  %4756 = vst [vmem:[#allocation88_spill] sm:$0xff] %v4166_v58 }
 0x100   : > { %2646 = vmatprep.subr.bf16.mxu1 %v3882_v33 }
 0x102   : > { %2620 = vmatpush1.bf16.msra.mxu0 %v3879_v28 }
 0x103   : > { %2622 = vmatprep.subr.bf16.mxu0 %v3885_v39  ;;  %2648 = vmatpush1.bf16.msra.mxu1 %v3888_v53  ;;  %v962_v39 = vld [vmem:[#allocation5 + $0x8] sm:$0xff] }
 0x104   : > { %2650 = vmatprep.subr.bf16.mxu1 %v3894_v59 }
 0x106   : > { %2624 = vmatpush1.bf16.msra.mxu0 %v3891_v54  ;;  %v569_v54 = vld [vmem:[#allocation13 + $0x3a8] sm:$0xff] }
 0x107   : > { %2626 = vmatprep.subr.bf16.mxu0 %v3897_v5  ;;  %2652 = vmatpush1.bf16.msra.mxu1 %v3900_v21  ;;  %v561_v5 = vld [vmem:[#allocation13 + $0x368] sm:$0xff] }
 0x108   : > { %2654 = vmatprep.subr.bf16.mxu1 %v3906_v36  ;;  %v3930_v51 = vpack.c.bf16 %v561_v5, %v553_v1  ;;  %v568_v5 = vld [vmem:[#allocation13 + $0x3a0] sm:$0xff] }
 0x10a   : > { %2628 = vmatpush1.bf16.msra.mxu0 %v3903_v32  ;;  %4727 = vst [vmem:[#allocation62_spill] sm:$0xff] %v3930_v51  ;;  %v466_v32 = vld [vmem:[#allocation13 + $0x70] sm:$0xff] }
 0x10b   : > { %2630 = vmatprep.subr.bf16.mxu0 %v3909_v45  ;;  %2656 = vmatpush1.bf16.msra.mxu1 %v3912_v57  ;;  %v3933_v45 = vpack.c.bf16 %v467_v42, %v459_v41  ;;  %v577_v57 = vld [vmem:[#allocation13 + $0x3e8] sm:$0xff]  ;;  %v3939_v13 = vpack.c.bf16 %v466_v32, %v458_v2  ;;  %v576_v41 = vld [vmem:[#allocation13 + $0x3e0] sm:$0xff]  ;;  %v3945_v42 = vpack.c.bf16 %v483_v20, %v475_v19  ;;  %v490_v2 = vld [vmem:[#allocation13 + $0x130] sm:$0xff] }
 0x10c   : > { %2658 = vmatprep.subr.bf16.mxu1 %v3918_v15  ;;  %v3942_v1 = vpack.c.bf16 %v577_v57, %v569_v54  ;;  %v491_v15 = vld [vmem:[#allocation13 + $0x138] sm:$0xff]  ;;  %v3949_v32 = vpack.c.bf16 %v576_v41, %v568_v5  ;;  %v3961_v5 = vpack.c.bf16 %v498_v60, %v490_v2  ;;  %v522_v60 = vld [vmem:[#allocation13 + $0x230] sm:$0xff] }
 0x10d   : > { %4728 = vst [vmem:[#allocation63_spill] sm:$0xff] %v3933_v45  ;;  %4730 = vst [vmem:[#allocation65_spill] sm:$0xff] %v3939_v13  ;;  %v507_v19 = vld [vmem:[#allocation13 + $0x1b8] sm:$0xff] }
 0x10e   : > { %2632 = vmatpush1.bf16.msra.mxu0 %v3915_v10  ;;  %4731 = vst [vmem:[#allocation66_spill] sm:$0xff] %v3942_v1  ;;  %4732 = vst [vmem:[#allocation67_spill] sm:$0xff] %v3945_v42  ;;  %v482_v10 = vld [vmem:[#allocation13 + $0xf0] sm:$0xff]  ;;  %v515_v20 = vld [vmem:[#allocation13 + $0x1f8] sm:$0xff] }
 0x10f   : > { %2634 = vmatprep.subr.bf16.mxu0 %v3921_v3  ;;  %2660 = vmatpush1.bf16.msra.mxu1 %v3924_v35  ;;  %v474_v3 = vld [vmem:[#allocation13 + $0xb0] sm:$0xff]  ;;  %v499_v35 = vld [vmem:[#allocation13 + $0x178] sm:$0xff]  ;;  %4733 = vst [vmem:[#allocation68_spill] sm:$0xff] %v3949_v32  ;;  %4737 = vst [vmem:[#allocation71_spill] sm:$0xff] %v3961_v5 }
 0x110   : > { %2662 = vmatprep.subr.bf16.mxu1 %v3930_v51  ;;  %v3952_v54 = vpack.c.bf16 %v482_v10, %v474_v3  ;;  %v3956_v57 = vpack.c.bf16 %v499_v35, %v491_v15  ;;  %v4738_v3 = vmov 0.0|0.0   ;;  %v3965_v10 = vpack.c.bf16 %v515_v20, %v507_v19  ;;  %v506_v15 = vld [vmem:[#allocation13 + $0x1b0] sm:$0xff]  ;;  %v523_v41 = vld [vmem:[#allocation13 + $0x238] sm:$0xff] }
 0x111   : > { %v514_v35 = vld [vmem:[#allocation13 + $0x1f0] sm:$0xff]  ;;  %v539_v20 = vld [vmem:[#allocation13 + $0x2b8] sm:$0xff] }
 0x112   : > { %2636 = vmatpush1.bf16.msra.mxu0 %v3927_v50  ;;  %4734 = vst [vmem:[#allocation69_spill] sm:$0xff] %v3952_v54  ;;  %4735 = vst [vmem:[#allocation70_spill] sm:$0xff] %v3956_v57  ;;  %v530_v19 = vld [vmem:[#allocation13 + $0x270] sm:$0xff]  ;;  %v1004_v51 = vld [vmem:[#allocation5 + $0x18] sm:$0xff] }
 0x113   : > { %2670 = vmatprep.subr.bf16.mxu0 %v3933_v45  ;;  %2664 = vmatpush1.bf16.msra.mxu1 %v3936_v0  ;;  %4739 = vst [vmem:[#allocation72_spill] sm:$0xff] %v3965_v10 }
 0x114   : > { %2666 = vmatprep.subr.bf16.mxu1 %v3942_v1 }
 0x115   : > { %786 = vmatmul.mubr.f32.vlgmr.msra.gmra.mrb[2].mxu0 %v3833_v23 }
 0x116   : > { %2672 = vmatpush1.bf16.msra.mxu0 %v3939_v13  ;;  %927 = vmatprep.mubr.f32.mxu0 %v4736_v63  ;;  %v3977_v13 = vpack.c.bf16 %v530_v19, %v522_v60  ;;  %v571_v60 = vld [vmem:[#allocation13 + $0x3b8] sm:$0xff] }
 0x117   : > { %2674 = vmatprep.subr.bf16.mxu0 %v3945_v42  ;;  %2668 = vmatpush1.bf16.msra.mxu1 %v3949_v32  ;;  %v531_v42 = vld [vmem:[#allocation13 + $0x278] sm:$0xff]  ;;  %v538_v32 = vld [vmem:[#allocation13 + $0x2b0] sm:$0xff] }
 0x118   : > { %2701 = vmatprep.subr.bf16.mxu1 %v4738_v3  ;;  %v3974_v2 = vpack.c.bf16 %v531_v42, %v523_v41  ;;  %4742 = vst [vmem:[#allocation75_spill] sm:$0xff] %v3977_v13  ;;  %v579_v19 = vld [vmem:[#allocation13 + $0x3f8] sm:$0xff] }
 0x11a   : > { %2676 = vmatpush1.bf16.msra.mxu0 %v3952_v54  ;;  %857 = vmatmul.mubr.f32.vlgmr.msra.gmra.mrb[2].mxu1 %v3833_v23  ;;  %v3971_v54 = vpack.c.bf16 %v514_v35, %v506_v15  ;;  %4741 = vst [vmem:[#allocation74_spill] sm:$0xff] %v3974_v2  ;;  %v555_v15 = vld [vmem:[#allocation13 + $0x338] sm:$0xff] }
 0x11b   : > { %2678 = vmatprep.subr.bf16.mxu0 %v3956_v57  ;;  %2476 = vmatprep.mubr.msk.f32.mxu1 %vm3405_vm0, %v4736_v63  ;;  %v547_v57 = vld [vmem:[#allocation13 + $0x2f8] sm:$0xff] }
 0x11c   : > { %4740 = vst [vmem:[#allocation73_spill] sm:$0xff] %v3971_v54  ;;  %v3980_v45 = vpack.c.bf16 %v547_v57, %v539_v20  ;;  %v563_v35 = vld [vmem:[#allocation13 + $0x378] sm:$0xff]  ;;  %v3992_v20 = vpack.c.bf16 %v579_v19, %v571_v60  ;;  %v1278_v19 = vld [vmem:[#allocation10 + $0x10] sm:$0xff] }
 0x11d   : > { %v3986_v41 = vpack.c.bf16 %v563_v35, %v555_v15 }
 0x11e   : > { %2680 = vmatpush1.bf16.msra.mxu0 %v3961_v5  ;;  %4743 = vst [vmem:[#allocation76_spill] sm:$0xff] %v3980_v45  ;;  %v546_v5 = vld [vmem:[#allocation13 + $0x2f0] sm:$0xff]  ;;  %4747 = vst [vmem:[#allocation80_spill] sm:$0xff] %v3992_v20 }
 0x11f   : > { %2682 = vmatprep.subr.bf16.mxu0 %v3965_v10  ;;  %v3983_v42 = vpack.c.bf16 %v546_v5, %v538_v32  ;;  %4745 = vst [vmem:[#allocation78_spill] sm:$0xff] %v3986_v41  ;;  %v554_v10 = vld [vmem:[#allocation13 + $0x330] sm:$0xff] }
 0x121   : > { %4744 = vst [vmem:[#allocation77_spill] sm:$0xff] %v3983_v42 }
 0x122   : > { %2684 = vmatpush1.bf16.msra.mxu0 %v3971_v54  ;;  %v562_v54 = vld [vmem:[#allocation13 + $0x370] sm:$0xff] }
 0x123   : > { %2686 = vmatprep.subr.bf16.mxu0 %v3974_v2  ;;  %v3989_v57 = vpack.c.bf16 %v562_v54, %v554_v10  ;;  %v570_v2 = vld [vmem:[#allocation13 + $0x3b0] sm:$0xff]  ;;  %v1276_v10 = vld [vmem:[#allocation10] sm:$0xff] }
 0x125   : > { %4746 = vst [vmem:[#allocation79_spill] sm:$0xff] %v3989_v57 }
 0x126   : > { %2688 = vmatpush1.bf16.msra.mxu0 %v3977_v13  ;;  %v578_v13 = vld [vmem:[#allocation13 + $0x3f0] sm:$0xff] }
 0x127   : > { %2690 = vmatprep.subr.bf16.mxu0 %v3980_v45  ;;  %v3995_v32 = vpack.c.bf16 %v578_v13, %v570_v2  ;;  %v4605_v13 = vmov 112   ;;  %v1277_v2 = vld [vmem:[#allocation10 + $0x8] sm:$0xff] }
 0x128   : > { %v2702_v15 = vpack.c.bf16 %v1277_v2, %v1276_v10  ;;  %v1282_v10 = vld [vmem:[#allocation10 + $0x30] sm:$0xff]  ;;  %v1283_v2 = vld [vmem:[#allocation10 + $0x38] sm:$0xff] }
 0x129   : > { %4748 = vst [vmem:[#allocation81_spill] sm:$0xff] %v3995_v32 }
 0x12a   : > { %2692 = vmatpush1.bf16.msra.mxu0 %v3983_v42  ;;  %2703 = vmatpush3.bf16.msra.mxu1 %v2702_v15  ;;  %v1284_v15 = vld [vmem:[#allocation10 + $0x40] sm:$0xff] }
 0x12b   : > { %2694 = vmatprep.subr.bf16.mxu0 %v3986_v41  ;;  %2704 = vmatprep.subr.bf16.mxu1 %v4738_v3 }
 0x12e   : > { %2696 = vmatpush1.bf16.msra.mxu0 %v3989_v57 }
 0x12f   : > { %2698 = vmatprep.subr.bf16.mxu0 %v3992_v20 }
 0x132   : > { %2700 = vmatpush1.bf16.msra.mxu0 %v3995_v32 }
 0x133   : > { %2725 = vmatprep.subr.bf16.mxu0 %v4738_v3 }
 0x135   : > { %928 = vmatmul.mubr.f32.vlgmr.msra.gmra.mrb[4].mxu0 %v3833_v23  ;;  %v4749_v23 = vmov 0  }
 0x136   : > { %2727 = vmatpush3.bf16.msra.mxu0 %v3763_v7  ;;  %2511 = vmatprep.mubr.msk.f32.mxu0 %vm3405_vm0, %v4736_v63 }
 0x137   : > { %2728 = vmatprep.subr.bf16.mxu0 %v4738_v3 }
 0x13a   : > { %2730 = vmatpush3.bf16.msra.mxu0 %v3766_v9 }
 0x13b   : > { %2731 = vmatprep.subr.bf16.mxu0 %v4738_v3 }
 0x13e   : > { %2733 = vmatpush3.bf16.msra.mxu0 %v3770_v16  ;;  %v4610_v16 = vmov 48  }
 0x13f   : > { %2734 = vmatprep.subr.bf16.mxu0 %v4738_v3 }
 0x142   : > { %2736 = vmatpush3.bf16.msra.mxu0 %v3784_v29  ;;  %v3410_v29 = vmov 16  }
 0x143   : > { %2737 = vmatprep.subr.bf16.mxu0 %v4738_v3 }
 0x146   : > { %2739 = vmatpush3.bf16.msra.mxu0 %v3794_v38  ;;  %v4609_v38 = vmov 64  }
 0x147   : > { %2740 = vmatprep.subr.bf16.mxu0 %v4738_v3 }
 0x14a   : > { %2742 = vmatpush3.bf16.msra.mxu0 %v3804_v47  ;;  %v4607_v47 = vmov 80  }
 0x14b   : > { %2743 = vmatprep.subr.bf16.mxu0 %v4738_v3 }
 0x14e   : > { %2745 = vmatpush3.bf16.msra.mxu0 %v3814_v56 }
 0x14f   : > { %2746 = vmatprep.subr.bf16.mxu0 %v4738_v3 }
 0x152   : > { %2748 = vmatpush3.bf16.msra.mxu0 %v3824_v8  ;;  %v4608_v8 = vmov 96  }
 0x153   : > { %2782 = vmatprep.subr.bf16.mxu0 %v3830_v14 }
 0x1c8   : > { %v4019_v7 = vpop.f32.mrb[0].mxu0 }
 0x1c9   : > { %976 = vperm.xlu1 %3025, %v4019_v7   ;;  %936 = vperm.xlu0 %3023, %v4019_v7   ;;  %v2443_v9 = vpop.f32.mrb[1].mxu0 }
 0x1ca   : > { %v1279_v9 = vld [vmem:[#allocation10 + $0x18] sm:$0xff] }
 0x1cd   : > { %3026 = vset.pattern.permute.xlu1 %v4610_v16  ;;  %3024 = vset.pattern.permute.xlu0 %v3410_v29  ;;  %v4030_v56 = vpop.f32.mrb[0].mxu1 }
 0x1ce   : > { %997 = vperm.xlu1 %3026, %v4019_v7   ;;  %955 = vperm.xlu0 %3024, %v4019_v7   ;;  %v4033_v14 = vpop.f32.mrb[1].mxu1 }
 0x1d2   : > { %3027 = vset.pattern.permute.xlu1 %v4609_v38  ;;  %3028 = vset.pattern.permute.xlu0 %v4607_v47  ;;  %v1285_v38 = vld [vmem:[#allocation10 + $0x48] sm:$0xff] }
 0x1d3   : > { %1018 = vperm.xlu1 %3027, %v4019_v7   ;;  %1039 = vperm.xlu0 %3028, %v4019_v7   ;;  %v2714_v16 = vpack.c.bf16 %v1285_v38, %v1284_v15 }
 0x1d7   : > { %3029 = vset.pattern.permute.xlu1 %v4608_v8  ;;  %3031 = vset.pattern.permute.xlu0 %v4749_v23  ;;  %v2705_v23 = vpack.c.bf16 %v1279_v9, %v1278_v19  ;;  %v2711_v8 = vpack.c.bf16 %v1283_v2, %v1282_v10  ;;  %v1286_v19 = vld [vmem:[#allocation10 + $0x50] sm:$0xff]  ;;  %v1287_v9 = vld [vmem:[#allocation10 + $0x58] sm:$0xff] }
 0x1d8   : > { %1060 = vperm.xlu1 %3029, %v4019_v7   ;;  %v1291_v2 = vld [vmem:[#allocation10 + $0x78] sm:$0xff] }
 0x1d9   : > { %2706 = vmatpush3.bf16.msra.mxu1 %v2705_v23  ;;  %v2717_v23 = vpack.c.bf16 %v1287_v9, %v1286_v19 }
 0x1da   : > { %2707 = vmatprep.subr.bf16.mxu1 %v4738_v3 }
 0x1dc   : > { %3030 = vset.pattern.permute.xlu1 %v4605_v13  ;;  %v1281_v13 = vld [vmem:[#allocation10 + $0x28] sm:$0xff] }
 0x1dd   : > { %1081 = vperm.xlu1 %3030, %v4019_v7  }
 0x1e1   : > { %3032 = vset.pattern.permute.xlu1 %v3410_v29  ;;  %v1280_v29 = vld [vmem:[#allocation10 + $0x20] sm:$0xff] }
 0x1e2   : > { %v2708_v47 = vpack.c.bf16 %v1281_v13, %v1280_v29  ;;  %v1289_v13 = vld [vmem:[#allocation10 + $0x68] sm:$0xff] }
 0x1e4   : > { %2709 = vmatpush3.bf16.msra.mxu1 %v2708_v47  ;;  %v1288_v47 = vld [vmem:[#allocation10 + $0x60] sm:$0xff] }
 0x1e5   : > { %2710 = vmatprep.subr.bf16.mxu1 %v4738_v3  ;;  %v2720_v10 = vpack.c.bf16 %v1289_v13, %v1288_v47  ;;  %v983_v13 = vld [vmem:[#allocation5 + $0x10] sm:$0xff] }
 0x1e8   : > { %v4039_v54 = vpop.f32.mrb[2].mxu0  ;;  %2712 = vmatpush3.bf16.msra.mxu1 %v2711_v8  ;;  %v1290_v8 = vld [vmem:[#allocation10 + $0x70] sm:$0xff] }
 0x1e9   : > { %v4041_v5 = vpop.f32.mrb[3].mxu0  ;;  %2713 = vmatprep.subr.bf16.mxu1 %v4738_v3  ;;  %v2723_v38 = vpack.c.bf16 %v1291_v2, %v1290_v8 }
 0x1ec   : > { %2715 = vmatpush3.bf16.msra.mxu1 %v2714_v16  ;;  %v1101_v16 = vlaneseq }
 0x1ed   : > { %v4043_v35 = vpop.f32.mrb[2].mxu1  ;;  %2716 = vmatprep.subr.bf16.mxu1 %v4738_v3 }
 0x1ee   : > { %v4045_v60 = vpop.f32.mrb[3].mxu1  ;;  %v1102_v15 = vshrl.u32 %v1101_v16, 7 }
 0x1f0   : > { %2718 = vmatpush3.bf16.msra.mxu1 %v2717_v23  ;;  %v4059_v19 = vsub.s32 0, %v1102_v15  ;;  %v4063_v23 = vsub.s32 1, %v1102_v15  ;;  %v4065_v47 = vsub.s32 2, %v1102_v15  ;;  %v4078_v42 = vsub.s32 4, %v1102_v15 }
 0x1f1   : > { %2719 = vmatprep.subr.bf16.mxu1 %v4738_v3  ;;  %v4105_v62 = vsub.s32 7, %v1102_v15 }
 0x1f2   : > { %v1104_v9 = vrot.slane %v4019_v7, %v4059_v19  ;;  %v1125_v57 = vrot.slane %v4019_v7, %v4063_v23  ;;  %v1147_v41 = vrot.slane %v4019_v7, %v4065_v47  ;;  %4750 = vst [vmem:[#allocation82_spill] sm:$0xff] %v4078_v42  ;;  %v1191_v28 = vrot.slane %v4019_v7, %v4078_v42 }
 0x1f3   : > { %4753 = vst [vmem:[#allocation85_spill] sm:$0xff] %v4105_v62  ;;  %v1257_v44 = vrot.slane %v4019_v7, %v4105_v62 }
 0x1f4   : > { %2721 = vmatpush3.bf16.msra.mxu1 %v2720_v10  ;;  %v941_v10 = vld [vmem:[#allocation5] sm:$0xff]  ;;  %v4068_v2 = vsub.f32 %v4019_v7, %v1104_v9  ;;  %v4084_v9 = vsub.s32 5, %v1102_v15  ;;  %v4123_v52 = vsub.f32 %v4019_v7, %v1191_v28 }
 0x1f5   : > { %2722 = vmatprep.subr.bf16.mxu1 %v4738_v3 }
 0x1f6   : > { %4751 = vst [vmem:[#allocation83_spill] sm:$0xff] %v4084_v9  ;;  %v1107_v50 = vand.u32 2147483647, %v4068_v2  ;;  %v1213_v53 = vrot.slane %v4019_v7, %v4084_v9 }
 0x1f8   : > { %2724 = vmatpush3.bf16.msra.mxu1 %v2723_v38  ;;  %v4070_v38 = vsub.s32 3, %v1102_v15  ;;  %v4130_v61 = vsub.f32 %v4019_v7, %v1213_v53 }
 0x1f9   : > { %2750 = vmatprep.subr.bf16.mxu1 %v3772_v17 }
 0x208   : > { %v4052_v32 = vpop.f32.mrb[4].mxu0 }
 0x209   : > { %v4054_v29 = vpop.f32.mrb[5].mxu0 }
 0x248   : > { %v977_v20 = vpop.permute.xlu1 %976  ;;  %v937_v8 = vpop.permute.xlu0 %936 }
 0x249   : > { %v979_v17 = vsub.f32 %v4019_v7, %v977_v20  ;;  %v939_v16 = vsub.f32 %v4019_v7, %v937_v8  ;;  %v1169_v20 = vrot.slane %v4019_v7, %v4070_v38  ;;  %v4089_v8 = vsub.s32 6, %v1102_v15 }
 0x24b   : > { %v4080_v45 = vmul.f32 %v983_v13, %v979_v17  ;;  %v4082_v3 = vmul.f32 %v941_v10, %v939_v16  ;;  %4752 = vst [vmem:[#allocation84_spill] sm:$0xff] %v4089_v8  ;;  %v4094_v10 = vsub.f32 %v4019_v7, %v1125_v57  ;;  %v4097_v17 = vsub.f32 %v4019_v7, %v1147_v41 }
 0x24c   : > { %v4112_v41 = vsub.f32 %v4019_v7, %v1169_v20 }
 0x24d   : > { %v985_v1 = vand.u32 2147483647, %v4080_v45  ;;  %v943_v0 = vand.u32 2147483647, %v4082_v3  ;;  %v998_v36 = vpop.permute.xlu1 %997  ;;  %v956_v13 = vpop.permute.xlu0 %955 }
 0x24e   : > { %v1000_v16 = vsub.f32 %v4019_v7, %v998_v36  ;;  %v958_v21 = vsub.f32 %v4019_v7, %v956_v13  ;;  %v1235_v36 = vrot.slane %v4019_v7, %v4089_v8  ;;  %v4116_v13 = vadd.f32 1.0, %v1107_v50 }
 0x24f   : > { %v986_v59 = vadd.f32 1.0, %v985_v1  ;;  %v944_v12 = vadd.f32 1.0, %v943_v0  ;;  %v1129_v0 = vand.u32 2147483647, %v4094_v10  ;;  %v1151_v1 = vand.u32 2147483647, %v4097_v17 }
 0x250   : > { %v4107_v33 = vmul.f32 %v1004_v51, %v1000_v16  ;;  %v4109_v57 = vmul.f32 %v962_v39, %v958_v21  ;;  %v1025_v39 = vld [vmem:[#allocation5 + $0x20] sm:$0xff]  ;;  %v1046_v16 = vld [vmem:[#allocation5 + $0x28] sm:$0xff]  ;;  %v4133_v26 = vsub.f32 %v4019_v7, %v1235_v36 }
 0x251   : > { %3040 = vrcp.f32 %v986_v59  ;;  %v4140_v28 = vadd.f32 1.0, %v1129_v0  ;;  %v4152_v0 = vsub.f32 %v4019_v7, %v1257_v44 }
 0x252   : > { %3042 = vrcp.f32 %v944_v12  ;;  %v1006_v15 = vand.u32 2147483647, %v4107_v33  ;;  %v964_v51 = vand.u32 2147483647, %v4109_v57  ;;  %v1019_v21 = vpop.permute.xlu1 %1018  ;;  %v1040_v20 = vpop.permute.xlu0 %1039  ;;  %v1239_v11 = vand.u32 2147483647, %v4133_v26 }
 0x253   : > { %v1021_v22 = vsub.f32 %v4019_v7, %v1019_v21  ;;  %v1042_v50 = vsub.f32 %v4019_v7, %v1040_v20  ;;  %3044 = vrcp.f32 %v4116_v13  ;;  %v4142_v21 = vadd.f32 1.0, %v1151_v1  ;;  %4755 = vst [vmem:[#allocation87_spill] sm:$0xff] %v4152_v0 }
 0x254   : > { %v1007_v4 = vadd.f32 1.0, %v1006_v15  ;;  %v965_v34 = vadd.f32 1.0, %v964_v51  ;;  %v1173_v15 = vand.u32 2147483647, %v4112_v41  ;;  %v1195_v51 = vand.u32 2147483647, %v4123_v52 }
 0x255   : > { %v4135_v48 = vmul.f32 %v1025_v39, %v1021_v22  ;;  %v4137_v43 = vmul.f32 %v1046_v16, %v1042_v50  ;;  %v4148_v22 = vld [vmem:[#allocation5 + $0x30] sm:$0xff]  ;;  %v1217_v50 = vand.u32 2147483647, %v4130_v61 }
 0x256   : > { %3046 = vrcp.f32 %v1007_v4  ;;  %4754 = vst [vmem:[#allocation86_spill] sm:$0xff] %v4148_v22  ;;  %v4160_v25 = vadd.f32 1.0, %v1173_v15 }
 0x257   : > { %3048 = vrcp.f32 %v965_v34  ;;  %v1027_v53 = vand.u32 2147483647, %v4135_v48  ;;  %v1048_v36 = vand.u32 2147483647, %v4137_v43  ;;  %v1061_v39 = vpop.permute.xlu1 %1060  ;;  %v4170_v49 = vadd.f32 1.0, %v1217_v50 }
 0x258   : > { %v1063_v16 = vsub.f32 %v4019_v7, %v1061_v39  ;;  %3050 = vrcp.f32 %v4140_v28  ;;  %v4163_v39 = vadd.f32 1.0, %v1195_v51  ;;  %v4173_v51 = vadd.f32 1.0, %v1239_v11 }
 0x259   : > { %v1028_v20 = vadd.f32 1.0, %v1027_v53  ;;  %v1049_v1 = vadd.f32 1.0, %v1048_v36  ;;  %3052 = vrcp.f32 %v4142_v21 }
 0x25a   : > { %v4157_v30 = vmul.f32 %v4148_v22, %v1063_v16  ;;  %v1261_v16 = vand.u32 2147483647, %v4152_v0 }
 0x25b   : > { %v3041_v6 = vpop.eup %3040  ;;  %3054 = vrcp.f32 %v1028_v20 }
 0x25c   : > { %v3043_v44 = vpop.eup %3042  ;;  %v988_v53 = vmul.f32 %v3041_v6, %v986_v59  ;;  %3056 = vrcp.f32 %v1049_v1  ;;  %v1069_v36 = vand.u32 2147483647, %v4157_v30  ;;  %v1082_v55 = vpop.permute.xlu1 %1081 }
 0x25d   : > { %v946_v22 = vmul.f32 %v3043_v44, %v944_v12  ;;  %v1084_v15 = vsub.f32 %v4019_v7, %v1082_v55  ;;  %3058 = vrcp.f32 %v4160_v25  ;;  %v4175_v59 = vpop.eup %3044  ;;  %v4181_v55 = vadd.f32 1.0, %v1261_v16 }
 0x25e   : > { %v989_v46 = vsub.f32 2.0, %v988_v53  ;;  %v1070_v40 = vadd.f32 1.0, %v1069_v36  ;;  %3060 = vrcp.f32 %v4163_v39  ;;  %v1110_v16 = vmul.f32 %v4175_v59, %v4116_v13 }
 0x25f   : > { %v947_v37 = vsub.f32 2.0, %v946_v22  ;;  %v4178_v31 = vmul.f32 %v4166_v58, %v1084_v15 }
 0x260   : > { %v3047_v27 = vpop.eup %3046  ;;  %v990_v12 = vmul.f32 %v3041_v6, %v989_v46  ;;  %3062 = vrcp.f32 %v1070_v40  ;;  %v981_v46 = vld [vmem:[#allocation7 + $0x10] sm:$0xff]  ;;  %v1111_v9 = vsub.f32 2.0, %v1110_v16 }
 0x261   : > { %v3049_v7 = vpop.eup %3048  ;;  %v948_v50 = vmul.f32 %v3043_v44, %v947_v37  ;;  %v1009_v53 = vmul.f32 %v3047_v27, %v1007_v4  ;;  %v1090_v36 = vand.u32 2147483647, %v4178_v31  ;;  %3064 = vrcp.f32 %v4170_v49  ;;  %v940_v44 = vld [vmem:[#allocation7] sm:$0xff] }
 0x262   : > { %v991_v11 = vmul.f32 %v990_v12, %v4080_v45  ;;  %v967_v22 = vmul.f32 %v3049_v7, %v965_v34  ;;  %3066 = vrcp.f32 %v4173_v51  ;;  %v3051_v15 = vpop.eup %3050 }
 0x263   : > { %v949_v58 = vmul.f32 %v948_v50, %v4082_v3  ;;  %v1010_v24 = vsub.f32 2.0, %v1009_v53  ;;  %v1091_v6 = vadd.f32 1.0, %v1090_v36  ;;  %v4190_v37 = vpop.eup %3052  ;;  %3068 = vrcp.f32 %v4181_v55 }
 0x264   : > { %v968_v4 = vsub.f32 2.0, %v967_v22  ;;  %v992_v63 = vmul.f32 0.25, %v991_v11  ;;  %v1132_v53 = vmul.f32 %v3051_v15, %v4140_v28  ;;  %v960_v28 = vld [vmem:[#allocation7 + $0x8] sm:$0xff] }
 0x265   : > { %v3055_v45 = vpop.eup %3054  ;;  %v1011_v34 = vmul.f32 %v3047_v27, %v1010_v24  ;;  %v950_v12 = vmul.f32 0.25, %v949_v58  ;;  %3070 = vrcp.f32 %v1091_v6  ;;  %v1002_v24 = vld [vmem:[#allocation7 + $0x18] sm:$0xff]  ;;  %v1154_v27 = vmul.f32 %v4190_v37, %v4142_v21 }
 0x266   : > { %v3057_v18 = vpop.eup %3056  ;;  %v969_v62 = vmul.f32 %v3049_v7, %v968_v4  ;;  %v1030_v3 = vmul.f32 %v3055_v45, %v1028_v20  ;;  %v993_v50 = vadd.f32 %v992_v63, %v981_v46  ;;  %v1133_v16 = vsub.f32 2.0, %v1132_v53 }
 0x267   : > { %v1012_v36 = vmul.f32 %v1011_v34, %v4107_v33  ;;  %v1051_v13 = vmul.f32 %v3057_v18, %v1049_v1  ;;  %v951_v8 = vadd.f32 %v950_v12, %v940_v44  ;;  %v3059_v22 = vpop.eup %3058 }
 0x268   : > { %v970_v11 = vmul.f32 %v969_v62, %v4109_v57  ;;  %v1031_v42 = vsub.f32 2.0, %v1030_v3  ;;  %v994_v0 = vmul.f32 %v993_v50, %v4039_v54  ;;  %v3061_v58 = vpop.eup %3060  ;;  %v1176_v54 = vmul.f32 %v3059_v22, %v4160_v25 }
 0x269   : > { %v1052_v20 = vsub.f32 2.0, %v1051_v13  ;;  %v952_v63 = vmul.f32 %v951_v8, %v4030_v56  ;;  %v1013_v7 = vmul.f32 0.25, %v1012_v36  ;;  %v1112_v3 = vmul.f32 %v4175_v59, %v1111_v9  ;;  %v1044_v36 = vld [vmem:[#allocation7 + $0x28] sm:$0xff] }
 0x26a   : > { %v3063_v33 = vpop.eup %3062  ;;  %v1032_v1 = vmul.f32 %v3055_v45, %v1031_v42  ;;  %v971_v46 = vmul.f32 0.25, %v970_v11  ;;  %v1155_v56 = vsub.f32 2.0, %v1154_v27  ;;  %v1023_v45 = vld [vmem:[#allocation7 + $0x20] sm:$0xff]  ;;  %v1134_v13 = vmul.f32 %v3051_v15, %v1133_v16 }
 0x26b   : > { %v3065_v4 = vpop.eup %3064  ;;  %v1053_v44 = vmul.f32 %v3057_v18, %v1052_v20  ;;  %v1072_v62 = vmul.f32 %v3063_v33, %v1070_v40  ;;  %v1014_v57 = vadd.f32 %v1013_v7, %v1002_v24  ;;  %v1198_v18 = vmul.f32 %v3061_v58, %v4163_v39 }
 0x26c   : > { %v4201_v34 = vpop.eup %3066  ;;  %v1033_v21 = vmul.f32 %v1032_v1, %v4135_v48  ;;  %v972_v12 = vadd.f32 %v971_v46, %v960_v28  ;;  %v1177_v20 = vsub.f32 2.0, %v1176_v54  ;;  %v1220_v9 = vmul.f32 %v3065_v4, %v4170_v49 }
 0x26d   : > { %v1054_v8 = vmul.f32 %v1053_v44, %v4137_v43  ;;  %v1073_v50 = vsub.f32 2.0, %v1072_v62  ;;  %v1015_v42 = vmul.f32 %v1014_v57, %v4041_v5  ;;  %v3069_v40 = vpop.eup %3068  ;;  %v1113_v5 = vmul.f32 %v1112_v3, %v4068_v2 }
 0x26e   : > { %v973_v53 = vmul.f32 %v972_v12, %v4033_v14  ;;  %v1034_v25 = vmul.f32 0.25, %v1033_v21  ;;  %v1156_v7 = vmul.f32 %v4190_v37, %v1155_v56  ;;  %v1199_v14 = vsub.f32 2.0, %v1198_v18 }
 0x26f   : > { %v3071_v11 = vpop.eup %3070  ;;  %v1074_v48 = vmul.f32 %v3063_v33, %v1073_v50  ;;  %v1055_v24 = vmul.f32 0.25, %v1054_v8  ;;  %v1065_v33 = vld [vmem:[#allocation7 + $0x30] sm:$0xff]  ;;  %v1242_v16 = vmul.f32 %v4201_v34, %v4173_v51  ;;  %v1178_v2 = vmul.f32 %v3059_v22, %v1177_v20  ;;  %v1106_v51 = vld [vmem:[#allocation8] sm:$0xff] }
 0x270   : > { %v974_v59 = vadd.f32 %v973_v53, %v952_v63  ;;  %v1093_v43 = vmul.f32 %v3071_v11, %v1091_v6  ;;  %v1035_v27 = vadd.f32 %v1034_v25, %v1023_v45  ;;  %v1135_v63 = vmul.f32 %v1134_v13, %v4094_v10  ;;  %v1086_v10 = vld [vmem:[#allocation7 + $0x38] sm:$0xff] }
 0x271   : > { %v1075_v28 = vmul.f32 %v1074_v48, %v4157_v30  ;;  %v1056_v39 = vadd.f32 %v1055_v24, %v1044_v36  ;;  %v1221_v62 = vsub.f32 2.0, %v1220_v9  ;;  %v1264_v37 = vmul.f32 %v3069_v40, %v4181_v55  ;;  %v1128_v55 = vld [vmem:[#allocation8 + $0x8] sm:$0xff] }
 0x272   : > { %v995_v1 = vadd.f32 %v994_v0, %v974_v59  ;;  %v1094_v46 = vsub.f32 2.0, %v1093_v43  ;;  %v1036_v15 = vmul.f32 %v1035_v27, %v4043_v35  ;;  %v1114_v0 = vmul.f32 0.25, %v1113_v5  ;;  %v1172_v43 = vld [vmem:[#allocation8 + $0x18] sm:$0xff] }
 0x273   : > { %v1057_v49 = vmul.f32 %v1056_v39, %v4045_v60  ;;  %v1076_v6 = vmul.f32 0.25, %v1075_v28  ;;  %v1157_v54 = vmul.f32 %v1156_v7, %v4097_v17  ;;  %v1200_v12 = vmul.f32 %v3061_v58, %v1199_v14  ;;  %v4224_v17 = vld [vmem:[%s3739_s20] sm:$0xff]  ;;  %v1194_v7 = vld [vmem:[#allocation8 + $0x20] sm:$0xff] }
 0x274   : > { %v1016_v44 = vadd.f32 %v1015_v42, %v995_v1  ;;  %v1095_v30 = vmul.f32 %v3071_v11, %v1094_v46  ;;  %v1243_v60 = vsub.f32 2.0, %v1242_v16  ;;  %v1136_v22 = vmul.f32 0.25, %v1135_v63  ;;  %v1150_v11 = vld [vmem:[#allocation8 + $0x10] sm:$0xff]  ;;  %v4758_v46 = vld [vmem:[#allocation82_spill] sm:$0xff] }
 0x275   : > { %v1077_v57 = vadd.f32 %v1076_v6, %v1065_v33  ;;  %v1179_v56 = vmul.f32 %v1178_v2, %v4112_v41  ;;  %v1222_v42 = vmul.f32 %v3065_v4, %v1221_v62  ;;  %v1265_v45 = vsub.f32 2.0, %v1264_v37  ;;  %v1216_v33 = vld [vmem:[#allocation8 + $0x28] sm:$0xff] }
 0x276   : > { %v1096_v35 = vmul.f32 %v1095_v30, %v4178_v31  ;;  %v1037_v21 = vadd.f32 %v1036_v15, %v1016_v44  ;;  %v1115_v18 = vadd.f32 %v1114_v0, %v1106_v51  ;;  %v1119_v31 = vrot.slane %v4224_v17, %v4059_v19  ;;  %v4759_v2 = vld [vmem:[#allocation83_spill] sm:$0xff]  ;;  %v1238_v44 = vld [vmem:[#allocation8 + $0x30] sm:$0xff]  ;;  %v1260_v0 = vld [vmem:[#allocation8 + $0x38] sm:$0xff] }
 0x277   : > { %v1078_v3 = vmul.f32 %v1077_v57, %v4052_v32  ;;  %v1158_v53 = vmul.f32 0.25, %v1157_v54  ;;  %v1201_v32 = vmul.f32 %v1200_v12, %v4123_v52  ;;  %v1244_v36 = vmul.f32 %v4201_v34, %v1243_v60  ;;  %v4760_v51 = vld [vmem:[#allocation84_spill] sm:$0xff] }
 0x278   : > { %v1058_v8 = vadd.f32 %v1057_v49, %v1037_v21  ;;  %v1097_v50 = vmul.f32 0.25, %v1096_v35  ;;  %v1137_v13 = vadd.f32 %v1136_v22, %v1128_v55  ;;  %v1141_v41 = vrot.slane %v4224_v17, %v4063_v23  ;;  %v4761_v22 = vld [vmem:[#allocation85_spill] sm:$0xff] }
 0x279   : > { %v1180_v48 = vmul.f32 0.25, %v1179_v56  ;;  %v1223_v24 = vmul.f32 %v1222_v42, %v4130_v61  ;;  %v1266_v20 = vmul.f32 %v3069_v40, %v1265_v45  ;;  %v1120_v9 = vmul.f32 %v1119_v31, %v1115_v18  ;;  %v4757_v61 = vld [vmem:[#allocation87_spill] sm:$0xff]  ;;  %v4762_v18 = vld [vmem:[#allocation20_spill] sm:$0xff] }
 0x27a   : > { %v1079_v58 = vadd.f32 %v1078_v3, %v1058_v8  ;;  %v1098_v25 = vadd.f32 %v1097_v50, %v1086_v10  ;;  %v1163_v59 = vrot.slane %v4224_v17, %v4065_v47  ;;  %v1159_v52 = vadd.f32 %v1158_v53, %v1150_v11  ;;  %v4764_v53 = vld [vmem:[#allocation21_spill] sm:$0xff]  ;;  %v4771_v11 = vld [vmem:[#allocation28_spill] sm:$0xff] }
 0x27b   : > { %v1202_v5 = vmul.f32 0.25, %v1201_v32  ;;  %v1245_v34 = vmul.f32 %v1244_v36, %v4133_v26  ;;  %v1142_v28 = vmul.f32 %v1141_v41, %v1137_v13  ;;  %v1185_v39 = vrot.slane %v4224_v17, %v4070_v38  ;;  %v4767_v32 = vld [vmem:[#allocation24_spill] sm:$0xff]  ;;  %v4768_v36 = vld [vmem:[#allocation25_spill] sm:$0xff]  ;;  %v4769_v13 = vld [vmem:[#allocation26_spill] sm:$0xff] }
 0x27c   : > { %v1099_v4 = vmul.f32 %v1098_v25, %v4054_v29  ;;  %v1181_v14 = vadd.f32 %v1180_v48, %v1172_v43  ;;  %v1224_v1 = vmul.f32 0.25, %v1223_v24  ;;  %v1267_v40 = vmul.f32 %v1266_v20, %v4757_v61  ;;  %v4766_v25 = vld [vmem:[#allocation23_spill] sm:$0xff]  ;;  %v4773_v48 = vld [vmem:[#allocation30_spill] sm:$0xff]  ;;  %v4775_v20 = vld [vmem:[#allocation32_spill] sm:$0xff] }
 0x27d   : > { %v1207_v15 = vrot.slane %v4224_v17, %v4758_v46  ;;  %v1164_v49 = vmul.f32 %v1163_v59, %v1159_v52  ;;  %v1203_v6 = vadd.f32 %v1202_v5, %v1194_v7  ;;  %v1246_v63 = vmul.f32 0.25, %v1245_v34  ;;  %v4770_v41 = vld [vmem:[#allocation27_spill] sm:$0xff]  ;;  %v4777_v59 = vld [vmem:[#allocation36_spill] sm:$0xff]  ;;  %v4778_v43 = vld [vmem:[#allocation38_spill] sm:$0xff] }
 0x27e   : > { %v1100_v27 = vadd.f32 %v1099_v4, %v1079_v58  ;;  %v1229_v26 = vrot.slane %v4224_v17, %v4759_v2  ;;  %v1186_v62 = vmul.f32 %v1185_v39, %v1181_v14  ;;  %v1225_v37 = vadd.f32 %v1224_v1, %v1216_v33  ;;  %v4765_v58 = vld [vmem:[#allocation22_spill] sm:$0xff]  ;;  %v4772_v4 = vld [vmem:[#allocation29_spill] sm:$0xff]  ;;  %v4774_v24 = vld [vmem:[#allocation31_spill] sm:$0xff] }
 0x27f   : > { %v1268_v57 = vmul.f32 0.25, %v1267_v40  ;;  %v1208_v35 = vmul.f32 %v1207_v15, %v1203_v6  ;;  %v1247_v21 = vadd.f32 %v1246_v63, %v1238_v44  ;;  %v1251_v12 = vrot.slane %v4224_v17, %v4760_v51  ;;  %v2332_v5 = vld [vmem:[%s4573_s8] ss:$0 sm:$0xff]  ;;  %v4781_v1 = vld [vmem:[#allocation35_spill] sm:$0xff]  ;;  %v4782_v61 = vld [vmem:[#allocation42_spill] sm:$0xff] }
 0x280   : > { %v1121_v29 = vadd.f32 %v1120_v9, %v1100_v27  ;;  %v1230_v3 = vmul.f32 %v1229_v26, %v1225_v37  ;;  %v1273_v56 = vrot.slane %v4224_v17, %v4761_v22  ;;  %v4763_v31 = vmov 0.0   ;;  %v4776_v9 = vld [vmem:[#allocation34_spill] sm:$0xff]  ;;  %v2331_v27 = vld [vmem:[%s4572_s7] ss:$0 sm:$0xff]  ;;  %v4783_v40 = vld [vmem:[#allocation37_spill] sm:$0xff] }
 0x281   : > { %v1269_v10 = vadd.f32 %v1268_v57, %v1260_v0  ;;  %v1252_v50 = vmul.f32 %v1251_v12, %v1247_v21  ;;  %v4780_v14 = vld [vmem:[#allocation40_spill] sm:$0xff]  ;;  %v4785_v33 = vld [vmem:[#allocation39_spill] sm:$0xff]  ;;  %v4790_v26 = vld [vmem:[#allocation50_spill] sm:$0xff] }
 0x282   : > { %v1143_v16 = vadd.f32 %v1142_v28, %v1121_v29  ;;  %v4779_v29 = vld [vmem:[#allocation33_spill] sm:$0xff]  ;;  %v4784_v15 = vld [vmem:[#allocation44_spill] sm:$0xff]  ;;  %v4789_v63 = vld [vmem:[#allocation43_spill] sm:$0xff] }
 0x283   : > { %v1274_v42 = vmul.f32 %v1273_v56, %v1269_v10  ;;  %v4788_v6 = vld [vmem:[#allocation48_spill] sm:$0xff]  ;;  %v4791_v44 = vld [vmem:[#allocation45_spill] sm:$0xff]  ;;  %v4794_v37 = vld [vmem:[#allocation54_spill] sm:$0xff] }
 0x284   : > { %v1165_v30 = vadd.f32 %v1164_v49, %v1143_v16  ;;  %v4786_v16 = vld [vmem:[#allocation46_spill] sm:$0xff]  ;;  %v4787_v49 = vld [vmem:[#allocation41_spill] sm:$0xff]  ;;  %v4796_v0 = vld [vmem:[#allocation56_spill] sm:$0xff] }
 0x285   : > { %v4795_v57 = vld [vmem:[#allocation49_spill] sm:$0xff]  ;;  %v4800_v12 = vld [vmem:[#allocation60_spill] sm:$0xff] }
 0x286   : > { %v1187_v54 = vadd.f32 %v1186_v62, %v1165_v30  ;;  %v4792_v30 = vld [vmem:[#allocation52_spill] sm:$0xff]  ;;  %v4793_v62 = vld [vmem:[#allocation47_spill] sm:$0xff]  ;;  %v4799_v21 = vld [vmem:[#allocation53_spill] sm:$0xff] }
 0x287   : > { %v4803_v10 = vld [vmem:[#allocation57_spill] sm:$0xff]  ;;  %v4804_v56 = vld [vmem:[#allocation64_spill] sm:$0xff] }
 0x288   : > { %v1209_v60 = vadd.f32 %v1208_v35, %v1187_v54  ;;  %v4797_v54 = vld [vmem:[#allocation51_spill] sm:$0xff]  ;;  %v4798_v35 = vld [vmem:[#allocation58_spill] sm:$0xff] }
 0x28a   : > { %v1231_v8 = vadd.f32 %v1230_v3, %v1209_v60  ;;  %v4801_v60 = vld [vmem:[#allocation55_spill] sm:$0xff]  ;;  %v4802_v3 = vld [vmem:[#allocation62_spill] sm:$0xff] }
 0x28c   : > { %v1253_v55 = vadd.f32 %v1252_v50, %v1231_v8  ;;  %v4805_v8 = vld [vmem:[#allocation59_spill] sm:$0xff]  ;;  %v4806_v50 = vld [vmem:[#allocation66_spill] sm:$0xff] }
 0x28e   : > { %v1275_v45 = vadd.f32 %v1274_v42, %v1253_v55  ;;  %v4807_v55 = vld [vmem:[#allocation61_spill] sm:$0xff]  ;;  %v4808_v42 = vld [vmem:[#allocation68_spill] sm:$0xff] }
 0x290   : > { %2477 = vmatmul.mubr.f32.vlgmr.msra.gmra.mrb[4].mxu1 %v1275_v45  ;;  %v4809_v45 = vld [vmem:[#allocation63_spill] sm:$0xff] }
 0x291   : > { %2752 = vmatpush1.bf16.msra.mxu1 %v4762_v18  ;;  %1513 = vmatprep.mubr.f32.mxu1 %v4763_v31  ;;  %v4810_v18 = vmov 0.0|0.0  }
 0x292   : > { %2754 = vmatprep.subr.bf16.mxu1 %v4764_v53  ;;  %v4811_v53 = vld [vmem:[#allocation65_spill] sm:$0xff] }
 0x295   : > { %2756 = vmatpush1.bf16.msra.mxu1 %v4765_v58  ;;  %v4812_v58 = vld [vmem:[#allocation67_spill] sm:$0xff] }
 0x296   : > { %2758 = vmatprep.subr.bf16.mxu1 %v4766_v25  ;;  %v4813_v25 = vld [vmem:[#allocation69_spill] sm:$0xff] }
 0x299   : > { %2760 = vmatpush1.bf16.msra.mxu1 %v4767_v32  ;;  %v4814_v32 = vld [vmem:[#allocation70_spill] sm:$0xff] }
 0x29a   : > { %2762 = vmatprep.subr.bf16.mxu1 %v4768_v36  ;;  %v4815_v36 = vld [vmem:[#allocation71_spill] sm:$0xff] }
 0x29d   : > { %2764 = vmatpush1.bf16.msra.mxu1 %v4769_v13  ;;  %v4816_v13 = vld [vmem:[#allocation72_spill] sm:$0xff] }
 0x29e   : > { %2766 = vmatprep.subr.bf16.mxu1 %v4770_v41  ;;  %v4817_v41 = vld [vmem:[#allocation73_spill] sm:$0xff] }
 0x2a1   : > { %2768 = vmatpush1.bf16.msra.mxu1 %v4771_v11  ;;  %v4818_v11 = vld [vmem:[#allocation74_spill] sm:$0xff] }
 0x2a2   : > { %2770 = vmatprep.subr.bf16.mxu1 %v4772_v4  ;;  %v4819_v4 = vld [vmem:[#allocation75_spill] sm:$0xff] }
 0x2a5   : > { %2772 = vmatpush1.bf16.msra.mxu1 %v4773_v48  ;;  %v4820_v48 = vld [vmem:[#allocation76_spill] sm:$0xff] }
 0x2a6   : > { %2774 = vmatprep.subr.bf16.mxu1 %v4774_v24  ;;  %v4821_v24 = vld [vmem:[#allocation77_spill] sm:$0xff] }
 0x2a9   : > { %2776 = vmatpush1.bf16.msra.mxu1 %v4775_v20  ;;  %v4822_v20 = vld [vmem:[#allocation78_spill] sm:$0xff] }
 0x2aa   : > { %2778 = vmatprep.subr.bf16.mxu1 %v4776_v9  ;;  %v4824_v9 = vld [vmem:[#allocation80_spill] sm:$0xff] }
 0x2ad   : > { %2780 = vmatpush1.bf16.msra.mxu1 %v4777_v59  ;;  %v4825_v59 = vld [vmem:[#allocation81_spill] sm:$0xff] }
 0x2ae   : > { %2814 = vmatprep.subr.bf16.mxu1 %v4778_v43 }
 0x363   : > { %v1358_v52 = vpop.f32.mrb[4].mxu1 }
 0x364   : > { %v1369_v34 = vmul.f32 %v2331_v27, %v1358_v52  ;;  %v2478_v28 = vpop.f32.mrb[5].mxu1 }
 0x366   : > { %v1377_v39 = vadd.f32 %v2332_v5, %v1369_v34 }
 0x368   : > { %3072 = vtanh.f32 %v1377_v39 }
 0x372   : > { %v4271_v7 = vpop.eup %3072 }
 0x373   : > { %2512 = vmatmul.mubr.f32.vlgmr.msra.gmra.mrb[6].mxu0 %v4271_v7  ;;  %1514 = vmatmul.mubr.f32.vlgmr.msra.gmra.mrb[6].mxu1 %v4271_v7 }
 0x374   : > { %2784 = vmatpush1.bf16.msra.mxu0 %v4779_v29  ;;  %2816 = vmatpush1.bf16.msra.mxu1 %v4780_v14 }
 0x375   : > { %2786 = vmatprep.subr.bf16.mxu0 %v4781_v1  ;;  %2818 = vmatprep.subr.bf16.mxu1 %v4782_v61 }
 0x376   : > { %1584 = vmatprep.mubr.f32.mxu0 %v4763_v31  ;;  %1655 = vmatprep.mubr.f32.mxu1 %v4763_v31 }
 0x378   : > { %2788 = vmatpush1.bf16.msra.mxu0 %v4783_v40  ;;  %2820 = vmatpush1.bf16.msra.mxu1 %v4784_v15 }
 0x379   : > { %2790 = vmatprep.subr.bf16.mxu0 %v4785_v33  ;;  %2822 = vmatprep.subr.bf16.mxu1 %v4786_v16 }
 0x37c   : > { %2792 = vmatpush1.bf16.msra.mxu0 %v4787_v49  ;;  %2824 = vmatpush1.bf16.msra.mxu1 %v4788_v6 }
 0x37d   : > { %2794 = vmatprep.subr.bf16.mxu0 %v4789_v63  ;;  %2826 = vmatprep.subr.bf16.mxu1 %v4790_v26 }
 0x380   : > { %2796 = vmatpush1.bf16.msra.mxu0 %v4791_v44  ;;  %2828 = vmatpush1.bf16.msra.mxu1 %v4792_v30  ;;  %v4826_v44 = vmov 32   ;;  %v4827_v30 = vmov 48  }
 0x381   : > { %2798 = vmatprep.subr.bf16.mxu0 %v4793_v62  ;;  %2830 = vmatprep.subr.bf16.mxu1 %v4794_v37 }
 0x384   : > { %2800 = vmatpush1.bf16.msra.mxu0 %v4795_v57  ;;  %2832 = vmatpush1.bf16.msra.mxu1 %v4796_v0 }
 0x385   : > { %2802 = vmatprep.subr.bf16.mxu0 %v4797_v54  ;;  %2834 = vmatprep.subr.bf16.mxu1 %v4798_v35 }
 0x388   : > { %2804 = vmatpush1.bf16.msra.mxu0 %v4799_v21  ;;  %2836 = vmatpush1.bf16.msra.mxu1 %v4800_v12 }
 0x389   : > { %2806 = vmatprep.subr.bf16.mxu0 %v4801_v60  ;;  %2838 = vmatprep.subr.bf16.mxu1 %v4802_v3 }
 0x38c   : > { %2808 = vmatpush1.bf16.msra.mxu0 %v4803_v10  ;;  %2840 = vmatpush1.bf16.msra.mxu1 %v4804_v56 }
 0x38d   : > { %2810 = vmatprep.subr.bf16.mxu0 %v4805_v8  ;;  %2842 = vmatprep.subr.bf16.mxu1 %v4806_v50 }
 0x390   : > { %2812 = vmatpush1.bf16.msra.mxu0 %v4807_v55  ;;  %2844 = vmatpush1.bf16.msra.mxu1 %v4808_v42  ;;  %v4828_v55 = vmov 64   ;;  %v4829_v42 = vmov 96  }
 0x391   : > { %2846 = vmatprep.subr.bf16.mxu0 %v4809_v45  ;;  %2877 = vmatprep.subr.bf16.mxu1 %v4810_v18 }
 0x393   : > { %1585 = vmatmul.mubr.f32.vlgmr.msra.gmra.mrb[8].mxu0 %v4271_v7  ;;  %1656 = vmatmul.mubr.f32.vlgmr.msra.gmra.mrb[8].mxu1 %v4271_v7 }
 0x394   : > { %2848 = vmatpush1.bf16.msra.mxu0 %v4811_v53  ;;  %1726 = vmatprep.mubr.f32.mxu0 %v4763_v31 }
 0x395   : > { %2850 = vmatprep.subr.bf16.mxu0 %v4812_v58  ;;  %2546 = vmatprep.mubr.msk.f32.mxu1 %vm3405_vm0, %v4763_v31  ;;  %v4823_v31 = vld [vmem:[#allocation79_spill] sm:$0xff] }
 0x398   : > { %2852 = vmatpush1.bf16.msra.mxu0 %v4813_v25  ;;  %v4830_v25 = vmov 80  }
 0x399   : > { %2854 = vmatprep.subr.bf16.mxu0 %v4814_v32  ;;  %v4831_v32 = vmov 112  }
 0x39c   : > { %2856 = vmatpush1.bf16.msra.mxu0 %v4815_v36 }
 0x39d   : > { %2858 = vmatprep.subr.bf16.mxu0 %v4816_v13 }
 0x3a0   : > { %2860 = vmatpush1.bf16.msra.mxu0 %v4817_v41 }
 0x3a1   : > { %2862 = vmatprep.subr.bf16.mxu0 %v4818_v11 }
 0x3a4   : > { %2864 = vmatpush1.bf16.msra.mxu0 %v4819_v4 }
 0x3a5   : > { %2866 = vmatprep.subr.bf16.mxu0 %v4820_v48 }
 0x3a8   : > { %2868 = vmatpush1.bf16.msra.mxu0 %v4821_v24 }
 0x3a9   : > { %2870 = vmatprep.subr.bf16.mxu0 %v4822_v20 }
 0x3ac   : > { %2872 = vmatpush1.bf16.msra.mxu0 %v4823_v31 }
 0x3ad   : > { %2874 = vmatprep.subr.bf16.mxu0 %v4824_v9  ;;  %v1905_v9 = vrot.slane %v4271_v7, %v4059_v19 }
 0x3b0   : > { %2876 = vmatpush1.bf16.msra.mxu0 %v4825_v59  ;;  %v1927_v59 = vrot.slane %v4271_v7, %v4063_v23 }
 0x3b3   : > { %1727 = vmatmul.mubr.f32.vlgmr.msra.gmra.mrb[10].mxu0 %v4271_v7 }
 0x446   : > { %v4330_v43 = vpop.f32.mrb[6].mxu0  ;;  %v4332_v27 = vpop.f32.mrb[6].mxu1 }
 0x447   : > { %1754 = vperm.xlu1 %3032, %v4330_v43   ;;  %1735 = vperm.xlu0 %3031, %v4330_v43   ;;  %v2513_v52 = vpop.f32.mrb[7].mxu0  ;;  %v4336_v5 = vpop.f32.mrb[7].mxu1  ;;  %v1889_v34 = vrot.slane %v4330_v43, %v4059_v19  ;;  %v1911_v28 = vrot.slane %v4330_v43, %v4063_v23  ;;  %v1933_v39 = vrot.slane %v4330_v43, %v4065_v47 }
 0x448   : > { %v1955_v29 = vrot.slane %v4330_v43, %v4070_v38  ;;  %v1977_v14 = vrot.slane %v4330_v43, %v4758_v46  ;;  %v1999_v1 = vrot.slane %v4330_v43, %v4759_v2  ;;  %v2021_v61 = vrot.slane %v4330_v43, %v4760_v51 }
 0x449   : > { %v4353_v40 = vsub.f32 %v4330_v43, %v1889_v34  ;;  %v4356_v15 = vsub.f32 %v4330_v43, %v1911_v28  ;;  %v4359_v33 = vsub.f32 %v4330_v43, %v1933_v39  ;;  %v2043_v16 = vrot.slane %v4330_v43, %v4761_v22 }
 0x44a   : > { %v4364_v49 = vsub.f32 %v4330_v43, %v1955_v29  ;;  %v4367_v6 = vsub.f32 %v4330_v43, %v1977_v14  ;;  %v4370_v63 = vsub.f32 %v4330_v43, %v1999_v1  ;;  %v4373_v26 = vsub.f32 %v4330_v43, %v2021_v61 }
 0x44b   : > { %3033 = vset.pattern.permute.xlu1 %v4826_v44  ;;  %3034 = vset.pattern.permute.xlu0 %v4827_v30  ;;  %v1893_v62 = vand.u32 2147483647, %v4353_v40  ;;  %v1915_v37 = vand.u32 2147483647, %v4356_v15  ;;  %v1937_v57 = vand.u32 2147483647, %v4359_v33  ;;  %v4381_v0 = vsub.f32 %v4330_v43, %v2043_v16 }
 0x44c   : > { %1773 = vperm.xlu1 %3033, %v4330_v43   ;;  %1792 = vperm.xlu0 %3034, %v4330_v43   ;;  %v1959_v54 = vand.u32 2147483647, %v4364_v49  ;;  %v1981_v35 = vand.u32 2147483647, %v4367_v6  ;;  %v2003_v21 = vand.u32 2147483647, %v4370_v63  ;;  %v1949_v39 = vrot.slane %v4271_v7, %v4065_v47 }
 0x44d   : > { %v1894_v12 = vadd.f32 1.0, %v1893_v62  ;;  %v1916_v60 = vadd.f32 1.0, %v1915_v37  ;;  %v1938_v3 = vadd.f32 1.0, %v1937_v57  ;;  %v2025_v10 = vand.u32 2147483647, %v4373_v26 }
 0x44e   : > { %v1960_v56 = vadd.f32 1.0, %v1959_v54  ;;  %v2047_v8 = vand.u32 2147483647, %v4381_v0  ;;  %v1982_v50 = vadd.f32 1.0, %v1981_v35  ;;  %v2004_v45 = vadd.f32 1.0, %v2003_v21  ;;  %v1892_v35 = vld [vmem:[#allocation8 + $0x40] sm:$0xff] }
 0x44f   : > { %3074 = vrcp.f32 %v1894_v12  ;;  %v2026_v53 = vadd.f32 1.0, %v2025_v10  ;;  %v1971_v30 = vrot.slane %v4271_v7, %v4070_v38  ;;  %v1936_v38 = vld [vmem:[#allocation8 + $0x50] sm:$0xff] }
 0x450   : > { %3035 = vset.pattern.permute.xlu1 %v4828_v55  ;;  %3037 = vset.pattern.permute.xlu0 %v4829_v42  ;;  %3076 = vrcp.f32 %v1916_v60  ;;  %v2048_v58 = vadd.f32 1.0, %v2047_v8 }
 0x451   : > { %1811 = vperm.xlu1 %3035, %v4330_v43   ;;  %1849 = vperm.xlu0 %3037, %v4330_v43   ;;  %3078 = vrcp.f32 %v1938_v3 }
 0x452   : > { %3080 = vrcp.f32 %v1960_v56 }
 0x453   : > { %3082 = vrcp.f32 %v1982_v50 }
 0x454   : > { %3084 = vrcp.f32 %v2004_v45 }
 0x455   : > { %3036 = vset.pattern.permute.xlu1 %v4830_v25  ;;  %3086 = vrcp.f32 %v2026_v53  ;;  %3039 = vset.pattern.permute.xlu0 %v4831_v32 }
 0x456   : > { %1830 = vperm.xlu1 %3036, %v4330_v43   ;;  %3088 = vrcp.f32 %v2048_v58 }
 0x459   : > { %v3075_v36 = vpop.eup %3074 }
 0x45a   : > { %v3077_v13 = vpop.eup %3076  ;;  %3038 = vset.pattern.permute.xlu1 %v4831_v32  ;;  %v1896_v41 = vmul.f32 %v3075_v36, %v1894_v12  ;;  %v1958_v32 = vld [vmem:[#allocation8 + $0x58] sm:$0xff] }
 0x45b   : > { %v3079_v11 = vpop.eup %3078  ;;  %1868 = vperm.xlu1 %3038, %v4330_v43   ;;  %v1918_v4 = vmul.f32 %v3077_v13, %v1916_v60 }
 0x45c   : > { %v3081_v48 = vpop.eup %3080  ;;  %v1897_v24 = vsub.f32 2.0, %v1896_v41  ;;  %v1940_v20 = vmul.f32 %v3079_v11, %v1938_v3  ;;  %v1914_v3 = vld [vmem:[#allocation8 + $0x48] sm:$0xff]  ;;  %v1980_v41 = vld [vmem:[#allocation8 + $0x60] sm:$0xff] }
 0x45d   : > { %v3083_v31 = vpop.eup %3082  ;;  %v1919_v52 = vsub.f32 2.0, %v1918_v4  ;;  %v1962_v34 = vmul.f32 %v3081_v48, %v1960_v56 }
 0x45e   : > { %v3085_v28 = vpop.eup %3084  ;;  %v1898_v29 = vmul.f32 %v3075_v36, %v1897_v24  ;;  %v1941_v14 = vsub.f32 2.0, %v1940_v20  ;;  %v1984_v1 = vmul.f32 %v3083_v31, %v1982_v50 }
 0x45f   : > { %v3087_v61 = vpop.eup %3086  ;;  %v1920_v16 = vmul.f32 %v3077_v13, %v1919_v52  ;;  %v1963_v44 = vsub.f32 2.0, %v1962_v34  ;;  %v2006_v62 = vmul.f32 %v3085_v28, %v2004_v45 }
 0x460   : > { %v3089_v19 = vpop.eup %3088  ;;  %v1899_v37 = vmul.f32 %v1898_v29, %v4353_v40  ;;  %v1942_v23 = vmul.f32 %v3079_v11, %v1941_v14  ;;  %v1985_v57 = vsub.f32 2.0, %v1984_v1  ;;  %v2028_v54 = vmul.f32 %v3087_v61, %v2026_v53  ;;  %v2024_v14 = vld [vmem:[#allocation8 + $0x70] sm:$0xff] }
 0x461   : > { %v1921_v21 = vmul.f32 %v1920_v16, %v4356_v15  ;;  %v1964_v47 = vmul.f32 %v3081_v48, %v1963_v44  ;;  %v2007_v12 = vsub.f32 2.0, %v2006_v62  ;;  %v2050_v60 = vmul.f32 %v3089_v19, %v2048_v58  ;;  %v2046_v62 = vld [vmem:[#allocation8 + $0x78] sm:$0xff] }
 0x462   : > { %v1900_v10 = vmul.f32 0.25, %v1899_v37  ;;  %v1943_v56 = vmul.f32 %v1942_v23, %v4359_v33  ;;  %v1986_v8 = vmul.f32 %v3083_v31, %v1985_v57  ;;  %v2029_v50 = vsub.f32 2.0, %v2028_v54  ;;  %v2002_v31 = vld [vmem:[#allocation8 + $0x68] sm:$0xff] }
 0x463   : > { %v1922_v55 = vmul.f32 0.25, %v1921_v21  ;;  %v1965_v42 = vmul.f32 %v1964_v47, %v4364_v49  ;;  %v2008_v40 = vmul.f32 %v3085_v28, %v2007_v12  ;;  %v2051_v45 = vsub.f32 2.0, %v2050_v60  ;;  %v2063_v21 = vld [vmem:[#allocation10 + $0x80] sm:$0xff]  ;;  %v2064_v47 = vld [vmem:[#allocation10 + $0x88] sm:$0xff]  ;;  %v2065_v12 = vld [vmem:[#allocation10 + $0x90] sm:$0xff] }
 0x464   : > { %v1901_v25 = vadd.f32 %v1900_v10, %v1892_v35  ;;  %v1944_v53 = vmul.f32 0.25, %v1943_v56  ;;  %v1987_v15 = vmul.f32 %v1986_v8, %v4367_v6  ;;  %v2030_v36 = vmul.f32 %v3087_v61, %v2029_v50  ;;  %v2066_v60 = vld [vmem:[#allocation10 + $0x98] sm:$0xff]  ;;  %v2068_v10 = vld [vmem:[#allocation10 + $0xa8] sm:$0xff]  ;;  %v2071_v50 = vld [vmem:[#allocation10 + $0xc0] sm:$0xff] }
 0x465   : > { %v1923_v13 = vadd.f32 %v1922_v55, %v1914_v3  ;;  %v1966_v58 = vmul.f32 0.25, %v1965_v42  ;;  %v2009_v11 = vmul.f32 %v2008_v40, %v4370_v63  ;;  %v2052_v33 = vmul.f32 %v3089_v19, %v2051_v45  ;;  %v2073_v42 = vld [vmem:[#allocation10 + $0xd0] sm:$0xff]  ;;  %v2074_v40 = vld [vmem:[#allocation10 + $0xd8] sm:$0xff] }
 0x466   : > { %v4413_v4 = vpop.f32.mrb[8].mxu0  ;;  %v4415_v48 = vpop.f32.mrb[8].mxu1  ;;  %v4417_v24 = vmul.f32 %v1905_v9, %v1901_v25  ;;  %v1945_v49 = vadd.f32 %v1944_v53, %v1936_v38  ;;  %v1988_v20 = vmul.f32 0.25, %v1987_v15  ;;  %v2031_v52 = vmul.f32 %v2030_v36, %v4373_v26  ;;  %v2072_v38 = vld [vmem:[#allocation10 + $0xc8] sm:$0xff] }
 0x467   : > { %v4420_v34 = vpop.f32.mrb[9].mxu0  ;;  %v4422_v6 = vpop.f32.mrb[9].mxu1  ;;  %v4424_v28 = vmul.f32 %v1927_v59, %v1923_v13  ;;  %v1967_v29 = vadd.f32 %v1966_v58, %v1958_v32  ;;  %v2010_v63 = vmul.f32 0.25, %v2009_v11  ;;  %v2053_v1 = vmul.f32 %v2052_v33, %v4381_v0  ;;  %v2075_v32 = vld [vmem:[#allocation10 + $0xe0] sm:$0xff]  ;;  %v2076_v15 = vld [vmem:[#allocation10 + $0xe8] sm:$0xff]  ;;  %v2077_v13 = vld [vmem:[#allocation10 + $0xf0] sm:$0xff] }
 0x468   : > { %v4427_v61 = vmul.f32 %v1949_v39, %v1945_v49  ;;  %v1989_v9 = vadd.f32 %v1988_v20, %v1980_v41  ;;  %v1993_v16 = vrot.slane %v4271_v7, %v4758_v46  ;;  %v2032_v44 = vmul.f32 0.25, %v2031_v52  ;;  %v2078_v58 = vld [vmem:[#allocation10 + $0xf8] sm:$0xff] }
 0x469   : > { %v4431_v26 = vmul.f32 %v1971_v30, %v1967_v29  ;;  %v2011_v19 = vadd.f32 %v2010_v63, %v2002_v31  ;;  %v2015_v59 = vrot.slane %v4271_v7, %v4759_v2  ;;  %v2054_v37 = vmul.f32 0.25, %v2053_v1  ;;  %v3109_v31 = vld [vmem:[#allocation5 + $0x8] sm:$0xff]  ;;  %v3110_v29 = vld [vmem:[#allocation5] sm:$0xff] }
 0x46a   : > { %v4435_v23 = vmul.f32 %v1993_v16, %v1989_v9  ;;  %v2033_v57 = vadd.f32 %v2032_v44, %v2024_v14  ;;  %v2037_v0 = vrot.slane %v4271_v7, %v4760_v51  ;;  %v2059_v46 = vrot.slane %v4271_v7, %v4761_v22  ;;  %v2067_v51 = vld [vmem:[#allocation10 + $0xa0] sm:$0xff]  ;;  %v2069_v22 = vld [vmem:[#allocation10 + $0xb0] sm:$0xff]  ;;  %v2070_v7 = vld [vmem:[#allocation10 + $0xb8] sm:$0xff] }
 0x46b   : > { %v4439_v39 = vmul.f32 %v2015_v59, %v2011_v19  ;;  %v2055_v54 = vadd.f32 %v2054_v37, %v2046_v62  ;;  %v2878_v2 = vpack.c.bf16 %v2064_v47, %v2063_v21  ;;  %v2881_v3 = vpack.c.bf16 %v2066_v60, %v2065_v12  ;;  %v3111_v59 = vld [vmem:[#allocation5 + $0x10] sm:$0xff] }
 0x46c   : > { %v4443_v35 = vmul.f32 %v2037_v0, %v2033_v57  ;;  %v2884_v56 = vpack.c.bf16 %v2068_v10, %v2067_v51  ;;  %v2887_v8 = vpack.c.bf16 %v2070_v7, %v2069_v22  ;;  %v2890_v55 = vpack.c.bf16 %v2072_v38, %v2071_v50  ;;  %v3112_v57 = vld [vmem:[#allocation5 + $0x18] sm:$0xff]  ;;  %v3113_v51 = vld [vmem:[#allocation5 + $0x20] sm:$0xff] }
 0x46d   : > { %v4445_v30 = vmul.f32 %v2059_v46, %v2055_v54  ;;  %2879 = vmatpush3.bf16.msra.mxu1 %v2878_v2  ;;  %v2893_v25 = vpack.c.bf16 %v2074_v40, %v2073_v42  ;;  %v2896_v36 = vpack.c.bf16 %v2076_v15, %v2075_v32  ;;  %v2899_v41 = vpack.c.bf16 %v2078_v58, %v2077_v13  ;;  %v3114_v40 = vld [vmem:[#allocation5 + $0x28] sm:$0xff] }
 0x46e   : > { %2880 = vmatprep.subr.bf16.mxu1 %v4810_v18 }
 0x471   : > { %2882 = vmatpush3.bf16.msra.mxu1 %v2881_v3 }
 0x472   : > { %2883 = vmatprep.subr.bf16.mxu1 %v4810_v18 }
 0x475   : > { %2885 = vmatpush3.bf16.msra.mxu1 %v2884_v56  ;;  %v4832_v56 = vld [vmem:[#allocation86_spill] sm:$0xff] }
 0x476   : > { %2886 = vmatprep.subr.bf16.mxu1 %v4810_v18 }
 0x479   : > { %2888 = vmatpush3.bf16.msra.mxu1 %v2887_v8 }
 0x47a   : > { %2889 = vmatprep.subr.bf16.mxu1 %v4810_v18 }
 0x47d   : > { %2891 = vmatpush3.bf16.msra.mxu1 %v2890_v55 }
 0x47e   : > { %2892 = vmatprep.subr.bf16.mxu1 %v4810_v18 }
 0x481   : > { %2894 = vmatpush3.bf16.msra.mxu1 %v2893_v25 }
 0x482   : > { %2895 = vmatprep.subr.bf16.mxu1 %v4810_v18 }
 0x485   : > { %2897 = vmatpush3.bf16.msra.mxu1 %v2896_v36 }
 0x486   : > { %v4451_v45 = vpop.f32.mrb[10].mxu0  ;;  %2898 = vmatprep.subr.bf16.mxu1 %v4810_v18 }
 0x487   : > { %v4453_v53 = vpop.f32.mrb[11].mxu0 }
 0x489   : > { %2900 = vmatpush3.bf16.msra.mxu1 %v2899_v41 }
 0x4c6   : > { %v1755_v11 = vpop.permute.xlu1 %1754  ;;  %v1736_v33 = vpop.permute.xlu0 %1735 }
 0x4c7   : > { %v1757_v49 = vsub.f32 %v4330_v43, %v1755_v11  ;;  %v1738_v20 = vsub.f32 %v4330_v43, %v1736_v33 }
 0x4c9   : > { %v1760_v52 = vmul.f32 %v3109_v31, %v1757_v49  ;;  %v1741_v63 = vmul.f32 %v3110_v29, %v1738_v20  ;;  %v4833_v31 = vld [vmem:[#allocation88_spill] sm:$0xff] }
 0x4cb   : > { %v1761_v14 = vand.u32 2147483647, %v1760_v52  ;;  %v1742_v1 = vand.u32 2147483647, %v1741_v63  ;;  %v1774_v9 = vpop.permute.xlu1 %1773  ;;  %v1793_v16 = vpop.permute.xlu0 %1792 }
 0x4cc   : > { %v1776_v44 = vsub.f32 %v4330_v43, %v1774_v9  ;;  %v1795_v62 = vsub.f32 %v4330_v43, %v1793_v16 }
 0x4cd   : > { %v1762_v18 = vadd.f32 1.0, %v1761_v14  ;;  %v1743_v19 = vadd.f32 1.0, %v1742_v1 }
 0x4ce   : > { %v4462_v37 = vmul.f32 %v3111_v59, %v1776_v44  ;;  %v4464_v0 = vmul.f32 %v3112_v57, %v1795_v62  ;;  %v1759_v57 = vld [vmem:[#allocation7 + $0x48] sm:$0xff] }
 0x4cf   : > { %3090 = vrcp.f32 %v1762_v18 }
 0x4d0   : > { %3092 = vrcp.f32 %v1743_v19  ;;  %v1780_v54 = vand.u32 2147483647, %v4462_v37  ;;  %v1799_v46 = vand.u32 2147483647, %v4464_v0  ;;  %v1812_v21 = vpop.permute.xlu1 %1811  ;;  %v1850_v47 = vpop.permute.xlu0 %1849 }
 0x4d1   : > { %v1814_v2 = vsub.f32 %v4330_v43, %v1812_v21  ;;  %v1852_v12 = vsub.f32 %v4330_v43, %v1850_v47  ;;  %v1740_v21 = vld [vmem:[#allocation7 + $0x40] sm:$0xff] }
 0x4d2   : > { %v1781_v60 = vadd.f32 1.0, %v1780_v54  ;;  %v1800_v3 = vadd.f32 1.0, %v1799_v46 }
 0x4d3   : > { %v4470_v10 = vmul.f32 %v3113_v51, %v1814_v2  ;;  %v4473_v22 = vmul.f32 %v1852_v12, %v4832_v56 }
 0x4d4   : > { %3094 = vrcp.f32 %v1781_v60 }
 0x4d5   : > { %3096 = vrcp.f32 %v1800_v3  ;;  %v1818_v7 = vand.u32 2147483647, %v4470_v10  ;;  %v1856_v8 = vand.u32 2147483647, %v4473_v22  ;;  %v1831_v50 = vpop.permute.xlu1 %1830 }
 0x4d6   : > { %v1833_v38 = vsub.f32 %v4330_v43, %v1831_v50 }
 0x4d7   : > { %v1819_v55 = vadd.f32 1.0, %v1818_v7  ;;  %v1857_v42 = vadd.f32 1.0, %v1856_v8 }
 0x4d8   : > { %v4478_v25 = vmul.f32 %v3114_v40, %v1833_v38 }
 0x4d9   : > { %v3091_v32 = vpop.eup %3090  ;;  %3098 = vrcp.f32 %v1819_v55 }
 0x4da   : > { %v3093_v15 = vpop.eup %3092  ;;  %v1764_v36 = vmul.f32 %v3091_v32, %v1762_v18  ;;  %3100 = vrcp.f32 %v1857_v42  ;;  %v1837_v13 = vand.u32 2147483647, %v4478_v25  ;;  %v1869_v58 = vpop.permute.xlu1 %1868 }
 0x4db   : > { %v1745_v41 = vmul.f32 %v3093_v15, %v1743_v19  ;;  %v1871_v11 = vsub.f32 %v4330_v43, %v1869_v58 }
 0x4dc   : > { %v1765_v33 = vsub.f32 2.0, %v1764_v36  ;;  %v1838_v49 = vadd.f32 1.0, %v1837_v13  ;;  %v1797_v13 = vld [vmem:[#allocation7 + $0x58] sm:$0xff] }
 0x4dd   : > { %v1746_v20 = vsub.f32 2.0, %v1745_v41  ;;  %v4483_v29 = vmul.f32 %v1871_v11, %v4833_v31 }
 0x4de   : > { %v3095_v14 = vpop.eup %3094  ;;  %v1766_v1 = vmul.f32 %v3091_v32, %v1765_v33  ;;  %3102 = vrcp.f32 %v1838_v49 }
 0x4df   : > { %v3097_v9 = vpop.eup %3096  ;;  %v1747_v16 = vmul.f32 %v3093_v15, %v1746_v20  ;;  %v1783_v44 = vmul.f32 %v3095_v14, %v1781_v60  ;;  %v1875_v62 = vand.u32 2147483647, %v4483_v29 }
 0x4e0   : > { %v1767_v18 = vmul.f32 %v1766_v1, %v1760_v52  ;;  %v1802_v59 = vmul.f32 %v3097_v9, %v1800_v3  ;;  %v1816_v1 = vld [vmem:[#allocation7 + $0x60] sm:$0xff] }
 0x4e1   : > { %v1748_v19 = vmul.f32 %v1747_v16, %v1741_v63  ;;  %v1784_v54 = vsub.f32 2.0, %v1783_v44  ;;  %v1876_v43 = vadd.f32 1.0, %v1875_v62  ;;  %v1778_v63 = vld [vmem:[#allocation7 + $0x50] sm:$0xff] }
 0x4e2   : > { %v1768_v46 = vmul.f32 0.25, %v1767_v18  ;;  %v1803_v47 = vsub.f32 2.0, %v1802_v59  ;;  %v1854_v44 = vld [vmem:[#allocation7 + $0x70] sm:$0xff] }
 0x4e3   : > { %v3099_v2 = vpop.eup %3098  ;;  %v1749_v12 = vmul.f32 0.25, %v1748_v19  ;;  %v1785_v51 = vmul.f32 %v3095_v14, %v1784_v54  ;;  %3104 = vrcp.f32 %v1876_v43 }
 0x4e4   : > { %v3101_v56 = vpop.eup %3100  ;;  %v1769_v7 = vadd.f32 %v1768_v46, %v1759_v57  ;;  %v1804_v8 = vmul.f32 %v3097_v9, %v1803_v47  ;;  %v1821_v50 = vmul.f32 %v3099_v2, %v1819_v55 }
 0x4e5   : > { %v1750_v60 = vadd.f32 %v1749_v12, %v1740_v21  ;;  %v1786_v38 = vmul.f32 %v1785_v51, %v4462_v37  ;;  %v1859_v52 = vmul.f32 %v3101_v56, %v1857_v42  ;;  %v1835_v21 = vld [vmem:[#allocation7 + $0x68] sm:$0xff] }
 0x4e6   : > { %v1770_v3 = vmul.f32 %v1769_v7, %v4336_v5  ;;  %v1805_v40 = vmul.f32 %v1804_v8, %v4464_v0  ;;  %v1822_v32 = vsub.f32 2.0, %v1821_v50  ;;  %v1873_v8 = vld [vmem:[#allocation7 + $0x78] sm:$0xff] }
 0x4e7   : > { %v1751_v15 = vmul.f32 %v1750_v60, %v4332_v27  ;;  %v1787_v36 = vmul.f32 0.25, %v1786_v38  ;;  %v1860_v58 = vsub.f32 2.0, %v1859_v52 }
 0x4e8   : > { %v3103_v41 = vpop.eup %3102  ;;  %v1806_v11 = vmul.f32 0.25, %v1805_v40  ;;  %v1823_v33 = vmul.f32 %v3099_v2, %v1822_v32 }
 0x4e9   : > { %v1771_v20 = vadd.f32 %v1770_v3, %v1751_v15  ;;  %v1788_v55 = vadd.f32 %v1787_v36, %v1778_v63  ;;  %v1861_v31 = vmul.f32 %v3101_v56, %v1860_v58  ;;  %v1840_v14 = vmul.f32 %v3103_v41, %v1838_v49 }
 0x4ea   : > { %v1807_v37 = vadd.f32 %v1806_v11, %v1797_v13  ;;  %v1824_v42 = vmul.f32 %v1823_v33, %v4470_v10 }
 0x4eb   : > { %v1789_v5 = vmul.f32 %v1788_v55, %v4413_v4  ;;  %v1862_v0 = vmul.f32 %v1861_v31, %v4473_v22  ;;  %v1841_v9 = vsub.f32 2.0, %v1840_v14 }
 0x4ec   : > { %v1808_v27 = vmul.f32 %v1807_v37, %v4420_v34  ;;  %v1825_v16 = vmul.f32 0.25, %v1824_v42 }
 0x4ed   : > { %v3105_v62 = vpop.eup %3104  ;;  %v1790_v18 = vadd.f32 %v1789_v5, %v1771_v20  ;;  %v1863_v59 = vmul.f32 0.25, %v1862_v0  ;;  %v1842_v57 = vmul.f32 %v3103_v41, %v1841_v9 }
 0x4ee   : > { %v1826_v19 = vadd.f32 %v1825_v16, %v1816_v1  ;;  %v1878_v54 = vmul.f32 %v3105_v62, %v1876_v43 }
 0x4ef   : > { %v1809_v49 = vadd.f32 %v1808_v27, %v1790_v18  ;;  %v1864_v46 = vadd.f32 %v1863_v59, %v1854_v44  ;;  %v1843_v10 = vmul.f32 %v1842_v57, %v4478_v25 }
 0x4f0   : > { %v1827_v4 = vmul.f32 %v1826_v19, %v4415_v48  ;;  %v1879_v47 = vsub.f32 2.0, %v1878_v54 }
 0x4f1   : > { %v1865_v22 = vmul.f32 %v1864_v46, %v4451_v45  ;;  %v1844_v2 = vmul.f32 0.25, %v1843_v10 }
 0x4f2   : > { %v1828_v34 = vadd.f32 %v1827_v4, %v1809_v49  ;;  %v1880_v12 = vmul.f32 %v3105_v62, %v1879_v47 }
 0x4f3   : > { %v1845_v51 = vadd.f32 %v1844_v2, %v1835_v21 }
 0x4f4   : > { %v1881_v56 = vmul.f32 %v1880_v12, %v4483_v29 }
 0x4f5   : > { %v1846_v7 = vmul.f32 %v1845_v51, %v4422_v6 }
 0x4f6   : > { %v1882_v43 = vmul.f32 0.25, %v1881_v56 }
 0x4f7   : > { %v1847_v50 = vadd.f32 %v1846_v7, %v1828_v34 }
 0x4f8   : > { %v1883_v60 = vadd.f32 %v1882_v43, %v1873_v8 }
 0x4f9   : > { %v1866_v38 = vadd.f32 %v1865_v22, %v1847_v50 }
 0x4fa   : > { %v1884_v25 = vmul.f32 %v1883_v60, %v4453_v53 }
 0x4fc   : > { %v1885_v48 = vadd.f32 %v1884_v25, %v1866_v38 }
 0x4fe   : > { %v1907_v52 = vadd.f32 %v4417_v24, %v1885_v48  ;;  %v2334_v24 = vld [vmem:[%s4572_s7 + $0x1] ss:$0 sm:$0xff] }
 0x500   : > { %v1929_v45 = vadd.f32 %v4424_v28, %v1907_v52 }
 0x502   : > { %v1951_v3 = vadd.f32 %v4427_v61, %v1929_v45  ;;  %v2336_v61 = vld [vmem:[%s4573_s8 + $0x1] ss:$0 sm:$0xff] }
 0x504   : > { %v1973_v29 = vadd.f32 %v4431_v26, %v1951_v3 }
 0x506   : > { %v1995_v6 = vadd.f32 %v4435_v23, %v1973_v29 }
 0x508   : > { %v2017_v63 = vadd.f32 %v4439_v39, %v1995_v6 }
 0x50a   : > { %v2039_v40 = vadd.f32 %v4443_v35, %v2017_v63 }
 0x50c   : > { %v2061_v32 = vadd.f32 %v4445_v30, %v2039_v40 }
 0x50e   : > { %2547 = vmatmul.mubr.f32.vlgmr.msra.gmra.mrb[10].mxu1 %v2061_v32 }
 0x5e1   : > { %v2145_v28 = vpop.f32.mrb[10].mxu1 }
 0x5e2   : > { %v2157_v26 = vmul.f32 %v2334_v24, %v2145_v28  ;;  %v2548_v23 = vpop.f32.mrb[11].mxu1 }
 0x5e4   : > { %v2166_v53 = vadd.f32 %v2336_v61, %v2157_v26 }
 0x5e6   : > { %3106 = vtanh.f32 %v2166_v53 }
 0x5f0   : > { %v3107_v39 = vpop.eup %3106 }
 0x5f1   : > { %v2168_v35 = vadd.f32 %v4224_v17, %v3107_v39 }
 0x5f3   : > { %2169 = vst [vmem:[%s434_s18] sm:$0xff] %v2168_v35 }
 0x5f4   : > { %3326 = shalt.err (!%p3323_p3)
}
 0x5f5   : > { %s3327_s22 = scalar_lea.hbm %s4521_s27, 128  ;;  %s3331_s13 = scalar_lea.hbm %s4834_s9, 256 }
 0x5f6   : > { %p3328_p4 = scmp.ne.s32.totalorder %s4521_s27, %s3327_s22  ;;  %p3332_p8 = scmp.lt.u32.totalorder %s4521_s27, %s4834_s9 }
 0x5f7   : > { %p3333_p5 = scmp.lt.u32.totalorder %s3331_s13, %s3327_s22  ;;  %p3335_p6 = scmp.lt.u32.totalorder %s3327_s22, %s4521_s27 }
 0x5f8   : > { %p3329_p10 = pnand %p3328_p4, %p4835_p9 }
 0x5f9   : > { %p3334_p7 = por %p3333_p5, %p3332_p8 }
 0x5fa   : > { %p3330_p11 = pneg %p3329_p10 }
 0x5fb   : > { %p3336_p12 = por %p3335_p6, %p3334_p7 }
 0x5fd   : > { %p3337_p1 = pnand %p3336_p12, %p3330_p11 }
 0x5ff   : > { %3340 = shalt.err (!%p3337_p1)
}
 0x600   : > { %2927 = dma.vmem_to_hbm [thread:$0]  (%p4835_p9), %s4523_s19, 128, %s4521_s27, %s2171_s14  }
 0x601 PF: > { %s2196_s16 = sand.u32 1, %s3379_s30   ;;  %p4836_p13 = scmp.ne.s32.totalorder %s4676_s29, 0 }
 0x602   : > { %p4837_p0 = scmp.ge.s32.totalorder %s3391_s12, 2  ;;  %s2197_s23 = scalar_lea.sflag [#allocation4], %s2196_s16 }
 0x604   : > { %p2953_p2 = pnand %p4837_p0, %p4836_p13 }
 0x606   : > { %3374 = dma.done.wait (!%p2953_p2), %s2197_s23, 128  }
 0x607   : > { %3376 = vsyncadd (!%p2953_p2), %s2197_s23, 4294967168  ;;  %p25_p3 = scmp.ge.s32.totalorder %s3657_s21, 4   ;;  %s4838_s30 = smov %s3383_s10 }
 0x608   : > { %s4839_s10 = smov %s3387_s11  ;;  %s4840_s11 = smov %s3668_s24 }
 0x609   : > { %s4841_s12 = smov %s3657_s21  ;;  %27 = sbr.rel (!%p25_p3) target bundleno = 11 (0xb), region = 165 }
 0x610   :  { %2202 = vsyncpa [#allocation3], 1 }
 0x611   :  { %2204 = vsyncpa [#allocation3 + $0x1], 1 }
 0x612   :  { %2205 = vsyncpa [#allocation6], 1 }
 0x613   :  { %2206 = vsyncpa [#allocation9], 1 }
 0x614   :  { %2207 = vsyncpa [#allocation12], 1 }
 0x615   :  { %2208 = vsyncpa [#allocation4], 1 }
 0x616   :  { %2210 = vsyncpa [#allocation4 + $0x1], 1 }

</bundles_post_ra>
